<compile_context>
chip_gen: v6e
topology: v6e:2x2x1
jax: 0.10.0
libtpu: 0.0.40
codegen_flags: <defaults>
</compile_context>

<pallas_src>
import numpy as np

import jax
import jax.numpy as jnp
from jax.experimental import pallas as pl
from jax.experimental.pallas import tpu as pltpu

# Model hyperparameters (small, synthetic).
D_MODEL = 32
N_HEADS = 4
HEAD_DIM = D_MODEL // N_HEADS
D_FF = 64
N_LAYERS = 2
EPS = 1e-5
NEG_INF = -1e30

# ---------------------------------------------------------------------------
# Packed-parameter slab layout (per layer): all regions start at lane 0 and at
# an 8-aligned row, so every in-kernel slice is a free static view.
# ---------------------------------------------------------------------------
ROW_SA_QK = 0                                  # (H*D, D)  fused scale*Wq_h@Wk_h^T, head-stacked
ROW_SA_VO = ROW_SA_QK + N_HEADS * D_MODEL      # (H*D, D)  fused Wv_h@Wo_h, head-stacked
ROW_CA_QK = ROW_SA_VO + N_HEADS * D_MODEL
ROW_CA_VO = ROW_CA_QK + N_HEADS * D_MODEL
ROW_FF1 = ROW_CA_VO + N_HEADS * D_MODEL        # (D, D_FF)
ROW_FF2 = ROW_FF1 + D_MODEL                    # (D_FF, D)
ROW_VEC = ROW_FF2 + D_FF                       # small (1, ·) vectors region

VEC_SA_BQK = 0                                 # H rows: fused per-head Q bias
VEC_SA_BO = N_HEADS                            # 1 row : out bias (+ folded V bias)
VEC_CA_BQK = 8
VEC_CA_BO = VEC_CA_BQK + N_HEADS
VEC_BFF1 = 16                                  # (1, D_FF)
VEC_BFF2 = 17                                  # (1, D)
VEC_LN = 24                                    # 6 rows: g1, b1, g2, b2, g3, b3
N_VEC_ROWS = 32

P_ROWS = ROW_VEC + N_VEC_ROWS                  # 640
W_LANES = max(D_MODEL, D_FF)                   # 64


def _layernorm(x, gamma, beta):
    mu = jnp.mean(x, axis=-1, keepdims=True)
    var = jnp.mean((x - mu) ** 2, axis=-1, keepdims=True)
    return (x - mu) * jax.lax.rsqrt(var + EPS) * gamma + beta


def decoder_stack_kernel(x_ref, mem_ref, mask_ref, w_ref, o_ref):
    R = x_ref.shape[0]          # decoder rows   (batch folded into sublanes)
    M = mem_ref.shape[0]        # memory rows
    n_layers = w_ref.shape[0]

    x = x_ref[...]                       # (R, D)
    mem = mem_ref[...]                   # (M, D)
    self_bias = mask_ref[0][:, 0:R]      # (R, R)  block-diag + causal additive mask
    cross_bias = mask_ref[1][:, 0:M]     # (R, M)  block-diag additive mask
    memT = mem.T                         # (D, M) — one transpose for the whole kernel

    def wmat(l, r0, nrows, ncols):
        return w_ref[l, r0:r0 + nrows, 0:ncols]

    def wvec(l, vrow, ncols):
        r0 = ROW_VEC + vrow
        return w_ref[l, r0:r0 + 1, 0:ncols]

    def attention(l, q_src, kv_src, kv_srcT, bias, qk_row, vo_row, bq_vrow, bo_vrow):
        # Per head:  p_h = softmax(q_src @ Wqk_h @ kv_src^T + bqk_h @ kv_src^T + bias)
        #            out += p_h @ (kv_src @ Wvo_h)
        # All per-head weights are 8-aligned row blocks of the slab; no lane
        # slicing of activations and no per-head transposes.
        acc = None
        for h in range(N_HEADS):
            wqk = wmat(l, qk_row + h * D_MODEL, D_MODEL, D_MODEL)      # (D, D)
            t = jnp.dot(q_src, wqk, preferred_element_type=jnp.float32)
            t = t + wvec(l, bq_vrow + h, D_MODEL)
            s = jnp.dot(t, kv_srcT, preferred_element_type=jnp.float32) + bias
            s = s - jnp.max(s, axis=-1, keepdims=True)
            p = jnp.exp(s)
            p = p * pl.reciprocal(jnp.sum(p, axis=-1, keepdims=True), approx=True)
            wvo = wmat(l, vo_row + h * D_MODEL, D_MODEL, D_MODEL)      # (D, D)
            vo = jnp.dot(kv_src, wvo, preferred_element_type=jnp.float32)
            contrib = jnp.dot(p, vo, preferred_element_type=jnp.float32)
            acc = contrib if acc is None else acc + contrib
        return acc + wvec(l, bo_vrow, D_MODEL)

    for l in range(n_layers):    # static unroll (fine for L=2; use a grid/fori for deep stacks)
        # ---- causal self-attention ----
        xT = x.T                 # one transpose per layer, shared by all heads
        sa = attention(l, x, x, xT, self_bias,
                       ROW_SA_QK, ROW_SA_VO, VEC_SA_BQK, VEC_SA_BO)
        x = _layernorm(x + sa, wvec(l, VEC_LN + 0, D_MODEL), wvec(l, VEC_LN + 1, D_MODEL))

        # ---- cross-attention over encoder memory ----
        ca = attention(l, x, mem, memT, cross_bias,
                       ROW_CA_QK, ROW_CA_VO, VEC_CA_BQK, VEC_CA_BO)
        x = _layernorm(x + ca, wvec(l, VEC_LN + 2, D_MODEL), wvec(l, VEC_LN + 3, D_MODEL))

        # ---- feed-forward (ReLU) ----
        ff = jnp.dot(x, wmat(l, ROW_FF1, D_MODEL, D_FF),
                     preferred_element_type=jnp.float32)
        ff = jnp.maximum(ff + wvec(l, VEC_BFF1, D_FF), 0.0)
        ff = jnp.dot(ff, wmat(l, ROW_FF2, D_FF, D_MODEL),
                     preferred_element_type=jnp.float32)
        ff = ff + wvec(l, VEC_BFF2, D_MODEL)
        x = _layernorm(x + ff, wvec(l, VEC_LN + 4, D_MODEL), wvec(l, VEC_LN + 5, D_MODEL))

    o_ref[...] = x.astype(o_ref.dtype)


def build_masks(batch, seq, seq_mem):
    """Static additive masks, built on the host (no in-kernel iota / int-div)."""
    R, M = batch * seq, batch * seq_mem
    r = np.arange(R)
    c = np.arange(M)
    self_ok = ((r[:, None] // seq) == (r[None, :] // seq)) & (r[None, :] <= r[:, None])
    cross_ok = (r[:, None] // seq) == (c[None, :] // seq_mem)
    K = max(R, M)
    masks = np.full((2, R, K), NEG_INF, np.float32)
    masks[0, :, :R] = np.where(self_ok, 0.0, NEG_INF)
    masks[1, :, :M] = np.where(cross_ok, 0.0, NEG_INF)
    return jnp.asarray(masks)


def transformer_decoder(x, memory, wslab):
    """TransformerDecoder.forward: all layers + whole batch in one kernel call."""
    B, S, D = x.shape
    Bm, S_mem, Dm = memory.shape
    assert B == Bm and D == D_MODEL and Dm == D_MODEL

    x2 = x.reshape(B * S, D)
    mem2 = memory.reshape(B * S_mem, D)
    masks = build_masks(B, S, S_mem)

    # Entire problem fits in VMEM -> single un-gridded invocation with
    # full-array VMEM blocks (no grid steps, no inter-layer HBM traffic).
    vmem_spec = pl.BlockSpec(memory_space=pltpu.MemorySpace.VMEM)
    out = pl.pallas_call(
        decoder_stack_kernel,
        out_shape=jax.ShapeDtypeStruct((B * S, D), x.dtype),
        in_specs=[vmem_spec] * 4,
        out_specs=vmem_spec,
        input_output_aliases={0: 0},   # reuse x2's HBM buffer for the output
    )(x2, mem2, masks, wslab)
    return out.reshape(B, S, D)


# ---------------------------------------------------------------------------
# Parameter initialization (natural form, used by the reference) and packing.
# ---------------------------------------------------------------------------
def init_layer_params(key):
    D = D_MODEL
    ks = jax.random.split(key, 32)
    it = iter(ks)

    def w(din, dout):
        return jax.random.normal(next(it), (din, dout), jnp.float32) / jnp.sqrt(
            jnp.float32(din))

    def b(dout):
        return 0.05 * jax.random.normal(next(it), (dout,), jnp.float32)

    p = {}
    for prefix in ("sa", "ca"):
        p[f"w_{prefix}_q"] = w(D, D)
        p[f"w_{prefix}_k"] = w(D, D)
        p[f"w_{prefix}_v"] = w(D, D)
        p[f"w_{prefix}_o"] = w(D, D)
        p[f"b_{prefix}_q"] = b(D)
        p[f"b_{prefix}_k"] = b(D)
        p[f"b_{prefix}_v"] = b(D)
        p[f"b_{prefix}_o"] = b(D)
    p["w_ff1"] = w(D, D_FF)
    p["b_ff1"] = b(D_FF)
    p["w_ff2"] = w(D_FF, D)
    p["b_ff2"] = b(D)
    for i in ("1", "2", "3"):
        p[f"ln_g{i}"] = 1.0 + 0.1 * jax.random.normal(next(it), (D,), jnp.float32)
        p[f"ln_b{i}"] = 0.1 * jax.random.normal(next(it), (D,), jnp.float32)
    return p


def init_params(key):
    per_layer = [init_layer_params(k) for k in jax.random.split(key, N_LAYERS)]
    return {name: jnp.stack([p[name] for p in per_layer], axis=0)
            for name in per_layer[0]}


def pack_params(params):
    """Pack natural parameters into one (L, P_ROWS, W_LANES) slab (host-side)."""
    scale = 1.0 / float(HEAD_DIM) ** 0.5
    pnp = {k: np.asarray(v, np.float32) for k, v in params.items()}
    slab = np.zeros((N_LAYERS, P_ROWS, W_LANES), np.float32)

    for l in range(N_LAYERS):
        def put(r0, arr):
            arr = np.asarray(arr, np.float32)
            slab[l, r0:r0 + arr.shape[0], :arr.shape[1]] = arr

        for prefix, qk_row, vo_row, bq_vrow, bo_vrow in (
                ("sa", ROW_SA_QK, ROW_SA_VO, VEC_SA_BQK, VEC_SA_BO),
                ("ca", ROW_CA_QK, ROW_CA_VO, VEC_CA_BQK, VEC_CA_BO)):
            wq = pnp[f"w_{prefix}_q"][l]
            wk = pnp[f"w_{prefix}_k"][l]
            wv = pnp[f"w_{prefix}_v"][l]
            wo = pnp[f"w_{prefix}_o"][l]
            bq = pnp[f"b_{prefix}_q"][l]
            bv = pnp[f"b_{prefix}_v"][l]
            bo = pnp[f"b_{prefix}_o"][l]
            # NOTE: the K bias (b_{prefix}_k) only shifts every score row by a
            # per-query constant, to which softmax is exactly invariant, so it
            # is dropped from the packed form.
            for h in range(N_HEADS):
                sl = slice(h * HEAD_DIM, (h + 1) * HEAD_DIM)
                put(qk_row + h * D_MODEL, scale * (wq[:, sl] @ wk[:, sl].T))
                put(ROW_VEC + bq_vrow + h, (scale * (bq[sl] @ wk[:, sl].T))[None, :])
                put(vo_row + h * D_MODEL, wv[:, sl] @ wo[sl, :])
            # V bias folds into the output bias (softmax rows sum to 1).
            put(ROW_VEC + bo_vrow, (bo + bv @ wo)[None, :])

        put(ROW_FF1, pnp["w_ff1"][l])
        put(ROW_FF2, pnp["w_ff2"][l])
        put(ROW_VEC + VEC_BFF1, pnp["b_ff1"][l][None, :])
        put(ROW_VEC + VEC_BFF2, pnp["b_ff2"][l][None, :])
        for i, name in enumerate(("ln_g1", "ln_b1", "ln_g2", "ln_b2", "ln_g3", "ln_b3")):
            put(ROW_VEC + VEC_LN + i, pnp[name][l][None, :])

    return jnp.asarray(slab)


# ---------------------------------------------------------------------------
# Pure-JAX reference (per-batch, per-head, natural parameters) for validation.
# ---------------------------------------------------------------------------
def reference_decoder(x, memory, params):
    B, S, D = x.shape
    H, Hd = N_HEADS, HEAD_DIM
    scale = 1.0 / float(Hd) ** 0.5

    def ln_fn(y, g, b):
        mu = jnp.mean(y, axis=-1, keepdims=True)
        var = jnp.mean((y - mu) ** 2, axis=-1, keepdims=True)
        return (y - mu) * jax.lax.rsqrt(var + EPS) * g + b

    def mha(q_src, kv_src, wq, bq, wk, bk, wv, bv, wo, bo, mask):
        q = q_src @ wq + bq
        k = kv_src @ wk + bk
        v = kv_src @ wv + bv
        Sq, Sk = q.shape[1], k.shape[1]
        qh = q.reshape(B, Sq, H, Hd)
        kh = k.reshape(B, Sk, H, Hd)
        vh = v.reshape(B, Sk, H, Hd)
        s = jnp.einsum("bqhd,bkhd->bhqk", qh, kh) * scale
        if mask is not None:
            s = jnp.where(mask[None, None], s, NEG_INF)
        p = jax.nn.softmax(s, axis=-1)
        o = jnp.einsum("bhqk,bkhd->bqhd", p, vh).reshape(B, Sq, D)
        return o @ wo + bo

    causal = jnp.arange(S)[:, None] >= jnp.arange(S)[None, :]
    out = x
    for l in range(N_LAYERS):
        g = lambda n: params[n][l]
        sa = mha(out, out, g("w_sa_q"), g("b_sa_q"), g("w_sa_k"), g("b_sa_k"),
                 g("w_sa_v"), g("b_sa_v"), g("w_sa_o"), g("b_sa_o"), causal)
        out = ln_fn(out + sa, g("ln_g1"), g("ln_b1"))

        ca = mha(out, memory, g("w_ca_q"), g("b_ca_q"), g("w_ca_k"), g("b_ca_k"),
                 g("w_ca_v"), g("b_ca_v"), g("w_ca_o"), g("b_ca_o"), None)
        out = ln_fn(out + ca, g("ln_g2"), g("ln_b2"))

        ff = jnp.maximum(out @ g("w_ff1") + g("b_ff1"), 0.0)
        ff = ff @ g("w_ff2") + g("b_ff2")
        out = ln_fn(out + ff, g("ln_g3"), g("ln_b3"))
    return out


if __name__ == "__main__":
    key = jax.random.PRNGKey(0)
    kx, km, kp = jax.random.split(key, 3)

    B, S, S_MEM = 2, 8, 8
    x = jax.random.normal(kx, (B, S, D_MODEL), jnp.float32)
    memory = jax.random.normal(km, (B, S_MEM, D_MODEL), jnp.float32)
    params = init_params(kp)
    wslab = pack_params(params)

    out = transformer_decoder(x, memory, wslab)
    out = jax.block_until_ready(out)

    assert out.shape == (B, S, D_MODEL)
    assert bool(jnp.all(jnp.isfinite(out)))

    ref = reference_decoder(x, memory, params)
    max_err = float(jnp.max(jnp.abs(out - ref)))
    assert max_err < 5e-2, f"kernel/reference mismatch: max abs err {max_err}"

    print("KERNEL_OK")
</pallas_src>

<mosaic_0001>
module attributes {stable_mosaic.version = 11 : i64} {
  func.func @decoder_stack_kernel(%arg0: memref<16x32xf32, #tpu.memory_space<vmem>>, %arg1: memref<16x32xf32, #tpu.memory_space<vmem>>, %arg2: memref<2x16x16xf32, #tpu.memory_space<vmem>>, %arg3: memref<2x640x64xf32, #tpu.memory_space<vmem>>, %arg4: memref<16x32xf32, #tpu.memory_space<vmem>>) attributes {dimension_semantics = [], scalar_prefetch = 0 : i64, scratch_operands = 0 : i64, tpu.core_type = #tpu.core_type<tc>} {
    %c0 = arith.constant 0 : index
    %c0_0 = arith.constant 0 : index
    %0 = vector.load %arg0[%c0, %c0_0] : memref<16x32xf32, #tpu.memory_space<vmem>>, vector<16x32xf32>
    %c0_1 = arith.constant 0 : index
    %c0_2 = arith.constant 0 : index
    %1 = vector.load %arg1[%c0_1, %c0_2] : memref<16x32xf32, #tpu.memory_space<vmem>>, vector<16x32xf32>
    %c0_3 = arith.constant 0 : index
    %c0_4 = arith.constant 0 : index
    %c0_5 = arith.constant 0 : index
    %2 = vector.load %arg2[%c0_3, %c0_4, %c0_5] : memref<2x16x16xf32, #tpu.memory_space<vmem>>, vector<1x16x16xf32>
    %3 = vector.shape_cast %2 : vector<1x16x16xf32> to vector<16x16xf32>
    %c1 = arith.constant 1 : index
    %c0_6 = arith.constant 0 : index
    %c0_7 = arith.constant 0 : index
    %4 = vector.load %arg2[%c1, %c0_6, %c0_7] : memref<2x16x16xf32, #tpu.memory_space<vmem>>, vector<1x16x16xf32>
    %5 = vector.shape_cast %4 : vector<1x16x16xf32> to vector<16x16xf32>
    %6 = tpu.transpose %1, [1, 0] : vector<16x32xf32> -> vector<32x16xf32>
    %7 = tpu.transpose %0, [1, 0] : vector<16x32xf32> -> vector<32x16xf32>
    %c0_8 = arith.constant 0 : index
    %c0_9 = arith.constant 0 : index
    %c0_10 = arith.constant 0 : index
    %8 = vector.load %arg3[%c0_8, %c0_9, %c0_10] : memref<2x640x64xf32, #tpu.memory_space<vmem>>, vector<1x32x32xf32>
    %9 = vector.shape_cast %8 : vector<1x32x32xf32> to vector<32x32xf32>
    %cst = arith.constant dense<0.000000e+00> : vector<16x32xf32>
    %10 = tpu.matmul %0, %9, %cst {dimension_numbers = #tpu.dot_dimension_numbers<[1], [0], [0], [1], [0, 0, 1, 1], [], []>} : vector<16x32xf32>, vector<32x32xf32>, vector<16x32xf32> -> vector<16x32xf32>
    %c0_11 = arith.constant 0 : index
    %c608 = arith.constant 608 : index
    %c0_12 = arith.constant 0 : index
    %11 = vector.load %arg3[%c0_11, %c608, %c0_12] : memref<2x640x64xf32, #tpu.memory_space<vmem>>, vector<1x1x32xf32>
    %12 = vector.shape_cast %11 : vector<1x1x32xf32> to vector<1x32xf32>
    %13 = vector.broadcast %12 : vector<1x32xf32> to vector<16x32xf32>
    %14 = arith.addf %10, %13 : vector<16x32xf32>
    %cst_13 = arith.constant dense<0.000000e+00> : vector<16x16xf32>
    %15 = tpu.matmul %14, %7, %cst_13 {dimension_numbers = #tpu.dot_dimension_numbers<[1], [0], [0], [1], [0, 0, 1, 1], [], []>} : vector<16x32xf32>, vector<32x16xf32>, vector<16x16xf32> -> vector<16x16xf32>
    %16 = arith.addf %15, %3 : vector<16x16xf32>
    %cst_14 = arith.constant dense<0xFF800000> : vector<16xf32>
    %17 = vector.multi_reduction <maximumf>, %16, %cst_14 [1] : vector<16x16xf32> to vector<16xf32>
    %18 = vector.shape_cast %17 : vector<16xf32> to vector<16x1xf32>
    %19 = vector.broadcast %18 : vector<16x1xf32> to vector<16x16xf32>
    %20 = arith.subf %16, %19 : vector<16x16xf32>
    %21 = math.exp %20 : vector<16x16xf32>
    %cst_15 = arith.constant dense<0.000000e+00> : vector<16xf32>
    %22 = vector.multi_reduction <add>, %21, %cst_15 [1] : vector<16x16xf32> to vector<16xf32>
    %23 = vector.shape_cast %22 : vector<16xf32> to vector<16x1xf32>
    %24 = tpu.reciprocal %23 {approx = true} : vector<16x1xf32> -> vector<16x1xf32>
    %25 = vector.broadcast %24 : vector<16x1xf32> to vector<16x16xf32>
    %26 = arith.mulf %21, %25 : vector<16x16xf32>
    %c0_16 = arith.constant 0 : index
    %c128 = arith.constant 128 : index
    %c0_17 = arith.constant 0 : index
    %27 = vector.load %arg3[%c0_16, %c128, %c0_17] : memref<2x640x64xf32, #tpu.memory_space<vmem>>, vector<1x32x32xf32>
    %28 = vector.shape_cast %27 : vector<1x32x32xf32> to vector<32x32xf32>
    %cst_18 = arith.constant dense<0.000000e+00> : vector<16x32xf32>
    %29 = tpu.matmul %0, %28, %cst_18 {dimension_numbers = #tpu.dot_dimension_numbers<[1], [0], [0], [1], [0, 0, 1, 1], [], []>} : vector<16x32xf32>, vector<32x32xf32>, vector<16x32xf32> -> vector<16x32xf32>
    %cst_19 = arith.constant dense<0.000000e+00> : vector<16x32xf32>
    %30 = tpu.matmul %26, %29, %cst_19 {dimension_numbers = #tpu.dot_dimension_numbers<[1], [0], [0], [1], [0, 0, 1, 1], [], []>} : vector<16x16xf32>, vector<16x32xf32>, vector<16x32xf32> -> vector<16x32xf32>
    %c0_20 = arith.constant 0 : index
    %c32 = arith.constant 32 : index
    %c0_21 = arith.constant 0 : index
    %31 = vector.load %arg3[%c0_20, %c32, %c0_21] : memref<2x640x64xf32, #tpu.memory_space<vmem>>, vector<1x32x32xf32>
    %32 = vector.shape_cast %31 : vector<1x32x32xf32> to vector<32x32xf32>
    %cst_22 = arith.constant dense<0.000000e+00> : vector<16x32xf32>
    %33 = tpu.matmul %0, %32, %cst_22 {dimension_numbers = #tpu.dot_dimension_numbers<[1], [0], [0], [1], [0, 0, 1, 1], [], []>} : vector<16x32xf32>, vector<32x32xf32>, vector<16x32xf32> -> vector<16x32xf32>
    %c0_23 = arith.constant 0 : index
    %c609 = arith.constant 609 : index
    %c0_24 = arith.constant 0 : index
    %34 = vector.load %arg3[%c0_23, %c609, %c0_24] : memref<2x640x64xf32, #tpu.memory_space<vmem>>, vector<1x1x32xf32>
    %35 = vector.shape_cast %34 : vector<1x1x32xf32> to vector<1x32xf32>
    %36 = vector.broadcast %35 : vector<1x32xf32> to vector<16x32xf32>
    %37 = arith.addf %33, %36 : vector<16x32xf32>
    %cst_25 = arith.constant dense<0.000000e+00> : vector<16x16xf32>
    %38 = tpu.matmul %37, %7, %cst_25 {dimension_numbers = #tpu.dot_dimension_numbers<[1], [0], [0], [1], [0, 0, 1, 1], [], []>} : vector<16x32xf32>, vector<32x16xf32>, vector<16x16xf32> -> vector<16x16xf32>
    %39 = arith.addf %38, %3 : vector<16x16xf32>
    %cst_26 = arith.constant dense<0xFF800000> : vector<16xf32>
    %40 = vector.multi_reduction <maximumf>, %39, %cst_26 [1] : vector<16x16xf32> to vector<16xf32>
    %41 = vector.shape_cast %40 : vector<16xf32> to vector<16x1xf32>
    %42 = vector.broadcast %41 : vector<16x1xf32> to vector<16x16xf32>
    %43 = arith.subf %39, %42 : vector<16x16xf32>
    %44 = math.exp %43 : vector<16x16xf32>
    %cst_27 = arith.constant dense<0.000000e+00> : vector<16xf32>
    %45 = vector.multi_reduction <add>, %44, %cst_27 [1] : vector<16x16xf32> to vector<16xf32>
    %46 = vector.shape_cast %45 : vector<16xf32> to vector<16x1xf32>
    %47 = tpu.reciprocal %46 {approx = true} : vector<16x1xf32> -> vector<16x1xf32>
    %48 = vector.broadcast %47 : vector<16x1xf32> to vector<16x16xf32>
    %49 = arith.mulf %44, %48 : vector<16x16xf32>
    %c0_28 = arith.constant 0 : index
    %c160 = arith.constant 160 : index
    %c0_29 = arith.constant 0 : index
    %50 = vector.load %arg3[%c0_28, %c160, %c0_29] : memref<2x640x64xf32, #tpu.memory_space<vmem>>, vector<1x32x32xf32>
    %51 = vector.shape_cast %50 : vector<1x32x32xf32> to vector<32x32xf32>
    %cst_30 = arith.constant dense<0.000000e+00> : vector<16x32xf32>
    %52 = tpu.matmul %0, %51, %cst_30 {dimension_numbers = #tpu.dot_dimension_numbers<[1], [0], [0], [1], [0, 0, 1, 1], [], []>} : vector<16x32xf32>, vector<32x32xf32>, vector<16x32xf32> -> vector<16x32xf32>
    %cst_31 = arith.constant dense<0.000000e+00> : vector<16x32xf32>
    %53 = tpu.matmul %49, %52, %cst_31 {dimension_numbers = #tpu.dot_dimension_numbers<[1], [0], [0], [1], [0, 0, 1, 1], [], []>} : vector<16x16xf32>, vector<16x32xf32>, vector<16x32xf32> -> vector<16x32xf32>
    %54 = arith.addf %30, %53 : vector<16x32xf32>
    %c0_32 = arith.constant 0 : index
    %c64 = arith.constant 64 : index
    %c0_33 = arith.constant 0 : index
    %55 = vector.load %arg3[%c0_32, %c64, %c0_33] : memref<2x640x64xf32, #tpu.memory_space<vmem>>, vector<1x32x32xf32>
    %56 = vector.shape_cast %55 : vector<1x32x32xf32> to vector<32x32xf32>
    %cst_34 = arith.constant dense<0.000000e+00> : vector<16x32xf32>
    %57 = tpu.matmul %0, %56, %cst_34 {dimension_numbers = #tpu.dot_dimension_numbers<[1], [0], [0], [1], [0, 0, 1, 1], [], []>} : vector<16x32xf32>, vector<32x32xf32>, vector<16x32xf32> -> vector<16x32xf32>
    %c0_35 = arith.constant 0 : index
    %c610 = arith.constant 610 : index
    %c0_36 = arith.constant 0 : index
    %58 = vector.load %arg3[%c0_35, %c610, %c0_36] : memref<2x640x64xf32, #tpu.memory_space<vmem>>, vector<1x1x32xf32>
    %59 = vector.shape_cast %58 : vector<1x1x32xf32> to vector<1x32xf32>
    %60 = vector.broadcast %59 : vector<1x32xf32> to vector<16x32xf32>
    %61 = arith.addf %57, %60 : vector<16x32xf32>
    %cst_37 = arith.constant dense<0.000000e+00> : vector<16x16xf32>
    %62 = tpu.matmul %61, %7, %cst_37 {dimension_numbers = #tpu.dot_dimension_numbers<[1], [0], [0], [1], [0, 0, 1, 1], [], []>} : vector<16x32xf32>, vector<32x16xf32>, vector<16x16xf32> -> vector<16x16xf32>
    %63 = arith.addf %62, %3 : vector<16x16xf32>
    %cst_38 = arith.constant dense<0xFF800000> : vector<16xf32>
    %64 = vector.multi_reduction <maximumf>, %63, %cst_38 [1] : vector<16x16xf32> to vector<16xf32>
    %65 = vector.shape_cast %64 : vector<16xf32> to vector<16x1xf32>
    %66 = vector.broadcast %65 : vector<16x1xf32> to vector<16x16xf32>
    %67 = arith.subf %63, %66 : vector<16x16xf32>
    %68 = math.exp %67 : vector<16x16xf32>
    %cst_39 = arith.constant dense<0.000000e+00> : vector<16xf32>
    %69 = vector.multi_reduction <add>, %68, %cst_39 [1] : vector<16x16xf32> to vector<16xf32>
    %70 = vector.shape_cast %69 : vector<16xf32> to vector<16x1xf32>
    %71 = tpu.reciprocal %70 {approx = true} : vector<16x1xf32> -> vector<16x1xf32>
    %72 = vector.broadcast %71 : vector<16x1xf32> to vector<16x16xf32>
    %73 = arith.mulf %68, %72 : vector<16x16xf32>
    %c0_40 = arith.constant 0 : index
    %c192 = arith.constant 192 : index
    %c0_41 = arith.constant 0 : index
    %74 = vector.load %arg3[%c0_40, %c192, %c0_41] : memref<2x640x64xf32, #tpu.memory_space<vmem>>, vector<1x32x32xf32>
    %75 = vector.shape_cast %74 : vector<1x32x32xf32> to vector<32x32xf32>
    %cst_42 = arith.constant dense<0.000000e+00> : vector<16x32xf32>
    %76 = tpu.matmul %0, %75, %cst_42 {dimension_numbers = #tpu.dot_dimension_numbers<[1], [0], [0], [1], [0, 0, 1, 1], [], []>} : vector<16x32xf32>, vector<32x32xf32>, vector<16x32xf32> -> vector<16x32xf32>
    %cst_43 = arith.constant dense<0.000000e+00> : vector<16x32xf32>
    %77 = tpu.matmul %73, %76, %cst_43 {dimension_numbers = #tpu.dot_dimension_numbers<[1], [0], [0], [1], [0, 0, 1, 1], [], []>} : vector<16x16xf32>, vector<16x32xf32>, vector<16x32xf32> -> vector<16x32xf32>
    %78 = arith.addf %54, %77 : vector<16x32xf32>
    %c0_44 = arith.constant 0 : index
    %c96 = arith.constant 96 : index
    %c0_45 = arith.constant 0 : index
    %79 = vector.load %arg3[%c0_44, %c96, %c0_45] : memref<2x640x64xf32, #tpu.memory_space<vmem>>, vector<1x32x32xf32>
    %80 = vector.shape_cast %79 : vector<1x32x32xf32> to vector<32x32xf32>
    %cst_46 = arith.constant dense<0.000000e+00> : vector<16x32xf32>
    %81 = tpu.matmul %0, %80, %cst_46 {dimension_numbers = #tpu.dot_dimension_numbers<[1], [0], [0], [1], [0, 0, 1, 1], [], []>} : vector<16x32xf32>, vector<32x32xf32>, vector<16x32xf32> -> vector<16x32xf32>
    %c0_47 = arith.constant 0 : index
    %c611 = arith.constant 611 : index
    %c0_48 = arith.constant 0 : index
    %82 = vector.load %arg3[%c0_47, %c611, %c0_48] : memref<2x640x64xf32, #tpu.memory_space<vmem>>, vector<1x1x32xf32>
    %83 = vector.shape_cast %82 : vector<1x1x32xf32> to vector<1x32xf32>
    %84 = vector.broadcast %83 : vector<1x32xf32> to vector<16x32xf32>
    %85 = arith.addf %81, %84 : vector<16x32xf32>
    %cst_49 = arith.constant dense<0.000000e+00> : vector<16x16xf32>
    %86 = tpu.matmul %85, %7, %cst_49 {dimension_numbers = #tpu.dot_dimension_numbers<[1], [0], [0], [1], [0, 0, 1, 1], [], []>} : vector<16x32xf32>, vector<32x16xf32>, vector<16x16xf32> -> vector<16x16xf32>
    %87 = arith.addf %86, %3 : vector<16x16xf32>
    %cst_50 = arith.constant dense<0xFF800000> : vector<16xf32>
    %88 = vector.multi_reduction <maximumf>, %87, %cst_50 [1] : vector<16x16xf32> to vector<16xf32>
    %89 = vector.shape_cast %88 : vector<16xf32> to vector<16x1xf32>
    %90 = vector.broadcast %89 : vector<16x1xf32> to vector<16x16xf32>
    %91 = arith.subf %87, %90 : vector<16x16xf32>
    %92 = math.exp %91 : vector<16x16xf32>
    %cst_51 = arith.constant dense<0.000000e+00> : vector<16xf32>
    %93 = vector.multi_reduction <add>, %92, %cst_51 [1] : vector<16x16xf32> to vector<16xf32>
    %94 = vector.shape_cast %93 : vector<16xf32> to vector<16x1xf32>
    %95 = tpu.reciprocal %94 {approx = true} : vector<16x1xf32> -> vector<16x1xf32>
    %96 = vector.broadcast %95 : vector<16x1xf32> to vector<16x16xf32>
    %97 = arith.mulf %92, %96 : vector<16x16xf32>
    %c0_52 = arith.constant 0 : index
    %c224 = arith.constant 224 : index
    %c0_53 = arith.constant 0 : index
    %98 = vector.load %arg3[%c0_52, %c224, %c0_53] : memref<2x640x64xf32, #tpu.memory_space<vmem>>, vector<1x32x32xf32>
    %99 = vector.shape_cast %98 : vector<1x32x32xf32> to vector<32x32xf32>
    %cst_54 = arith.constant dense<0.000000e+00> : vector<16x32xf32>
    %100 = tpu.matmul %0, %99, %cst_54 {dimension_numbers = #tpu.dot_dimension_numbers<[1], [0], [0], [1], [0, 0, 1, 1], [], []>} : vector<16x32xf32>, vector<32x32xf32>, vector<16x32xf32> -> vector<16x32xf32>
    %cst_55 = arith.constant dense<0.000000e+00> : vector<16x32xf32>
    %101 = tpu.matmul %97, %100, %cst_55 {dimension_numbers = #tpu.dot_dimension_numbers<[1], [0], [0], [1], [0, 0, 1, 1], [], []>} : vector<16x16xf32>, vector<16x32xf32>, vector<16x32xf32> -> vector<16x32xf32>
    %102 = arith.addf %78, %101 : vector<16x32xf32>
    %c0_56 = arith.constant 0 : index
    %c612 = arith.constant 612 : index
    %c0_57 = arith.constant 0 : index
    %103 = vector.load %arg3[%c0_56, %c612, %c0_57] : memref<2x640x64xf32, #tpu.memory_space<vmem>>, vector<1x1x32xf32>
    %104 = vector.shape_cast %103 : vector<1x1x32xf32> to vector<1x32xf32>
    %105 = vector.broadcast %104 : vector<1x32xf32> to vector<16x32xf32>
    %106 = arith.addf %102, %105 : vector<16x32xf32>
    %107 = arith.addf %0, %106 : vector<16x32xf32>
    %c0_58 = arith.constant 0 : index
    %c632 = arith.constant 632 : index
    %c0_59 = arith.constant 0 : index
    %108 = vector.load %arg3[%c0_58, %c632, %c0_59] : memref<2x640x64xf32, #tpu.memory_space<vmem>>, vector<1x1x32xf32>
    %109 = vector.shape_cast %108 : vector<1x1x32xf32> to vector<1x32xf32>
    %c0_60 = arith.constant 0 : index
    %c633 = arith.constant 633 : index
    %c0_61 = arith.constant 0 : index
    %110 = vector.load %arg3[%c0_60, %c633, %c0_61] : memref<2x640x64xf32, #tpu.memory_space<vmem>>, vector<1x1x32xf32>
    %111 = vector.shape_cast %110 : vector<1x1x32xf32> to vector<1x32xf32>
    %cst_62 = arith.constant dense<0.000000e+00> : vector<16xf32>
    %112 = vector.multi_reduction <add>, %107, %cst_62 [1] : vector<16x32xf32> to vector<16xf32>
    %113 = vector.shape_cast %112 : vector<16xf32> to vector<16x1xf32>
    %cst_63 = arith.constant 3.200000e+01 : f32
    %114 = vector.broadcast %cst_63 : f32 to vector<16x1xf32>
    %115 = arith.divf %113, %114 : vector<16x1xf32>
    %116 = vector.broadcast %115 : vector<16x1xf32> to vector<16x32xf32>
    %117 = arith.subf %107, %116 : vector<16x32xf32>
    %118 = arith.mulf %117, %117 : vector<16x32xf32>
    %cst_64 = arith.constant dense<0.000000e+00> : vector<16xf32>
    %119 = vector.multi_reduction <add>, %118, %cst_64 [1] : vector<16x32xf32> to vector<16xf32>
    %120 = vector.shape_cast %119 : vector<16xf32> to vector<16x1xf32>
    %cst_65 = arith.constant 3.200000e+01 : f32
    %121 = vector.broadcast %cst_65 : f32 to vector<16x1xf32>
    %122 = arith.divf %120, %121 : vector<16x1xf32>
    %123 = vector.broadcast %115 : vector<16x1xf32> to vector<16x32xf32>
    %124 = arith.subf %107, %123 : vector<16x32xf32>
    %cst_66 = arith.constant 9.99999974E-6 : f32
    %125 = vector.broadcast %cst_66 : f32 to vector<16x1xf32>
    %126 = arith.addf %122, %125 : vector<16x1xf32>
    %127 = math.rsqrt %126 : vector<16x1xf32>
    %128 = vector.broadcast %127 : vector<16x1xf32> to vector<16x32xf32>
    %129 = arith.mulf %124, %128 : vector<16x32xf32>
    %130 = vector.broadcast %109 : vector<1x32xf32> to vector<16x32xf32>
    %131 = arith.mulf %129, %130 : vector<16x32xf32>
    %132 = vector.broadcast %111 : vector<1x32xf32> to vector<16x32xf32>
    %133 = arith.addf %131, %132 : vector<16x32xf32>
    %c0_67 = arith.constant 0 : index
    %c256 = arith.constant 256 : index
    %c0_68 = arith.constant 0 : index
    %134 = vector.load %arg3[%c0_67, %c256, %c0_68] : memref<2x640x64xf32, #tpu.memory_space<vmem>>, vector<1x32x32xf32>
    %135 = vector.shape_cast %134 : vector<1x32x32xf32> to vector<32x32xf32>
    %cst_69 = arith.constant dense<0.000000e+00> : vector<16x32xf32>
    %136 = tpu.matmul %133, %135, %cst_69 {dimension_numbers = #tpu.dot_dimension_numbers<[1], [0], [0], [1], [0, 0, 1, 1], [], []>} : vector<16x32xf32>, vector<32x32xf32>, vector<16x32xf32> -> vector<16x32xf32>
    %c0_70 = arith.constant 0 : index
    %c616 = arith.constant 616 : index
    %c0_71 = arith.constant 0 : index
    %137 = vector.load %arg3[%c0_70, %c616, %c0_71] : memref<2x640x64xf32, #tpu.memory_space<vmem>>, vector<1x1x32xf32>
    %138 = vector.shape_cast %137 : vector<1x1x32xf32> to vector<1x32xf32>
    %139 = vector.broadcast %138 : vector<1x32xf32> to vector<16x32xf32>
    %140 = arith.addf %136, %139 : vector<16x32xf32>
    %cst_72 = arith.constant dense<0.000000e+00> : vector<16x16xf32>
    %141 = tpu.matmul %140, %6, %cst_72 {dimension_numbers = #tpu.dot_dimension_numbers<[1], [0], [0], [1], [0, 0, 1, 1], [], []>} : vector<16x32xf32>, vector<32x16xf32>, vector<16x16xf32> -> vector<16x16xf32>
    %142 = arith.addf %141, %5 : vector<16x16xf32>
    %cst_73 = arith.constant dense<0xFF800000> : vector<16xf32>
    %143 = vector.multi_reduction <maximumf>, %142, %cst_73 [1] : vector<16x16xf32> to vector<16xf32>
    %144 = vector.shape_cast %143 : vector<16xf32> to vector<16x1xf32>
    %145 = vector.broadcast %144 : vector<16x1xf32> to vector<16x16xf32>
    %146 = arith.subf %142, %145 : vector<16x16xf32>
    %147 = math.exp %146 : vector<16x16xf32>
    %cst_74 = arith.constant dense<0.000000e+00> : vector<16xf32>
    %148 = vector.multi_reduction <add>, %147, %cst_74 [1] : vector<16x16xf32> to vector<16xf32>
    %149 = vector.shape_cast %148 : vector<16xf32> to vector<16x1xf32>
    %150 = tpu.reciprocal %149 {approx = true} : vector<16x1xf32> -> vector<16x1xf32>
    %151 = vector.broadcast %150 : vector<16x1xf32> to vector<16x16xf32>
    %152 = arith.mulf %147, %151 : vector<16x16xf32>
    %c0_75 = arith.constant 0 : index
    %c384 = arith.constant 384 : index
    %c0_76 = arith.constant 0 : index
    %153 = vector.load %arg3[%c0_75, %c384, %c0_76] : memref<2x640x64xf32, #tpu.memory_space<vmem>>, vector<1x32x32xf32>
    %154 = vector.shape_cast %153 : vector<1x32x32xf32> to vector<32x32xf32>
    %cst_77 = arith.constant dense<0.000000e+00> : vector<16x32xf32>
    %155 = tpu.matmul %1, %154, %cst_77 {dimension_numbers = #tpu.dot_dimension_numbers<[1], [0], [0], [1], [0, 0, 1, 1], [], []>} : vector<16x32xf32>, vector<32x32xf32>, vector<16x32xf32> -> vector<16x32xf32>
    %cst_78 = arith.constant dense<0.000000e+00> : vector<16x32xf32>
    %156 = tpu.matmul %152, %155, %cst_78 {dimension_numbers = #tpu.dot_dimension_numbers<[1], [0], [0], [1], [0, 0, 1, 1], [], []>} : vector<16x16xf32>, vector<16x32xf32>, vector<16x32xf32> -> vector<16x32xf32>
    %c0_79 = arith.constant 0 : index
    %c288 = arith.constant 288 : index
    %c0_80 = arith.constant 0 : index
    %157 = vector.load %arg3[%c0_79, %c288, %c0_80] : memref<2x640x64xf32, #tpu.memory_space<vmem>>, vector<1x32x32xf32>
    %158 = vector.shape_cast %157 : vector<1x32x32xf32> to vector<32x32xf32>
    %cst_81 = arith.constant dense<0.000000e+00> : vector<16x32xf32>
    %159 = tpu.matmul %133, %158, %cst_81 {dimension_numbers = #tpu.dot_dimension_numbers<[1], [0], [0], [1], [0, 0, 1, 1], [], []>} : vector<16x32xf32>, vector<32x32xf32>, vector<16x32xf32> -> vector<16x32xf32>
    %c0_82 = arith.constant 0 : index
    %c617 = arith.constant 617 : index
    %c0_83 = arith.constant 0 : index
    %160 = vector.load %arg3[%c0_82, %c617, %c0_83] : memref<2x640x64xf32, #tpu.memory_space<vmem>>, vector<1x1x32xf32>
    %161 = vector.shape_cast %160 : vector<1x1x32xf32> to vector<1x32xf32>
    %162 = vector.broadcast %161 : vector<1x32xf32> to vector<16x32xf32>
    %163 = arith.addf %159, %162 : vector<16x32xf32>
    %cst_84 = arith.constant dense<0.000000e+00> : vector<16x16xf32>
    %164 = tpu.matmul %163, %6, %cst_84 {dimension_numbers = #tpu.dot_dimension_numbers<[1], [0], [0], [1], [0, 0, 1, 1], [], []>} : vector<16x32xf32>, vector<32x16xf32>, vector<16x16xf32> -> vector<16x16xf32>
    %165 = arith.addf %164, %5 : vector<16x16xf32>
    %cst_85 = arith.constant dense<0xFF800000> : vector<16xf32>
    %166 = vector.multi_reduction <maximumf>, %165, %cst_85 [1] : vector<16x16xf32> to vector<16xf32>
    %167 = vector.shape_cast %166 : vector<16xf32> to vector<16x1xf32>
    %168 = vector.broadcast %167 : vector<16x1xf32> to vector<16x16xf32>
    %169 = arith.subf %165, %168 : vector<16x16xf32>
    %170 = math.exp %169 : vector<16x16xf32>
    %cst_86 = arith.constant dense<0.000000e+00> : vector<16xf32>
    %171 = vector.multi_reduction <add>, %170, %cst_86 [1] : vector<16x16xf32> to vector<16xf32>
    %172 = vector.shape_cast %171 : vector<16xf32> to vector<16x1xf32>
    %173 = tpu.reciprocal %172 {approx = true} : vector<16x1xf32> -> vector<16x1xf32>
    %174 = vector.broadcast %173 : vector<16x1xf32> to vector<16x16xf32>
    %175 = arith.mulf %170, %174 : vector<16x16xf32>
    %c0_87 = arith.constant 0 : index
    %c416 = arith.constant 416 : index
    %c0_88 = arith.constant 0 : index
    %176 = vector.load %arg3[%c0_87, %c416, %c0_88] : memref<2x640x64xf32, #tpu.memory_space<vmem>>, vector<1x32x32xf32>
    %177 = vector.shape_cast %176 : vector<1x32x32xf32> to vector<32x32xf32>
    %cst_89 = arith.constant dense<0.000000e+00> : vector<16x32xf32>
    %178 = tpu.matmul %1, %177, %cst_89 {dimension_numbers = #tpu.dot_dimension_numbers<[1], [0], [0], [1], [0, 0, 1, 1], [], []>} : vector<16x32xf32>, vector<32x32xf32>, vector<16x32xf32> -> vector<16x32xf32>
    %cst_90 = arith.constant dense<0.000000e+00> : vector<16x32xf32>
    %179 = tpu.matmul %175, %178, %cst_90 {dimension_numbers = #tpu.dot_dimension_numbers<[1], [0], [0], [1], [0, 0, 1, 1], [], []>} : vector<16x16xf32>, vector<16x32xf32>, vector<16x32xf32> -> vector<16x32xf32>
    %180 = arith.addf %156, %179 : vector<16x32xf32>
    %c0_91 = arith.constant 0 : index
    %c320 = arith.constant 320 : index
    %c0_92 = arith.constant 0 : index
    %181 = vector.load %arg3[%c0_91, %c320, %c0_92] : memref<2x640x64xf32, #tpu.memory_space<vmem>>, vector<1x32x32xf32>
    %182 = vector.shape_cast %181 : vector<1x32x32xf32> to vector<32x32xf32>
    %cst_93 = arith.constant dense<0.000000e+00> : vector<16x32xf32>
    %183 = tpu.matmul %133, %182, %cst_93 {dimension_numbers = #tpu.dot_dimension_numbers<[1], [0], [0], [1], [0, 0, 1, 1], [], []>} : vector<16x32xf32>, vector<32x32xf32>, vector<16x32xf32> -> vector<16x32xf32>
    %c0_94 = arith.constant 0 : index
    %c618 = arith.constant 618 : index
    %c0_95 = arith.constant 0 : index
    %184 = vector.load %arg3[%c0_94, %c618, %c0_95] : memref<2x640x64xf32, #tpu.memory_space<vmem>>, vector<1x1x32xf32>
    %185 = vector.shape_cast %184 : vector<1x1x32xf32> to vector<1x32xf32>
    %186 = vector.broadcast %185 : vector<1x32xf32> to vector<16x32xf32>
    %187 = arith.addf %183, %186 : vector<16x32xf32>
    %cst_96 = arith.constant dense<0.000000e+00> : vector<16x16xf32>
    %188 = tpu.matmul %187, %6, %cst_96 {dimension_numbers = #tpu.dot_dimension_numbers<[1], [0], [0], [1], [0, 0, 1, 1], [], []>} : vector<16x32xf32>, vector<32x16xf32>, vector<16x16xf32> -> vector<16x16xf32>
    %189 = arith.addf %188, %5 : vector<16x16xf32>
    %cst_97 = arith.constant dense<0xFF800000> : vector<16xf32>
    %190 = vector.multi_reduction <maximumf>, %189, %cst_97 [1] : vector<16x16xf32> to vector<16xf32>
    %191 = vector.shape_cast %190 : vector<16xf32> to vector<16x1xf32>
    %192 = vector.broadcast %191 : vector<16x1xf32> to vector<16x16xf32>
    %193 = arith.subf %189, %192 : vector<16x16xf32>
    %194 = math.exp %193 : vector<16x16xf32>
    %cst_98 = arith.constant dense<0.000000e+00> : vector<16xf32>
    %195 = vector.multi_reduction <add>, %194, %cst_98 [1] : vector<16x16xf32> to vector<16xf32>
    %196 = vector.shape_cast %195 : vector<16xf32> to vector<16x1xf32>
    %197 = tpu.reciprocal %196 {approx = true} : vector<16x1xf32> -> vector<16x1xf32>
    %198 = vector.broadcast %197 : vector<16x1xf32> to vector<16x16xf32>
    %199 = arith.mulf %194, %198 : vector<16x16xf32>
    %c0_99 = arith.constant 0 : index
    %c448 = arith.constant 448 : index
    %c0_100 = arith.constant 0 : index
    %200 = vector.load %arg3[%c0_99, %c448, %c0_100] : memref<2x640x64xf32, #tpu.memory_space<vmem>>, vector<1x32x32xf32>
    %201 = vector.shape_cast %200 : vector<1x32x32xf32> to vector<32x32xf32>
    %cst_101 = arith.constant dense<0.000000e+00> : vector<16x32xf32>
    %202 = tpu.matmul %1, %201, %cst_101 {dimension_numbers = #tpu.dot_dimension_numbers<[1], [0], [0], [1], [0, 0, 1, 1], [], []>} : vector<16x32xf32>, vector<32x32xf32>, vector<16x32xf32> -> vector<16x32xf32>
    %cst_102 = arith.constant dense<0.000000e+00> : vector<16x32xf32>
    %203 = tpu.matmul %199, %202, %cst_102 {dimension_numbers = #tpu.dot_dimension_numbers<[1], [0], [0], [1], [0, 0, 1, 1], [], []>} : vector<16x16xf32>, vector<16x32xf32>, vector<16x32xf32> -> vector<16x32xf32>
    %204 = arith.addf %180, %203 : vector<16x32xf32>
    %c0_103 = arith.constant 0 : index
    %c352 = arith.constant 352 : index
    %c0_104 = arith.constant 0 : index
    %205 = vector.load %arg3[%c0_103, %c352, %c0_104] : memref<2x640x64xf32, #tpu.memory_space<vmem>>, vector<1x32x32xf32>
    %206 = vector.shape_cast %205 : vector<1x32x32xf32> to vector<32x32xf32>
    %cst_105 = arith.constant dense<0.000000e+00> : vector<16x32xf32>
    %207 = tpu.matmul %133, %206, %cst_105 {dimension_numbers = #tpu.dot_dimension_numbers<[1], [0], [0], [1], [0, 0, 1, 1], [], []>} : vector<16x32xf32>, vector<32x32xf32>, vector<16x32xf32> -> vector<16x32xf32>
    %c0_106 = arith.constant 0 : index
    %c619 = arith.constant 619 : index
    %c0_107 = arith.constant 0 : index
    %208 = vector.load %arg3[%c0_106, %c619, %c0_107] : memref<2x640x64xf32, #tpu.memory_space<vmem>>, vector<1x1x32xf32>
    %209 = vector.shape_cast %208 : vector<1x1x32xf32> to vector<1x32xf32>
    %210 = vector.broadcast %209 : vector<1x32xf32> to vector<16x32xf32>
    %211 = arith.addf %207, %210 : vector<16x32xf32>
    %cst_108 = arith.constant dense<0.000000e+00> : vector<16x16xf32>
    %212 = tpu.matmul %211, %6, %cst_108 {dimension_numbers = #tpu.dot_dimension_numbers<[1], [0], [0], [1], [0, 0, 1, 1], [], []>} : vector<16x32xf32>, vector<32x16xf32>, vector<16x16xf32> -> vector<16x16xf32>
    %213 = arith.addf %212, %5 : vector<16x16xf32>
    %cst_109 = arith.constant dense<0xFF800000> : vector<16xf32>
    %214 = vector.multi_reduction <maximumf>, %213, %cst_109 [1] : vector<16x16xf32> to vector<16xf32>
    %215 = vector.shape_cast %214 : vector<16xf32> to vector<16x1xf32>
    %216 = vector.broadcast %215 : vector<16x1xf32> to vector<16x16xf32>
    %217 = arith.subf %213, %216 : vector<16x16xf32>
    %218 = math.exp %217 : vector<16x16xf32>
    %cst_110 = arith.constant dense<0.000000e+00> : vector<16xf32>
    %219 = vector.multi_reduction <add>, %218, %cst_110 [1] : vector<16x16xf32> to vector<16xf32>
    %220 = vector.shape_cast %219 : vector<16xf32> to vector<16x1xf32>
    %221 = tpu.reciprocal %220 {approx = true} : vector<16x1xf32> -> vector<16x1xf32>
    %222 = vector.broadcast %221 : vector<16x1xf32> to vector<16x16xf32>
    %223 = arith.mulf %218, %222 : vector<16x16xf32>
    %c0_111 = arith.constant 0 : index
    %c480 = arith.constant 480 : index
    %c0_112 = arith.constant 0 : index
    %224 = vector.load %arg3[%c0_111, %c480, %c0_112] : memref<2x640x64xf32, #tpu.memory_space<vmem>>, vector<1x32x32xf32>
    %225 = vector.shape_cast %224 : vector<1x32x32xf32> to vector<32x32xf32>
    %cst_113 = arith.constant dense<0.000000e+00> : vector<16x32xf32>
    %226 = tpu.matmul %1, %225, %cst_113 {dimension_numbers = #tpu.dot_dimension_numbers<[1], [0], [0], [1], [0, 0, 1, 1], [], []>} : vector<16x32xf32>, vector<32x32xf32>, vector<16x32xf32> -> vector<16x32xf32>
    %cst_114 = arith.constant dense<0.000000e+00> : vector<16x32xf32>
    %227 = tpu.matmul %223, %226, %cst_114 {dimension_numbers = #tpu.dot_dimension_numbers<[1], [0], [0], [1], [0, 0, 1, 1], [], []>} : vector<16x16xf32>, vector<16x32xf32>, vector<16x32xf32> -> vector<16x32xf32>
    %228 = arith.addf %204, %227 : vector<16x32xf32>
    %c0_115 = arith.constant 0 : index
    %c620 = arith.constant 620 : index
    %c0_116 = arith.constant 0 : index
    %229 = vector.load %arg3[%c0_115, %c620, %c0_116] : memref<2x640x64xf32, #tpu.memory_space<vmem>>, vector<1x1x32xf32>
    %230 = vector.shape_cast %229 : vector<1x1x32xf32> to vector<1x32xf32>
    %231 = vector.broadcast %230 : vector<1x32xf32> to vector<16x32xf32>
    %232 = arith.addf %228, %231 : vector<16x32xf32>
    %233 = arith.addf %133, %232 : vector<16x32xf32>
    %c0_117 = arith.constant 0 : index
    %c634 = arith.constant 634 : index
    %c0_118 = arith.constant 0 : index
    %234 = vector.load %arg3[%c0_117, %c634, %c0_118] : memref<2x640x64xf32, #tpu.memory_space<vmem>>, vector<1x1x32xf32>
    %235 = vector.shape_cast %234 : vector<1x1x32xf32> to vector<1x32xf32>
    %c0_119 = arith.constant 0 : index
    %c635 = arith.constant 635 : index
    %c0_120 = arith.constant 0 : index
    %236 = vector.load %arg3[%c0_119, %c635, %c0_120] : memref<2x640x64xf32, #tpu.memory_space<vmem>>, vector<1x1x32xf32>
    %237 = vector.shape_cast %236 : vector<1x1x32xf32> to vector<1x32xf32>
    %cst_121 = arith.constant dense<0.000000e+00> : vector<16xf32>
    %238 = vector.multi_reduction <add>, %233, %cst_121 [1] : vector<16x32xf32> to vector<16xf32>
    %239 = vector.shape_cast %238 : vector<16xf32> to vector<16x1xf32>
    %cst_122 = arith.constant 3.200000e+01 : f32
    %240 = vector.broadcast %cst_122 : f32 to vector<16x1xf32>
    %241 = arith.divf %239, %240 : vector<16x1xf32>
    %242 = vector.broadcast %241 : vector<16x1xf32> to vector<16x32xf32>
    %243 = arith.subf %233, %242 : vector<16x32xf32>
    %244 = arith.mulf %243, %243 : vector<16x32xf32>
    %cst_123 = arith.constant dense<0.000000e+00> : vector<16xf32>
    %245 = vector.multi_reduction <add>, %244, %cst_123 [1] : vector<16x32xf32> to vector<16xf32>
    %246 = vector.shape_cast %245 : vector<16xf32> to vector<16x1xf32>
    %cst_124 = arith.constant 3.200000e+01 : f32
    %247 = vector.broadcast %cst_124 : f32 to vector<16x1xf32>
    %248 = arith.divf %246, %247 : vector<16x1xf32>
    %249 = vector.broadcast %241 : vector<16x1xf32> to vector<16x32xf32>
    %250 = arith.subf %233, %249 : vector<16x32xf32>
    %cst_125 = arith.constant 9.99999974E-6 : f32
    %251 = vector.broadcast %cst_125 : f32 to vector<16x1xf32>
    %252 = arith.addf %248, %251 : vector<16x1xf32>
    %253 = math.rsqrt %252 : vector<16x1xf32>
    %254 = vector.broadcast %253 : vector<16x1xf32> to vector<16x32xf32>
    %255 = arith.mulf %250, %254 : vector<16x32xf32>
    %256 = vector.broadcast %235 : vector<1x32xf32> to vector<16x32xf32>
    %257 = arith.mulf %255, %256 : vector<16x32xf32>
    %258 = vector.broadcast %237 : vector<1x32xf32> to vector<16x32xf32>
    %259 = arith.addf %257, %258 : vector<16x32xf32>
    %c0_126 = arith.constant 0 : index
    %c512 = arith.constant 512 : index
    %c0_127 = arith.constant 0 : index
    %260 = vector.load %arg3[%c0_126, %c512, %c0_127] : memref<2x640x64xf32, #tpu.memory_space<vmem>>, vector<1x32x64xf32>
    %261 = vector.shape_cast %260 : vector<1x32x64xf32> to vector<32x64xf32>
    %cst_128 = arith.constant dense<0.000000e+00> : vector<16x64xf32>
    %262 = tpu.matmul %259, %261, %cst_128 {dimension_numbers = #tpu.dot_dimension_numbers<[1], [0], [0], [1], [0, 0, 1, 1], [], []>} : vector<16x32xf32>, vector<32x64xf32>, vector<16x64xf32> -> vector<16x64xf32>
    %c0_129 = arith.constant 0 : index
    %c624 = arith.constant 624 : index
    %c0_130 = arith.constant 0 : index
    %263 = vector.load %arg3[%c0_129, %c624, %c0_130] : memref<2x640x64xf32, #tpu.memory_space<vmem>>, vector<1x1x64xf32>
    %264 = vector.shape_cast %263 : vector<1x1x64xf32> to vector<1x64xf32>
    %265 = vector.broadcast %264 : vector<1x64xf32> to vector<16x64xf32>
    %266 = arith.addf %262, %265 : vector<16x64xf32>
    %cst_131 = arith.constant 0.000000e+00 : f32
    %267 = vector.broadcast %cst_131 : f32 to vector<16x64xf32>
    %268 = arith.maximumf %266, %267 : vector<16x64xf32>
    %c0_132 = arith.constant 0 : index
    %c544 = arith.constant 544 : index
    %c0_133 = arith.constant 0 : index
    %269 = vector.load %arg3[%c0_132, %c544, %c0_133] : memref<2x640x64xf32, #tpu.memory_space<vmem>>, vector<1x64x32xf32>
    %270 = vector.shape_cast %269 : vector<1x64x32xf32> to vector<64x32xf32>
    %cst_134 = arith.constant dense<0.000000e+00> : vector<16x32xf32>
    %271 = tpu.matmul %268, %270, %cst_134 {dimension_numbers = #tpu.dot_dimension_numbers<[1], [0], [0], [1], [0, 0, 1, 1], [], []>} : vector<16x64xf32>, vector<64x32xf32>, vector<16x32xf32> -> vector<16x32xf32>
    %c0_135 = arith.constant 0 : index
    %c625 = arith.constant 625 : index
    %c0_136 = arith.constant 0 : index
    %272 = vector.load %arg3[%c0_135, %c625, %c0_136] : memref<2x640x64xf32, #tpu.memory_space<vmem>>, vector<1x1x32xf32>
    %273 = vector.shape_cast %272 : vector<1x1x32xf32> to vector<1x32xf32>
    %274 = vector.broadcast %273 : vector<1x32xf32> to vector<16x32xf32>
    %275 = arith.addf %271, %274 : vector<16x32xf32>
    %276 = arith.addf %259, %275 : vector<16x32xf32>
    %c0_137 = arith.constant 0 : index
    %c636 = arith.constant 636 : index
    %c0_138 = arith.constant 0 : index
    %277 = vector.load %arg3[%c0_137, %c636, %c0_138] : memref<2x640x64xf32, #tpu.memory_space<vmem>>, vector<1x1x32xf32>
    %278 = vector.shape_cast %277 : vector<1x1x32xf32> to vector<1x32xf32>
    %c0_139 = arith.constant 0 : index
    %c637 = arith.constant 637 : index
    %c0_140 = arith.constant 0 : index
    %279 = vector.load %arg3[%c0_139, %c637, %c0_140] : memref<2x640x64xf32, #tpu.memory_space<vmem>>, vector<1x1x32xf32>
    %280 = vector.shape_cast %279 : vector<1x1x32xf32> to vector<1x32xf32>
    %cst_141 = arith.constant dense<0.000000e+00> : vector<16xf32>
    %281 = vector.multi_reduction <add>, %276, %cst_141 [1] : vector<16x32xf32> to vector<16xf32>
    %282 = vector.shape_cast %281 : vector<16xf32> to vector<16x1xf32>
    %cst_142 = arith.constant 3.200000e+01 : f32
    %283 = vector.broadcast %cst_142 : f32 to vector<16x1xf32>
    %284 = arith.divf %282, %283 : vector<16x1xf32>
    %285 = vector.broadcast %284 : vector<16x1xf32> to vector<16x32xf32>
    %286 = arith.subf %276, %285 : vector<16x32xf32>
    %287 = arith.mulf %286, %286 : vector<16x32xf32>
    %cst_143 = arith.constant dense<0.000000e+00> : vector<16xf32>
    %288 = vector.multi_reduction <add>, %287, %cst_143 [1] : vector<16x32xf32> to vector<16xf32>
    %289 = vector.shape_cast %288 : vector<16xf32> to vector<16x1xf32>
    %cst_144 = arith.constant 3.200000e+01 : f32
    %290 = vector.broadcast %cst_144 : f32 to vector<16x1xf32>
    %291 = arith.divf %289, %290 : vector<16x1xf32>
    %292 = vector.broadcast %284 : vector<16x1xf32> to vector<16x32xf32>
    %293 = arith.subf %276, %292 : vector<16x32xf32>
    %cst_145 = arith.constant 9.99999974E-6 : f32
    %294 = vector.broadcast %cst_145 : f32 to vector<16x1xf32>
    %295 = arith.addf %291, %294 : vector<16x1xf32>
    %296 = math.rsqrt %295 : vector<16x1xf32>
    %297 = vector.broadcast %296 : vector<16x1xf32> to vector<16x32xf32>
    %298 = arith.mulf %293, %297 : vector<16x32xf32>
    %299 = vector.broadcast %278 : vector<1x32xf32> to vector<16x32xf32>
    %300 = arith.mulf %298, %299 : vector<16x32xf32>
    %301 = vector.broadcast %280 : vector<1x32xf32> to vector<16x32xf32>
    %302 = arith.addf %300, %301 : vector<16x32xf32>
    %303 = tpu.transpose %302, [1, 0] : vector<16x32xf32> -> vector<32x16xf32>
    %c1_146 = arith.constant 1 : index
    %c0_147 = arith.constant 0 : index
    %c0_148 = arith.constant 0 : index
    %304 = vector.load %arg3[%c1_146, %c0_147, %c0_148] : memref<2x640x64xf32, #tpu.memory_space<vmem>>, vector<1x32x32xf32>
    %305 = vector.shape_cast %304 : vector<1x32x32xf32> to vector<32x32xf32>
    %cst_149 = arith.constant dense<0.000000e+00> : vector<16x32xf32>
    %306 = tpu.matmul %302, %305, %cst_149 {dimension_numbers = #tpu.dot_dimension_numbers<[1], [0], [0], [1], [0, 0, 1, 1], [], []>} : vector<16x32xf32>, vector<32x32xf32>, vector<16x32xf32> -> vector<16x32xf32>
    %c1_150 = arith.constant 1 : index
    %c608_151 = arith.constant 608 : index
    %c0_152 = arith.constant 0 : index
    %307 = vector.load %arg3[%c1_150, %c608_151, %c0_152] : memref<2x640x64xf32, #tpu.memory_space<vmem>>, vector<1x1x32xf32>
    %308 = vector.shape_cast %307 : vector<1x1x32xf32> to vector<1x32xf32>
    %309 = vector.broadcast %308 : vector<1x32xf32> to vector<16x32xf32>
    %310 = arith.addf %306, %309 : vector<16x32xf32>
    %cst_153 = arith.constant dense<0.000000e+00> : vector<16x16xf32>
    %311 = tpu.matmul %310, %303, %cst_153 {dimension_numbers = #tpu.dot_dimension_numbers<[1], [0], [0], [1], [0, 0, 1, 1], [], []>} : vector<16x32xf32>, vector<32x16xf32>, vector<16x16xf32> -> vector<16x16xf32>
    %312 = arith.addf %311, %3 : vector<16x16xf32>
    %cst_154 = arith.constant dense<0xFF800000> : vector<16xf32>
    %313 = vector.multi_reduction <maximumf>, %312, %cst_154 [1] : vector<16x16xf32> to vector<16xf32>
    %314 = vector.shape_cast %313 : vector<16xf32> to vector<16x1xf32>
    %315 = vector.broadcast %314 : vector<16x1xf32> to vector<16x16xf32>
    %316 = arith.subf %312, %315 : vector<16x16xf32>
    %317 = math.exp %316 : vector<16x16xf32>
    %cst_155 = arith.constant dense<0.000000e+00> : vector<16xf32>
    %318 = vector.multi_reduction <add>, %317, %cst_155 [1] : vector<16x16xf32> to vector<16xf32>
    %319 = vector.shape_cast %318 : vector<16xf32> to vector<16x1xf32>
    %320 = tpu.reciprocal %319 {approx = true} : vector<16x1xf32> -> vector<16x1xf32>
    %321 = vector.broadcast %320 : vector<16x1xf32> to vector<16x16xf32>
    %322 = arith.mulf %317, %321 : vector<16x16xf32>
    %c1_156 = arith.constant 1 : index
    %c128_157 = arith.constant 128 : index
    %c0_158 = arith.constant 0 : index
    %323 = vector.load %arg3[%c1_156, %c128_157, %c0_158] : memref<2x640x64xf32, #tpu.memory_space<vmem>>, vector<1x32x32xf32>
    %324 = vector.shape_cast %323 : vector<1x32x32xf32> to vector<32x32xf32>
    %cst_159 = arith.constant dense<0.000000e+00> : vector<16x32xf32>
    %325 = tpu.matmul %302, %324, %cst_159 {dimension_numbers = #tpu.dot_dimension_numbers<[1], [0], [0], [1], [0, 0, 1, 1], [], []>} : vector<16x32xf32>, vector<32x32xf32>, vector<16x32xf32> -> vector<16x32xf32>
    %cst_160 = arith.constant dense<0.000000e+00> : vector<16x32xf32>
    %326 = tpu.matmul %322, %325, %cst_160 {dimension_numbers = #tpu.dot_dimension_numbers<[1], [0], [0], [1], [0, 0, 1, 1], [], []>} : vector<16x16xf32>, vector<16x32xf32>, vector<16x32xf32> -> vector<16x32xf32>
    %c1_161 = arith.constant 1 : index
    %c32_162 = arith.constant 32 : index
    %c0_163 = arith.constant 0 : index
    %327 = vector.load %arg3[%c1_161, %c32_162, %c0_163] : memref<2x640x64xf32, #tpu.memory_space<vmem>>, vector<1x32x32xf32>
    %328 = vector.shape_cast %327 : vector<1x32x32xf32> to vector<32x32xf32>
    %cst_164 = arith.constant dense<0.000000e+00> : vector<16x32xf32>
    %329 = tpu.matmul %302, %328, %cst_164 {dimension_numbers = #tpu.dot_dimension_numbers<[1], [0], [0], [1], [0, 0, 1, 1], [], []>} : vector<16x32xf32>, vector<32x32xf32>, vector<16x32xf32> -> vector<16x32xf32>
    %c1_165 = arith.constant 1 : index
    %c609_166 = arith.constant 609 : index
    %c0_167 = arith.constant 0 : index
    %330 = vector.load %arg3[%c1_165, %c609_166, %c0_167] : memref<2x640x64xf32, #tpu.memory_space<vmem>>, vector<1x1x32xf32>
    %331 = vector.shape_cast %330 : vector<1x1x32xf32> to vector<1x32xf32>
    %332 = vector.broadcast %331 : vector<1x32xf32> to vector<16x32xf32>
    %333 = arith.addf %329, %332 : vector<16x32xf32>
    %cst_168 = arith.constant dense<0.000000e+00> : vector<16x16xf32>
    %334 = tpu.matmul %333, %303, %cst_168 {dimension_numbers = #tpu.dot_dimension_numbers<[1], [0], [0], [1], [0, 0, 1, 1], [], []>} : vector<16x32xf32>, vector<32x16xf32>, vector<16x16xf32> -> vector<16x16xf32>
    %335 = arith.addf %334, %3 : vector<16x16xf32>
    %cst_169 = arith.constant dense<0xFF800000> : vector<16xf32>
    %336 = vector.multi_reduction <maximumf>, %335, %cst_169 [1] : vector<16x16xf32> to vector<16xf32>
    %337 = vector.shape_cast %336 : vector<16xf32> to vector<16x1xf32>
    %338 = vector.broadcast %337 : vector<16x1xf32> to vector<16x16xf32>
    %339 = arith.subf %335, %338 : vector<16x16xf32>
    %340 = math.exp %339 : vector<16x16xf32>
    %cst_170 = arith.constant dense<0.000000e+00> : vector<16xf32>
    %341 = vector.multi_reduction <add>, %340, %cst_170 [1] : vector<16x16xf32> to vector<16xf32>
    %342 = vector.shape_cast %341 : vector<16xf32> to vector<16x1xf32>
    %343 = tpu.reciprocal %342 {approx = true} : vector<16x1xf32> -> vector<16x1xf32>
    %344 = vector.broadcast %343 : vector<16x1xf32> to vector<16x16xf32>
    %345 = arith.mulf %340, %344 : vector<16x16xf32>
    %c1_171 = arith.constant 1 : index
    %c160_172 = arith.constant 160 : index
    %c0_173 = arith.constant 0 : index
    %346 = vector.load %arg3[%c1_171, %c160_172, %c0_173] : memref<2x640x64xf32, #tpu.memory_space<vmem>>, vector<1x32x32xf32>
    %347 = vector.shape_cast %346 : vector<1x32x32xf32> to vector<32x32xf32>
    %cst_174 = arith.constant dense<0.000000e+00> : vector<16x32xf32>
    %348 = tpu.matmul %302, %347, %cst_174 {dimension_numbers = #tpu.dot_dimension_numbers<[1], [0], [0], [1], [0, 0, 1, 1], [], []>} : vector<16x32xf32>, vector<32x32xf32>, vector<16x32xf32> -> vector<16x32xf32>
    %cst_175 = arith.constant dense<0.000000e+00> : vector<16x32xf32>
    %349 = tpu.matmul %345, %348, %cst_175 {dimension_numbers = #tpu.dot_dimension_numbers<[1], [0], [0], [1], [0, 0, 1, 1], [], []>} : vector<16x16xf32>, vector<16x32xf32>, vector<16x32xf32> -> vector<16x32xf32>
    %350 = arith.addf %326, %349 : vector<16x32xf32>
    %c1_176 = arith.constant 1 : index
    %c64_177 = arith.constant 64 : index
    %c0_178 = arith.constant 0 : index
    %351 = vector.load %arg3[%c1_176, %c64_177, %c0_178] : memref<2x640x64xf32, #tpu.memory_space<vmem>>, vector<1x32x32xf32>
    %352 = vector.shape_cast %351 : vector<1x32x32xf32> to vector<32x32xf32>
    %cst_179 = arith.constant dense<0.000000e+00> : vector<16x32xf32>
    %353 = tpu.matmul %302, %352, %cst_179 {dimension_numbers = #tpu.dot_dimension_numbers<[1], [0], [0], [1], [0, 0, 1, 1], [], []>} : vector<16x32xf32>, vector<32x32xf32>, vector<16x32xf32> -> vector<16x32xf32>
    %c1_180 = arith.constant 1 : index
    %c610_181 = arith.constant 610 : index
    %c0_182 = arith.constant 0 : index
    %354 = vector.load %arg3[%c1_180, %c610_181, %c0_182] : memref<2x640x64xf32, #tpu.memory_space<vmem>>, vector<1x1x32xf32>
    %355 = vector.shape_cast %354 : vector<1x1x32xf32> to vector<1x32xf32>
    %356 = vector.broadcast %355 : vector<1x32xf32> to vector<16x32xf32>
    %357 = arith.addf %353, %356 : vector<16x32xf32>
    %cst_183 = arith.constant dense<0.000000e+00> : vector<16x16xf32>
    %358 = tpu.matmul %357, %303, %cst_183 {dimension_numbers = #tpu.dot_dimension_numbers<[1], [0], [0], [1], [0, 0, 1, 1], [], []>} : vector<16x32xf32>, vector<32x16xf32>, vector<16x16xf32> -> vector<16x16xf32>
    %359 = arith.addf %358, %3 : vector<16x16xf32>
    %cst_184 = arith.constant dense<0xFF800000> : vector<16xf32>
    %360 = vector.multi_reduction <maximumf>, %359, %cst_184 [1] : vector<16x16xf32> to vector<16xf32>
    %361 = vector.shape_cast %360 : vector<16xf32> to vector<16x1xf32>
    %362 = vector.broadcast %361 : vector<16x1xf32> to vector<16x16xf32>
    %363 = arith.subf %359, %362 : vector<16x16xf32>
    %364 = math.exp %363 : vector<16x16xf32>
    %cst_185 = arith.constant dense<0.000000e+00> : vector<16xf32>
    %365 = vector.multi_reduction <add>, %364, %cst_185 [1] : vector<16x16xf32> to vector<16xf32>
    %366 = vector.shape_cast %365 : vector<16xf32> to vector<16x1xf32>
    %367 = tpu.reciprocal %366 {approx = true} : vector<16x1xf32> -> vector<16x1xf32>
    %368 = vector.broadcast %367 : vector<16x1xf32> to vector<16x16xf32>
    %369 = arith.mulf %364, %368 : vector<16x16xf32>
    %c1_186 = arith.constant 1 : index
    %c192_187 = arith.constant 192 : index
    %c0_188 = arith.constant 0 : index
    %370 = vector.load %arg3[%c1_186, %c192_187, %c0_188] : memref<2x640x64xf32, #tpu.memory_space<vmem>>, vector<1x32x32xf32>
    %371 = vector.shape_cast %370 : vector<1x32x32xf32> to vector<32x32xf32>
    %cst_189 = arith.constant dense<0.000000e+00> : vector<16x32xf32>
    %372 = tpu.matmul %302, %371, %cst_189 {dimension_numbers = #tpu.dot_dimension_numbers<[1], [0], [0], [1], [0, 0, 1, 1], [], []>} : vector<16x32xf32>, vector<32x32xf32>, vector<16x32xf32> -> vector<16x32xf32>
    %cst_190 = arith.constant dense<0.000000e+00> : vector<16x32xf32>
    %373 = tpu.matmul %369, %372, %cst_190 {dimension_numbers = #tpu.dot_dimension_numbers<[1], [0], [0], [1], [0, 0, 1, 1], [], []>} : vector<16x16xf32>, vector<16x32xf32>, vector<16x32xf32> -> vector<16x32xf32>
    %374 = arith.addf %350, %373 : vector<16x32xf32>
    %c1_191 = arith.constant 1 : index
    %c96_192 = arith.constant 96 : index
    %c0_193 = arith.constant 0 : index
    %375 = vector.load %arg3[%c1_191, %c96_192, %c0_193] : memref<2x640x64xf32, #tpu.memory_space<vmem>>, vector<1x32x32xf32>
    %376 = vector.shape_cast %375 : vector<1x32x32xf32> to vector<32x32xf32>
    %cst_194 = arith.constant dense<0.000000e+00> : vector<16x32xf32>
    %377 = tpu.matmul %302, %376, %cst_194 {dimension_numbers = #tpu.dot_dimension_numbers<[1], [0], [0], [1], [0, 0, 1, 1], [], []>} : vector<16x32xf32>, vector<32x32xf32>, vector<16x32xf32> -> vector<16x32xf32>
    %c1_195 = arith.constant 1 : index
    %c611_196 = arith.constant 611 : index
    %c0_197 = arith.constant 0 : index
    %378 = vector.load %arg3[%c1_195, %c611_196, %c0_197] : memref<2x640x64xf32, #tpu.memory_space<vmem>>, vector<1x1x32xf32>
    %379 = vector.shape_cast %378 : vector<1x1x32xf32> to vector<1x32xf32>
    %380 = vector.broadcast %379 : vector<1x32xf32> to vector<16x32xf32>
    %381 = arith.addf %377, %380 : vector<16x32xf32>
    %cst_198 = arith.constant dense<0.000000e+00> : vector<16x16xf32>
    %382 = tpu.matmul %381, %303, %cst_198 {dimension_numbers = #tpu.dot_dimension_numbers<[1], [0], [0], [1], [0, 0, 1, 1], [], []>} : vector<16x32xf32>, vector<32x16xf32>, vector<16x16xf32> -> vector<16x16xf32>
    %383 = arith.addf %382, %3 : vector<16x16xf32>
    %cst_199 = arith.constant dense<0xFF800000> : vector<16xf32>
    %384 = vector.multi_reduction <maximumf>, %383, %cst_199 [1] : vector<16x16xf32> to vector<16xf32>
    %385 = vector.shape_cast %384 : vector<16xf32> to vector<16x1xf32>
    %386 = vector.broadcast %385 : vector<16x1xf32> to vector<16x16xf32>
    %387 = arith.subf %383, %386 : vector<16x16xf32>
    %388 = math.exp %387 : vector<16x16xf32>
    %cst_200 = arith.constant dense<0.000000e+00> : vector<16xf32>
    %389 = vector.multi_reduction <add>, %388, %cst_200 [1] : vector<16x16xf32> to vector<16xf32>
    %390 = vector.shape_cast %389 : vector<16xf32> to vector<16x1xf32>
    %391 = tpu.reciprocal %390 {approx = true} : vector<16x1xf32> -> vector<16x1xf32>
    %392 = vector.broadcast %391 : vector<16x1xf32> to vector<16x16xf32>
    %393 = arith.mulf %388, %392 : vector<16x16xf32>
    %c1_201 = arith.constant 1 : index
    %c224_202 = arith.constant 224 : index
    %c0_203 = arith.constant 0 : index
    %394 = vector.load %arg3[%c1_201, %c224_202, %c0_203] : memref<2x640x64xf32, #tpu.memory_space<vmem>>, vector<1x32x32xf32>
    %395 = vector.shape_cast %394 : vector<1x32x32xf32> to vector<32x32xf32>
    %cst_204 = arith.constant dense<0.000000e+00> : vector<16x32xf32>
    %396 = tpu.matmul %302, %395, %cst_204 {dimension_numbers = #tpu.dot_dimension_numbers<[1], [0], [0], [1], [0, 0, 1, 1], [], []>} : vector<16x32xf32>, vector<32x32xf32>, vector<16x32xf32> -> vector<16x32xf32>
    %cst_205 = arith.constant dense<0.000000e+00> : vector<16x32xf32>
    %397 = tpu.matmul %393, %396, %cst_205 {dimension_numbers = #tpu.dot_dimension_numbers<[1], [0], [0], [1], [0, 0, 1, 1], [], []>} : vector<16x16xf32>, vector<16x32xf32>, vector<16x32xf32> -> vector<16x32xf32>
    %398 = arith.addf %374, %397 : vector<16x32xf32>
    %c1_206 = arith.constant 1 : index
    %c612_207 = arith.constant 612 : index
    %c0_208 = arith.constant 0 : index
    %399 = vector.load %arg3[%c1_206, %c612_207, %c0_208] : memref<2x640x64xf32, #tpu.memory_space<vmem>>, vector<1x1x32xf32>
    %400 = vector.shape_cast %399 : vector<1x1x32xf32> to vector<1x32xf32>
    %401 = vector.broadcast %400 : vector<1x32xf32> to vector<16x32xf32>
    %402 = arith.addf %398, %401 : vector<16x32xf32>
    %403 = arith.addf %302, %402 : vector<16x32xf32>
    %c1_209 = arith.constant 1 : index
    %c632_210 = arith.constant 632 : index
    %c0_211 = arith.constant 0 : index
    %404 = vector.load %arg3[%c1_209, %c632_210, %c0_211] : memref<2x640x64xf32, #tpu.memory_space<vmem>>, vector<1x1x32xf32>
    %405 = vector.shape_cast %404 : vector<1x1x32xf32> to vector<1x32xf32>
    %c1_212 = arith.constant 1 : index
    %c633_213 = arith.constant 633 : index
    %c0_214 = arith.constant 0 : index
    %406 = vector.load %arg3[%c1_212, %c633_213, %c0_214] : memref<2x640x64xf32, #tpu.memory_space<vmem>>, vector<1x1x32xf32>
    %407 = vector.shape_cast %406 : vector<1x1x32xf32> to vector<1x32xf32>
    %cst_215 = arith.constant dense<0.000000e+00> : vector<16xf32>
    %408 = vector.multi_reduction <add>, %403, %cst_215 [1] : vector<16x32xf32> to vector<16xf32>
    %409 = vector.shape_cast %408 : vector<16xf32> to vector<16x1xf32>
    %cst_216 = arith.constant 3.200000e+01 : f32
    %410 = vector.broadcast %cst_216 : f32 to vector<16x1xf32>
    %411 = arith.divf %409, %410 : vector<16x1xf32>
    %412 = vector.broadcast %411 : vector<16x1xf32> to vector<16x32xf32>
    %413 = arith.subf %403, %412 : vector<16x32xf32>
    %414 = arith.mulf %413, %413 : vector<16x32xf32>
    %cst_217 = arith.constant dense<0.000000e+00> : vector<16xf32>
    %415 = vector.multi_reduction <add>, %414, %cst_217 [1] : vector<16x32xf32> to vector<16xf32>
    %416 = vector.shape_cast %415 : vector<16xf32> to vector<16x1xf32>
    %cst_218 = arith.constant 3.200000e+01 : f32
    %417 = vector.broadcast %cst_218 : f32 to vector<16x1xf32>
    %418 = arith.divf %416, %417 : vector<16x1xf32>
    %419 = vector.broadcast %411 : vector<16x1xf32> to vector<16x32xf32>
    %420 = arith.subf %403, %419 : vector<16x32xf32>
    %cst_219 = arith.constant 9.99999974E-6 : f32
    %421 = vector.broadcast %cst_219 : f32 to vector<16x1xf32>
    %422 = arith.addf %418, %421 : vector<16x1xf32>
    %423 = math.rsqrt %422 : vector<16x1xf32>
    %424 = vector.broadcast %423 : vector<16x1xf32> to vector<16x32xf32>
    %425 = arith.mulf %420, %424 : vector<16x32xf32>
    %426 = vector.broadcast %405 : vector<1x32xf32> to vector<16x32xf32>
    %427 = arith.mulf %425, %426 : vector<16x32xf32>
    %428 = vector.broadcast %407 : vector<1x32xf32> to vector<16x32xf32>
    %429 = arith.addf %427, %428 : vector<16x32xf32>
    %c1_220 = arith.constant 1 : index
    %c256_221 = arith.constant 256 : index
    %c0_222 = arith.constant 0 : index
    %430 = vector.load %arg3[%c1_220, %c256_221, %c0_222] : memref<2x640x64xf32, #tpu.memory_space<vmem>>, vector<1x32x32xf32>
    %431 = vector.shape_cast %430 : vector<1x32x32xf32> to vector<32x32xf32>
    %cst_223 = arith.constant dense<0.000000e+00> : vector<16x32xf32>
    %432 = tpu.matmul %429, %431, %cst_223 {dimension_numbers = #tpu.dot_dimension_numbers<[1], [0], [0], [1], [0, 0, 1, 1], [], []>} : vector<16x32xf32>, vector<32x32xf32>, vector<16x32xf32> -> vector<16x32xf32>
    %c1_224 = arith.constant 1 : index
    %c616_225 = arith.constant 616 : index
    %c0_226 = arith.constant 0 : index
    %433 = vector.load %arg3[%c1_224, %c616_225, %c0_226] : memref<2x640x64xf32, #tpu.memory_space<vmem>>, vector<1x1x32xf32>
    %434 = vector.shape_cast %433 : vector<1x1x32xf32> to vector<1x32xf32>
    %435 = vector.broadcast %434 : vector<1x32xf32> to vector<16x32xf32>
    %436 = arith.addf %432, %435 : vector<16x32xf32>
    %cst_227 = arith.constant dense<0.000000e+00> : vector<16x16xf32>
    %437 = tpu.matmul %436, %6, %cst_227 {dimension_numbers = #tpu.dot_dimension_numbers<[1], [0], [0], [1], [0, 0, 1, 1], [], []>} : vector<16x32xf32>, vector<32x16xf32>, vector<16x16xf32> -> vector<16x16xf32>
    %438 = arith.addf %437, %5 : vector<16x16xf32>
    %cst_228 = arith.constant dense<0xFF800000> : vector<16xf32>
    %439 = vector.multi_reduction <maximumf>, %438, %cst_228 [1] : vector<16x16xf32> to vector<16xf32>
    %440 = vector.shape_cast %439 : vector<16xf32> to vector<16x1xf32>
    %441 = vector.broadcast %440 : vector<16x1xf32> to vector<16x16xf32>
    %442 = arith.subf %438, %441 : vector<16x16xf32>
    %443 = math.exp %442 : vector<16x16xf32>
    %cst_229 = arith.constant dense<0.000000e+00> : vector<16xf32>
    %444 = vector.multi_reduction <add>, %443, %cst_229 [1] : vector<16x16xf32> to vector<16xf32>
    %445 = vector.shape_cast %444 : vector<16xf32> to vector<16x1xf32>
    %446 = tpu.reciprocal %445 {approx = true} : vector<16x1xf32> -> vector<16x1xf32>
    %447 = vector.broadcast %446 : vector<16x1xf32> to vector<16x16xf32>
    %448 = arith.mulf %443, %447 : vector<16x16xf32>
    %c1_230 = arith.constant 1 : index
    %c384_231 = arith.constant 384 : index
    %c0_232 = arith.constant 0 : index
    %449 = vector.load %arg3[%c1_230, %c384_231, %c0_232] : memref<2x640x64xf32, #tpu.memory_space<vmem>>, vector<1x32x32xf32>
    %450 = vector.shape_cast %449 : vector<1x32x32xf32> to vector<32x32xf32>
    %cst_233 = arith.constant dense<0.000000e+00> : vector<16x32xf32>
    %451 = tpu.matmul %1, %450, %cst_233 {dimension_numbers = #tpu.dot_dimension_numbers<[1], [0], [0], [1], [0, 0, 1, 1], [], []>} : vector<16x32xf32>, vector<32x32xf32>, vector<16x32xf32> -> vector<16x32xf32>
    %cst_234 = arith.constant dense<0.000000e+00> : vector<16x32xf32>
    %452 = tpu.matmul %448, %451, %cst_234 {dimension_numbers = #tpu.dot_dimension_numbers<[1], [0], [0], [1], [0, 0, 1, 1], [], []>} : vector<16x16xf32>, vector<16x32xf32>, vector<16x32xf32> -> vector<16x32xf32>
    %c1_235 = arith.constant 1 : index
    %c288_236 = arith.constant 288 : index
    %c0_237 = arith.constant 0 : index
    %453 = vector.load %arg3[%c1_235, %c288_236, %c0_237] : memref<2x640x64xf32, #tpu.memory_space<vmem>>, vector<1x32x32xf32>
    %454 = vector.shape_cast %453 : vector<1x32x32xf32> to vector<32x32xf32>
    %cst_238 = arith.constant dense<0.000000e+00> : vector<16x32xf32>
    %455 = tpu.matmul %429, %454, %cst_238 {dimension_numbers = #tpu.dot_dimension_numbers<[1], [0], [0], [1], [0, 0, 1, 1], [], []>} : vector<16x32xf32>, vector<32x32xf32>, vector<16x32xf32> -> vector<16x32xf32>
    %c1_239 = arith.constant 1 : index
    %c617_240 = arith.constant 617 : index
    %c0_241 = arith.constant 0 : index
    %456 = vector.load %arg3[%c1_239, %c617_240, %c0_241] : memref<2x640x64xf32, #tpu.memory_space<vmem>>, vector<1x1x32xf32>
    %457 = vector.shape_cast %456 : vector<1x1x32xf32> to vector<1x32xf32>
    %458 = vector.broadcast %457 : vector<1x32xf32> to vector<16x32xf32>
    %459 = arith.addf %455, %458 : vector<16x32xf32>
    %cst_242 = arith.constant dense<0.000000e+00> : vector<16x16xf32>
    %460 = tpu.matmul %459, %6, %cst_242 {dimension_numbers = #tpu.dot_dimension_numbers<[1], [0], [0], [1], [0, 0, 1, 1], [], []>} : vector<16x32xf32>, vector<32x16xf32>, vector<16x16xf32> -> vector<16x16xf32>
    %461 = arith.addf %460, %5 : vector<16x16xf32>
    %cst_243 = arith.constant dense<0xFF800000> : vector<16xf32>
    %462 = vector.multi_reduction <maximumf>, %461, %cst_243 [1] : vector<16x16xf32> to vector<16xf32>
    %463 = vector.shape_cast %462 : vector<16xf32> to vector<16x1xf32>
    %464 = vector.broadcast %463 : vector<16x1xf32> to vector<16x16xf32>
    %465 = arith.subf %461, %464 : vector<16x16xf32>
    %466 = math.exp %465 : vector<16x16xf32>
    %cst_244 = arith.constant dense<0.000000e+00> : vector<16xf32>
    %467 = vector.multi_reduction <add>, %466, %cst_244 [1] : vector<16x16xf32> to vector<16xf32>
    %468 = vector.shape_cast %467 : vector<16xf32> to vector<16x1xf32>
    %469 = tpu.reciprocal %468 {approx = true} : vector<16x1xf32> -> vector<16x1xf32>
    %470 = vector.broadcast %469 : vector<16x1xf32> to vector<16x16xf32>
    %471 = arith.mulf %466, %470 : vector<16x16xf32>
    %c1_245 = arith.constant 1 : index
    %c416_246 = arith.constant 416 : index
    %c0_247 = arith.constant 0 : index
    %472 = vector.load %arg3[%c1_245, %c416_246, %c0_247] : memref<2x640x64xf32, #tpu.memory_space<vmem>>, vector<1x32x32xf32>
    %473 = vector.shape_cast %472 : vector<1x32x32xf32> to vector<32x32xf32>
    %cst_248 = arith.constant dense<0.000000e+00> : vector<16x32xf32>
    %474 = tpu.matmul %1, %473, %cst_248 {dimension_numbers = #tpu.dot_dimension_numbers<[1], [0], [0], [1], [0, 0, 1, 1], [], []>} : vector<16x32xf32>, vector<32x32xf32>, vector<16x32xf32> -> vector<16x32xf32>
    %cst_249 = arith.constant dense<0.000000e+00> : vector<16x32xf32>
    %475 = tpu.matmul %471, %474, %cst_249 {dimension_numbers = #tpu.dot_dimension_numbers<[1], [0], [0], [1], [0, 0, 1, 1], [], []>} : vector<16x16xf32>, vector<16x32xf32>, vector<16x32xf32> -> vector<16x32xf32>
    %476 = arith.addf %452, %475 : vector<16x32xf32>
    %c1_250 = arith.constant 1 : index
    %c320_251 = arith.constant 320 : index
    %c0_252 = arith.constant 0 : index
    %477 = vector.load %arg3[%c1_250, %c320_251, %c0_252] : memref<2x640x64xf32, #tpu.memory_space<vmem>>, vector<1x32x32xf32>
    %478 = vector.shape_cast %477 : vector<1x32x32xf32> to vector<32x32xf32>
    %cst_253 = arith.constant dense<0.000000e+00> : vector<16x32xf32>
    %479 = tpu.matmul %429, %478, %cst_253 {dimension_numbers = #tpu.dot_dimension_numbers<[1], [0], [0], [1], [0, 0, 1, 1], [], []>} : vector<16x32xf32>, vector<32x32xf32>, vector<16x32xf32> -> vector<16x32xf32>
    %c1_254 = arith.constant 1 : index
    %c618_255 = arith.constant 618 : index
    %c0_256 = arith.constant 0 : index
    %480 = vector.load %arg3[%c1_254, %c618_255, %c0_256] : memref<2x640x64xf32, #tpu.memory_space<vmem>>, vector<1x1x32xf32>
    %481 = vector.shape_cast %480 : vector<1x1x32xf32> to vector<1x32xf32>
    %482 = vector.broadcast %481 : vector<1x32xf32> to vector<16x32xf32>
    %483 = arith.addf %479, %482 : vector<16x32xf32>
    %cst_257 = arith.constant dense<0.000000e+00> : vector<16x16xf32>
    %484 = tpu.matmul %483, %6, %cst_257 {dimension_numbers = #tpu.dot_dimension_numbers<[1], [0], [0], [1], [0, 0, 1, 1], [], []>} : vector<16x32xf32>, vector<32x16xf32>, vector<16x16xf32> -> vector<16x16xf32>
    %485 = arith.addf %484, %5 : vector<16x16xf32>
    %cst_258 = arith.constant dense<0xFF800000> : vector<16xf32>
    %486 = vector.multi_reduction <maximumf>, %485, %cst_258 [1] : vector<16x16xf32> to vector<16xf32>
    %487 = vector.shape_cast %486 : vector<16xf32> to vector<16x1xf32>
    %488 = vector.broadcast %487 : vector<16x1xf32> to vector<16x16xf32>
    %489 = arith.subf %485, %488 : vector<16x16xf32>
    %490 = math.exp %489 : vector<16x16xf32>
    %cst_259 = arith.constant dense<0.000000e+00> : vector<16xf32>
    %491 = vector.multi_reduction <add>, %490, %cst_259 [1] : vector<16x16xf32> to vector<16xf32>
    %492 = vector.shape_cast %491 : vector<16xf32> to vector<16x1xf32>
    %493 = tpu.reciprocal %492 {approx = true} : vector<16x1xf32> -> vector<16x1xf32>
    %494 = vector.broadcast %493 : vector<16x1xf32> to vector<16x16xf32>
    %495 = arith.mulf %490, %494 : vector<16x16xf32>
    %c1_260 = arith.constant 1 : index
    %c448_261 = arith.constant 448 : index
    %c0_262 = arith.constant 0 : index
    %496 = vector.load %arg3[%c1_260, %c448_261, %c0_262] : memref<2x640x64xf32, #tpu.memory_space<vmem>>, vector<1x32x32xf32>
    %497 = vector.shape_cast %496 : vector<1x32x32xf32> to vector<32x32xf32>
    %cst_263 = arith.constant dense<0.000000e+00> : vector<16x32xf32>
    %498 = tpu.matmul %1, %497, %cst_263 {dimension_numbers = #tpu.dot_dimension_numbers<[1], [0], [0], [1], [0, 0, 1, 1], [], []>} : vector<16x32xf32>, vector<32x32xf32>, vector<16x32xf32> -> vector<16x32xf32>
    %cst_264 = arith.constant dense<0.000000e+00> : vector<16x32xf32>
    %499 = tpu.matmul %495, %498, %cst_264 {dimension_numbers = #tpu.dot_dimension_numbers<[1], [0], [0], [1], [0, 0, 1, 1], [], []>} : vector<16x16xf32>, vector<16x32xf32>, vector<16x32xf32> -> vector<16x32xf32>
    %500 = arith.addf %476, %499 : vector<16x32xf32>
    %c1_265 = arith.constant 1 : index
    %c352_266 = arith.constant 352 : index
    %c0_267 = arith.constant 0 : index
    %501 = vector.load %arg3[%c1_265, %c352_266, %c0_267] : memref<2x640x64xf32, #tpu.memory_space<vmem>>, vector<1x32x32xf32>
    %502 = vector.shape_cast %501 : vector<1x32x32xf32> to vector<32x32xf32>
    %cst_268 = arith.constant dense<0.000000e+00> : vector<16x32xf32>
    %503 = tpu.matmul %429, %502, %cst_268 {dimension_numbers = #tpu.dot_dimension_numbers<[1], [0], [0], [1], [0, 0, 1, 1], [], []>} : vector<16x32xf32>, vector<32x32xf32>, vector<16x32xf32> -> vector<16x32xf32>
    %c1_269 = arith.constant 1 : index
    %c619_270 = arith.constant 619 : index
    %c0_271 = arith.constant 0 : index
    %504 = vector.load %arg3[%c1_269, %c619_270, %c0_271] : memref<2x640x64xf32, #tpu.memory_space<vmem>>, vector<1x1x32xf32>
    %505 = vector.shape_cast %504 : vector<1x1x32xf32> to vector<1x32xf32>
    %506 = vector.broadcast %505 : vector<1x32xf32> to vector<16x32xf32>
    %507 = arith.addf %503, %506 : vector<16x32xf32>
    %cst_272 = arith.constant dense<0.000000e+00> : vector<16x16xf32>
    %508 = tpu.matmul %507, %6, %cst_272 {dimension_numbers = #tpu.dot_dimension_numbers<[1], [0], [0], [1], [0, 0, 1, 1], [], []>} : vector<16x32xf32>, vector<32x16xf32>, vector<16x16xf32> -> vector<16x16xf32>
    %509 = arith.addf %508, %5 : vector<16x16xf32>
    %cst_273 = arith.constant dense<0xFF800000> : vector<16xf32>
    %510 = vector.multi_reduction <maximumf>, %509, %cst_273 [1] : vector<16x16xf32> to vector<16xf32>
    %511 = vector.shape_cast %510 : vector<16xf32> to vector<16x1xf32>
    %512 = vector.broadcast %511 : vector<16x1xf32> to vector<16x16xf32>
    %513 = arith.subf %509, %512 : vector<16x16xf32>
    %514 = math.exp %513 : vector<16x16xf32>
    %cst_274 = arith.constant dense<0.000000e+00> : vector<16xf32>
    %515 = vector.multi_reduction <add>, %514, %cst_274 [1] : vector<16x16xf32> to vector<16xf32>
    %516 = vector.shape_cast %515 : vector<16xf32> to vector<16x1xf32>
    %517 = tpu.reciprocal %516 {approx = true} : vector<16x1xf32> -> vector<16x1xf32>
    %518 = vector.broadcast %517 : vector<16x1xf32> to vector<16x16xf32>
    %519 = arith.mulf %514, %518 : vector<16x16xf32>
    %c1_275 = arith.constant 1 : index
    %c480_276 = arith.constant 480 : index
    %c0_277 = arith.constant 0 : index
    %520 = vector.load %arg3[%c1_275, %c480_276, %c0_277] : memref<2x640x64xf32, #tpu.memory_space<vmem>>, vector<1x32x32xf32>
    %521 = vector.shape_cast %520 : vector<1x32x32xf32> to vector<32x32xf32>
    %cst_278 = arith.constant dense<0.000000e+00> : vector<16x32xf32>
    %522 = tpu.matmul %1, %521, %cst_278 {dimension_numbers = #tpu.dot_dimension_numbers<[1], [0], [0], [1], [0, 0, 1, 1], [], []>} : vector<16x32xf32>, vector<32x32xf32>, vector<16x32xf32> -> vector<16x32xf32>
    %cst_279 = arith.constant dense<0.000000e+00> : vector<16x32xf32>
    %523 = tpu.matmul %519, %522, %cst_279 {dimension_numbers = #tpu.dot_dimension_numbers<[1], [0], [0], [1], [0, 0, 1, 1], [], []>} : vector<16x16xf32>, vector<16x32xf32>, vector<16x32xf32> -> vector<16x32xf32>
    %524 = arith.addf %500, %523 : vector<16x32xf32>
    %c1_280 = arith.constant 1 : index
    %c620_281 = arith.constant 620 : index
    %c0_282 = arith.constant 0 : index
    %525 = vector.load %arg3[%c1_280, %c620_281, %c0_282] : memref<2x640x64xf32, #tpu.memory_space<vmem>>, vector<1x1x32xf32>
    %526 = vector.shape_cast %525 : vector<1x1x32xf32> to vector<1x32xf32>
    %527 = vector.broadcast %526 : vector<1x32xf32> to vector<16x32xf32>
    %528 = arith.addf %524, %527 : vector<16x32xf32>
    %529 = arith.addf %429, %528 : vector<16x32xf32>
    %c1_283 = arith.constant 1 : index
    %c634_284 = arith.constant 634 : index
    %c0_285 = arith.constant 0 : index
    %530 = vector.load %arg3[%c1_283, %c634_284, %c0_285] : memref<2x640x64xf32, #tpu.memory_space<vmem>>, vector<1x1x32xf32>
    %531 = vector.shape_cast %530 : vector<1x1x32xf32> to vector<1x32xf32>
    %c1_286 = arith.constant 1 : index
    %c635_287 = arith.constant 635 : index
    %c0_288 = arith.constant 0 : index
    %532 = vector.load %arg3[%c1_286, %c635_287, %c0_288] : memref<2x640x64xf32, #tpu.memory_space<vmem>>, vector<1x1x32xf32>
    %533 = vector.shape_cast %532 : vector<1x1x32xf32> to vector<1x32xf32>
    %cst_289 = arith.constant dense<0.000000e+00> : vector<16xf32>
    %534 = vector.multi_reduction <add>, %529, %cst_289 [1] : vector<16x32xf32> to vector<16xf32>
    %535 = vector.shape_cast %534 : vector<16xf32> to vector<16x1xf32>
    %cst_290 = arith.constant 3.200000e+01 : f32
    %536 = vector.broadcast %cst_290 : f32 to vector<16x1xf32>
    %537 = arith.divf %535, %536 : vector<16x1xf32>
    %538 = vector.broadcast %537 : vector<16x1xf32> to vector<16x32xf32>
    %539 = arith.subf %529, %538 : vector<16x32xf32>
    %540 = arith.mulf %539, %539 : vector<16x32xf32>
    %cst_291 = arith.constant dense<0.000000e+00> : vector<16xf32>
    %541 = vector.multi_reduction <add>, %540, %cst_291 [1] : vector<16x32xf32> to vector<16xf32>
    %542 = vector.shape_cast %541 : vector<16xf32> to vector<16x1xf32>
    %cst_292 = arith.constant 3.200000e+01 : f32
    %543 = vector.broadcast %cst_292 : f32 to vector<16x1xf32>
    %544 = arith.divf %542, %543 : vector<16x1xf32>
    %545 = vector.broadcast %537 : vector<16x1xf32> to vector<16x32xf32>
    %546 = arith.subf %529, %545 : vector<16x32xf32>
    %cst_293 = arith.constant 9.99999974E-6 : f32
    %547 = vector.broadcast %cst_293 : f32 to vector<16x1xf32>
    %548 = arith.addf %544, %547 : vector<16x1xf32>
    %549 = math.rsqrt %548 : vector<16x1xf32>
    %550 = vector.broadcast %549 : vector<16x1xf32> to vector<16x32xf32>
    %551 = arith.mulf %546, %550 : vector<16x32xf32>
    %552 = vector.broadcast %531 : vector<1x32xf32> to vector<16x32xf32>
    %553 = arith.mulf %551, %552 : vector<16x32xf32>
    %554 = vector.broadcast %533 : vector<1x32xf32> to vector<16x32xf32>
    %555 = arith.addf %553, %554 : vector<16x32xf32>
    %c1_294 = arith.constant 1 : index
    %c512_295 = arith.constant 512 : index
    %c0_296 = arith.constant 0 : index
    %556 = vector.load %arg3[%c1_294, %c512_295, %c0_296] : memref<2x640x64xf32, #tpu.memory_space<vmem>>, vector<1x32x64xf32>
    %557 = vector.shape_cast %556 : vector<1x32x64xf32> to vector<32x64xf32>
    %cst_297 = arith.constant dense<0.000000e+00> : vector<16x64xf32>
    %558 = tpu.matmul %555, %557, %cst_297 {dimension_numbers = #tpu.dot_dimension_numbers<[1], [0], [0], [1], [0, 0, 1, 1], [], []>} : vector<16x32xf32>, vector<32x64xf32>, vector<16x64xf32> -> vector<16x64xf32>
    %c1_298 = arith.constant 1 : index
    %c624_299 = arith.constant 624 : index
    %c0_300 = arith.constant 0 : index
    %559 = vector.load %arg3[%c1_298, %c624_299, %c0_300] : memref<2x640x64xf32, #tpu.memory_space<vmem>>, vector<1x1x64xf32>
    %560 = vector.shape_cast %559 : vector<1x1x64xf32> to vector<1x64xf32>
    %561 = vector.broadcast %560 : vector<1x64xf32> to vector<16x64xf32>
    %562 = arith.addf %558, %561 : vector<16x64xf32>
    %cst_301 = arith.constant 0.000000e+00 : f32
    %563 = vector.broadcast %cst_301 : f32 to vector<16x64xf32>
    %564 = arith.maximumf %562, %563 : vector<16x64xf32>
    %c1_302 = arith.constant 1 : index
    %c544_303 = arith.constant 544 : index
    %c0_304 = arith.constant 0 : index
    %565 = vector.load %arg3[%c1_302, %c544_303, %c0_304] : memref<2x640x64xf32, #tpu.memory_space<vmem>>, vector<1x64x32xf32>
    %566 = vector.shape_cast %565 : vector<1x64x32xf32> to vector<64x32xf32>
    %cst_305 = arith.constant dense<0.000000e+00> : vector<16x32xf32>
    %567 = tpu.matmul %564, %566, %cst_305 {dimension_numbers = #tpu.dot_dimension_numbers<[1], [0], [0], [1], [0, 0, 1, 1], [], []>} : vector<16x64xf32>, vector<64x32xf32>, vector<16x32xf32> -> vector<16x32xf32>
    %c1_306 = arith.constant 1 : index
    %c625_307 = arith.constant 625 : index
    %c0_308 = arith.constant 0 : index
    %568 = vector.load %arg3[%c1_306, %c625_307, %c0_308] : memref<2x640x64xf32, #tpu.memory_space<vmem>>, vector<1x1x32xf32>
    %569 = vector.shape_cast %568 : vector<1x1x32xf32> to vector<1x32xf32>
    %570 = vector.broadcast %569 : vector<1x32xf32> to vector<16x32xf32>
    %571 = arith.addf %567, %570 : vector<16x32xf32>
    %572 = arith.addf %555, %571 : vector<16x32xf32>
    %c1_309 = arith.constant 1 : index
    %c636_310 = arith.constant 636 : index
    %c0_311 = arith.constant 0 : index
    %573 = vector.load %arg3[%c1_309, %c636_310, %c0_311] : memref<2x640x64xf32, #tpu.memory_space<vmem>>, vector<1x1x32xf32>
    %574 = vector.shape_cast %573 : vector<1x1x32xf32> to vector<1x32xf32>
    %c1_312 = arith.constant 1 : index
    %c637_313 = arith.constant 637 : index
    %c0_314 = arith.constant 0 : index
    %575 = vector.load %arg3[%c1_312, %c637_313, %c0_314] : memref<2x640x64xf32, #tpu.memory_space<vmem>>, vector<1x1x32xf32>
    %576 = vector.shape_cast %575 : vector<1x1x32xf32> to vector<1x32xf32>
    %cst_315 = arith.constant dense<0.000000e+00> : vector<16xf32>
    %577 = vector.multi_reduction <add>, %572, %cst_315 [1] : vector<16x32xf32> to vector<16xf32>
    %578 = vector.shape_cast %577 : vector<16xf32> to vector<16x1xf32>
    %cst_316 = arith.constant 3.200000e+01 : f32
    %579 = vector.broadcast %cst_316 : f32 to vector<16x1xf32>
    %580 = arith.divf %578, %579 : vector<16x1xf32>
    %581 = vector.broadcast %580 : vector<16x1xf32> to vector<16x32xf32>
    %582 = arith.subf %572, %581 : vector<16x32xf32>
    %583 = arith.mulf %582, %582 : vector<16x32xf32>
    %cst_317 = arith.constant dense<0.000000e+00> : vector<16xf32>
    %584 = vector.multi_reduction <add>, %583, %cst_317 [1] : vector<16x32xf32> to vector<16xf32>
    %585 = vector.shape_cast %584 : vector<16xf32> to vector<16x1xf32>
    %cst_318 = arith.constant 3.200000e+01 : f32
    %586 = vector.broadcast %cst_318 : f32 to vector<16x1xf32>
    %587 = arith.divf %585, %586 : vector<16x1xf32>
    %588 = vector.broadcast %580 : vector<16x1xf32> to vector<16x32xf32>
    %589 = arith.subf %572, %588 : vector<16x32xf32>
    %cst_319 = arith.constant 9.99999974E-6 : f32
    %590 = vector.broadcast %cst_319 : f32 to vector<16x1xf32>
    %591 = arith.addf %587, %590 : vector<16x1xf32>
    %592 = math.rsqrt %591 : vector<16x1xf32>
    %593 = vector.broadcast %592 : vector<16x1xf32> to vector<16x32xf32>
    %594 = arith.mulf %589, %593 : vector<16x32xf32>
    %595 = vector.broadcast %574 : vector<1x32xf32> to vector<16x32xf32>
    %596 = arith.mulf %594, %595 : vector<16x32xf32>
    %597 = vector.broadcast %576 : vector<1x32xf32> to vector<16x32xf32>
    %598 = arith.addf %596, %597 : vector<16x32xf32>
    %c0_320 = arith.constant 0 : index
    %c0_321 = arith.constant 0 : index
    %599 = vector.load %arg4[%c0_320, %c0_321] : memref<16x32xf32, #tpu.memory_space<vmem>>, vector<16x32xf32>
    tpu.vector_store %arg4[%c0_320, %c0_321], %598 {strides = array<i32>} : memref<16x32xf32, #tpu.memory_space<vmem>>, vector<16x32xf32>,
    return
  }
}

</mosaic_0001>

<bundles_post_ra>
// kernel: tpu_custom_call.1
= control target key start
LH: loop header
LB: loop body
LE: loop exit
PB: predicated region body
PF: predicated region fallthrough
CT: control target
= control target key end

     0   :  { %9 = vsyncpa [#allocation3], 0  ;;  %s8998_s0 = inlined_call_operand.hbm [shape: f32[16,32], index: 0, kind: input, shape index: {}, may-alias: {0,4}]   ;;  %s8999_s1 = inlined_call_operand.vmem [shape: f32[16,32], index: 1, kind: input, shape index: {}]   ;;  %s9000_s2 = inlined_call_operand.vmem [shape: f32[2,16,16], index: 2, kind: input, shape index: {}]   ;;  %s9001_s3 = inlined_call_operand.vmem [shape: f32[2,640,64], index: 3, kind: input, shape index: {}]   ;;  %s9002_s4 = inlined_call_operand.hbm [shape: f32[16,32], index: 4, kind: output, shape index: {}, may-alias: {0,4}]  }
   0x1   :  { %10 = vsyncpa [#allocation4], 0  ;;  %s7809_s15 = smov [#allocation2]  }
   0x2   :  { %s16_s16 = sshll.u32 %s7809_s15, 4  ;;  %s17_s16 = int_to_ptr.vmem [resolvable:$true] %s16_s16 }
   0x3   :  { %s7773_s17 = scalar_lea.vmem %s17_s16, 256  ;;  %p7778_p1 = scmp.lt.s32.totalorder %s17_s16, %s17_s16 }
   0x4   :  { %p7774_p0 = scmp.ne.s32.totalorder %s17_s16, %s7773_s17  ;;  %p7779_p2 = scmp.lt.s32.totalorder %s7773_s17, %s7773_s17 }
   0x6   :  { %p7780_p3 = por %p7779_p2, %p7778_p1 }
   0x8   :  { %p7781_p4 = pnand %p7780_p3, %p7774_p0 }
   0xa   :  { %7784 = shalt.err (!%p7781_p4)
}
   0xb   :  { %s7810_s18 = smov 128   ;;  %s7811_s19 = smov 8  }
   0xc   :  { %22 = dma.hbm_to_vmem [thread:$0]  %s8998_s0, 256, %s17_s16, [#allocation3], %s7810_s18, %s7810_s18, %s7811_s19  }
   0xd   :  { %7805 = dma.done.wait [#allocation3], 256  }
   0xe   :  { %7806 = vsyncadd [#allocation3], 4294967040  ;;  %vm50_vm0 = vcmask 261120   ;;  %v44_v0 = vld [vmem:[%s9001_s3 + $0x18] sm:$0xff]  ;;  %v43_v1 = vld [vmem:[%s9001_s3 + $0x10] sm:$0xff]  ;;  %vm213_vm1 = vcmask 130048  }
   0xf   :  { %6967 = vmatprep.subr.mxu0 %v44_v0  ;;  %v7850_v2 = vld [vmem:[#allocation2] sm:$0xff]  ;;  %v42_v3 = vld [vmem:[%s9001_s3 + $0x8] sm:$0xff]  ;;  %v318_v6 = vld [vmem:[%s9001_s3 + $0x38] sm:$0xff]  ;;  %vm3049_vm2 = vcmask 523264   ;;  %s7812_s12 = smov [#allocation5]  }
  0x10   :  { %6968 = vmatpush3.msra.mxu0 %v44_v0  ;;  %6975 = vmatprep.mubr.msk.f32.mxu0 %vm50_vm0, %v7850_v2  ;;  %v7857_v4 = vld [vmem:[#allocation2 + $0x8] sm:$0xff]  ;;  %v41_v5 = vld [vmem:[%s9001_s3] sm:$0xff]  ;;  %v239_v7 = vld [vmem:[%s9001_s3 + $0x98] sm:$0xff]  ;;  %s6303_s13 = sshll.u32 %s7812_s12, 4  ;;  %s6304_s13 = int_to_ptr.vmem [resolvable:$true] %s6303_s13 }
  0x11   :  { %6969 = vmatprep.subr.mxu0 %v43_v1  ;;  %6978 = vmatprep.subr.msk.mxu1 %vm50_vm0, %v7857_v4  ;;  %v238_v8 = vld [vmem:[%s9001_s3 + $0x90] sm:$0xff]  ;;  %v6317_v10 = vld [vmem:[%s9001_s3 + $0x260] ss:$0 sm:$0xff]  ;;  %v316_v15 = vld [vmem:[%s9001_s3 + $0x28] sm:$0xff]  ;;  %s7785_s14 = scalar_lea.vmem %s6304_s13, 256  ;;  %p7790_p6 = scmp.lt.s32.totalorder %s6304_s13, %s6304_s13 }
  0x12   :  { %6970 = vmatpush3.msra.mxu0 %v43_v1  ;;  %6979 = vmatpush3.xpose.msk.msra.mxu1 %vm50_vm0, %v7857_v4  ;;  %v317_v14 = vld [vmem:[%s9001_s3 + $0x30] sm:$0xff]  ;;  %v315_v16 = vld [vmem:[%s9001_s3 + $0x20] sm:$0xff]  ;;  %v505_v17 = vld [vmem:[%s9001_s3 + $0xb8] sm:$0xff]  ;;  %p7786_p5 = scmp.ne.s32.totalorder %s6304_s13, %s7785_s14  ;;  %p7791_p7 = scmp.lt.s32.totalorder %s7785_s14, %s7785_s14 }
  0x13   :  { %6971 = vmatprep.subr.mxu0 %v42_v3  ;;  %6980 = vmatprep.subr.msk.mxu1 %vm50_vm0, %v7850_v2  ;;  %v504_v18 = vld [vmem:[%s9001_s3 + $0xb0] sm:$0xff]  ;;  %v503_v19 = vld [vmem:[%s9001_s3 + $0xa8] sm:$0xff]  ;;  %v502_v21 = vld [vmem:[%s9001_s3 + $0xa0] sm:$0xff] }
  0x14   :  { %6972 = vmatpush3.msra.mxu0 %v42_v3  ;;  %v237_v20 = vld [vmem:[%s9001_s3 + $0x88] sm:$0xff]  ;;  %v236_v22 = vld [vmem:[%s9001_s3 + $0x80] sm:$0xff]  ;;  %p7792_p8 = por %p7791_p7, %p7790_p6 }
  0x15   :  { %6973 = vmatprep.subr.mxu0 %v41_v5  ;;  %v7944_v24 = vld [vmem:[%s9000_s2] sm:$0xff]  ;;  %v7949_v25 = vld [vmem:[%s9000_s2 + $0x8] sm:$0xff] }
  0x16   :  { %6974 = vmatpush3.msra.mxu0 %v41_v5  ;;  %6981 = vmatpush3.xpose.msk.msra.mxu1 %vm50_vm0, %v7850_v2  ;;  %v6326_v31 = vld [vmem:[%s9001_s3 + $0x261] ss:$0 sm:$0xff]  ;;  %p7793_p9 = pnand %p7792_p8, %p7786_p5 }
  0x17   :  { %6976 = vmatmul.mubr.msk.f32.vlgmr.msra.gmra.mxu0 %vm50_vm0, %v7857_v4  ;;  %6996 = vmatprep.subr.mxu1 %v318_v6 }
  0x18   :  { %6993 = vmatprep.mubr.msk.f32.mxu0 %vm50_vm0, %v7850_v2  ;;  %6985 = vmatprep.subr.mxu0 %v239_v7 }
  0x19   :  { %6986 = vmatpush3.msra.mxu0 %v239_v7 }
  0x1a   :  { %6987 = vmatprep.subr.mxu0 %v238_v8 }
  0x1b   :  { %6988 = vmatpush3.msra.mxu0 %v238_v8 }
  0x1c   :  { %6989 = vmatprep.subr.mxu0 %v237_v20 }
  0x1d   :  { %6990 = vmatpush3.msra.mxu0 %v237_v20 }
  0x1e   :  { %6991 = vmatprep.subr.mxu0 %v236_v22 }
  0x1f   :  { %6992 = vmatpush3.msra.mxu0 %v236_v22 }
  0x20   :  { %6994 = vmatmul.mubr.msk.f32.vlgmr.msra.gmra.mxu0 %vm50_vm0, %v7857_v4  ;;  %7007 = vmatprep.subr.msk.mxu0 %vm50_vm0, %v7857_v4 }
  0x21   :  { %7008 = vmatpush3.xpose.msk.msra.mxu0 %vm50_vm0, %v7857_v4 }
  0x22   :  { %7009 = vmatprep.subr.msk.mxu0 %vm50_vm0, %v7850_v2 }
  0x25   :  { %7010 = vmatpush3.xpose.msk.msra.mxu0 %vm50_vm0, %v7850_v2 }
  0xd7   :  { %v6977_v9 = vpop.f32.mrf.mxu0 }
  0xd8   :  { %v129_v13 = vadd.f32 %v6977_v9, %v6317_v10 }
  0xd9   :  { %v123_v11 = vpop.f32.mrf.mxu0 }
  0xda   :  { %v124_v12 = vadd.f32 %v6317_v10, %v123_v11 }
  0xdc   :  { %6982 = vmatprep.mubr.msk.f32.mxu1 %vm50_vm0, %v124_v12 }
  0xdd   :  { %6983 = vmatmul.mubr.msk.f32.vlgmr.msra.gmra.mxu1 %vm50_vm0, %v129_v13 }
  0xde   :  { %6997 = vmatpush3.msra.mxu1 %v318_v6  ;;  %7004 = vmatprep.mubr.msk.f32.mxu1 %vm50_vm0, %v7850_v2 }
  0xdf   :  { %6998 = vmatprep.subr.mxu1 %v317_v14 }
  0xe0   :  { %6999 = vmatpush3.msra.mxu1 %v317_v14  ;;  %v6995_v38 = vpop.f32.mrf.mxu0 }
  0xe1   :  { %7000 = vmatprep.subr.mxu1 %v316_v15 }
  0xe2   :  { %7001 = vmatpush3.msra.mxu1 %v316_v15  ;;  %v306_v39 = vpop.f32.mrf.mxu0  ;;  %v746_v15 = vld [vmem:[%s9001_s3 + $0x58] sm:$0xff] }
  0xe3   :  { %7002 = vmatprep.subr.mxu1 %v315_v16 }
  0xe4   :  { %7003 = vmatpush3.msra.mxu1 %v315_v16 }
  0xe5   :  { %7005 = vmatmul.mubr.msk.f32.vlgmr.msra.gmra.mxu1 %vm50_vm0, %v7857_v4  ;;  %7014 = vmatprep.subr.mxu1 %v505_v17 }
  0xe6   :  { %7015 = vmatpush3.msra.mxu1 %v505_v17  ;;  %7022 = vmatprep.mubr.msk.f32.mxu1 %vm50_vm0, %v7850_v2  ;;  %v745_v17 = vld [vmem:[%s9001_s3 + $0x50] sm:$0xff] }
  0xe7   :  { %7016 = vmatprep.subr.mxu1 %v504_v18 }
  0xe8   :  { %7017 = vmatpush3.msra.mxu1 %v504_v18  ;;  %v744_v18 = vld [vmem:[%s9001_s3 + $0x48] sm:$0xff] }
  0xe9   :  { %7018 = vmatprep.subr.mxu1 %v503_v19 }
  0xea   :  { %7019 = vmatpush3.msra.mxu1 %v503_v19  ;;  %v743_v19 = vld [vmem:[%s9001_s3 + $0x40] sm:$0xff] }
  0xeb   :  { %7020 = vmatprep.subr.mxu1 %v502_v21 }
  0xec   :  { %7021 = vmatpush3.msra.mxu1 %v502_v21 }
  0xed   :  { %7023 = vmatmul.mubr.msk.f32.vlgmr.msra.gmra.mxu1 %vm50_vm0, %v7857_v4  ;;  %7050 = vmatprep.subr.msk.mxu1 %vm50_vm0, %v7857_v4 }
  0xee   :  { %7051 = vmatpush3.xpose.msk.msra.mxu1 %vm50_vm0, %v7857_v4 }
  0xef   :  { %7052 = vmatprep.subr.msk.mxu1 %vm50_vm0, %v7850_v2 }
  0xf2   :  { %7053 = vmatpush3.xpose.msk.msra.mxu1 %vm50_vm0, %v7850_v2 }
 0x19d   :  { %v6984_v23 = vpop.f32.mrf.mxu1 }
 0x19e   :  { %v210_v28 = vadd.f32 %v6984_v23, %v7949_v25 }
 0x19f   :  { %v204_v26 = vpop.f32.mrf.mxu1 }
 0x1a0   :  { %v205_v27 = vadd.f32 %v204_v26, %v7944_v24  ;;  %v217_v32 = vsel %vm213_vm1, %v210_v28, -inf }
 0x1a2   :  { %v214_v29 = vsel %vm213_vm1, %v205_v27, -inf }
 0x1a3   :  { %215 = vmax.xlane.f32.xlu1 %v214_v29  ;;  %v6339_v29 = vld [vmem:[%s9001_s3 + $0x262] ss:$0 sm:$0xff] }
 0x1a5   :  { %v7006_v30 = vpop.f32.mrf.mxu1 }
 0x1a6   :  { %v396_v35 = vadd.f32 %v7006_v30, %v6326_v31 }
 0x1a7   :  { %v390_v33 = vpop.f32.mrf.mxu1  ;;  %218 = vmax.xlane.f32.xlu1 %v217_v32 }
 0x1a8   :  { %v391_v34 = vadd.f32 %v6326_v31, %v390_v33  ;;  %v933_v33 = vld [vmem:[%s9001_s3 + $0xd8] sm:$0xff] }
 0x1aa   :  { %7011 = vmatprep.mubr.msk.f32.mxu0 %vm50_vm0, %v391_v34  ;;  %v932_v34 = vld [vmem:[%s9001_s3 + $0xd0] sm:$0xff] }
 0x1ab   :  { %7012 = vmatmul.mubr.msk.f32.vlgmr.msra.gmra.mxu0 %vm50_vm0, %v396_v35  ;;  %v931_v35 = vld [vmem:[%s9001_s3 + $0xc8] sm:$0xff] }
 0x1ad   :  { %v7024_v36 = vpop.f32.mrf.mxu1 }
 0x1ae   :  { %7025 = vmatprep.subr.mxu0 %v7024_v36 }
 0x1af   :  { %v572_v37 = vpop.f32.mrf.mxu1  ;;  %7026 = vmatpush3.msra.mxu0 %v7024_v36  ;;  %v930_v36 = vld [vmem:[%s9001_s3 + $0xc0] sm:$0xff] }
 0x1b0   :  { %7027 = vmatprep.subr.mxu0 %v572_v37 }
 0x1b1   :  { %7028 = vmatpush3.msra.mxu0 %v572_v37 }
 0x1b2   :  { %7032 = vmatprep.subr.mxu0 %v6995_v38 }
 0x22c   :  { %v216_v46 = vpop.xlane.xlu1 %215 }
 0x22d   :  { %v220_v47 = vsub.f32 %v205_v27, %v216_v46 }
 0x22f   :  { %v222_v51 = vmul.f32 1.442695, %v220_v47 }
 0x230   :  { %v219_v48 = vpop.xlane.xlu1 %218 }
 0x231   :  { %v221_v52 = vsub.f32 %v210_v28, %v219_v48 }
 0x233   :  { %v224_v56 = vmul.f32 1.442695, %v221_v52 }
 0x26b   :  { %v7013_v40 = vpop.f32.mrf.mxu0 }
 0x26c   :  { %v477_v43 = vadd.f32 %v7013_v40, %v7949_v25 }
 0x26d   :  { %v471_v41 = vpop.f32.mrf.mxu0 }
 0x26e   :  { %v472_v42 = vadd.f32 %v471_v41, %v7944_v24  ;;  %v483_v45 = vsel %vm213_vm1, %v477_v43, -inf }
 0x270   :  { %v480_v44 = vsel %vm213_vm1, %v472_v42, -inf }
 0x271   :  { %481 = vmax.xlane.f32.xlu0 %v480_v44 }
 0x275   :  { %484 = vmax.xlane.f32.xlu0 %v483_v45 }
 0x2fa   :  { %v482_v49 = vpop.xlane.xlu0 %481 }
 0x2fb   :  { %v486_v50 = vsub.f32 %v472_v42, %v482_v49 }
 0x2fd   :  { %v488_v53 = vmul.f32 1.442695, %v486_v50 }
 0x2fe   :  { %v485_v54 = vpop.xlane.xlu0 %484 }
 0x2ff   :  { %7607 = vpow2.f32 %v488_v53  ;;  %v487_v55 = vsub.f32 %v477_v43, %v485_v54 }
 0x300   :  { %7609 = vpow2.f32 %v222_v51 }
 0x301   :  { %v490_v57 = vmul.f32 1.442695, %v487_v55  ;;  %v1095_v55 = vld [vmem:[%s9001_s3 + $0x78] sm:$0xff] }
 0x303   :  { %7611 = vpow2.f32 %v490_v57 }
 0x304   :  { %7613 = vpow2.f32 %v224_v56 }
 0x30c   :  { %v7608_v58 = vpop.eup %7607 }
 0x30d   :  { %v492_v59 = vsel %vm213_vm1, %v7608_v58, 0.0  ;;  %v7610_v60 = vpop.eup %7609 }
 0x30e   :  { %493 = vadd.xlane.f32.xlu0 %v492_v59  ;;  %v226_v63 = vsel %vm213_vm1, %v7610_v60, 0.0 }
 0x310   :  { %v7612_v61 = vpop.eup %7611 }
 0x311   :  { %v495_v62 = vsel %vm213_vm1, %v7612_v61, 0.0  ;;  %v7614_v0 = vpop.eup %7613 }
 0x312   :  { %496 = vadd.xlane.f32.xlu1 %v495_v62  ;;  %227 = vadd.xlane.f32.xlu0 %v226_v63  ;;  %v229_v1 = vsel %vm213_vm1, %v7614_v0, 0.0  ;;  %v1094_v62 = vld [vmem:[%s9001_s3 + $0x70] sm:$0xff]  ;;  %v1093_v63 = vld [vmem:[%s9001_s3 + $0x68] sm:$0xff] }
 0x316   :  { %230 = vadd.xlane.f32.xlu1 %v229_v1 }
 0x397   :  { %v494_v3 = vpop.xlane.xlu0 %493 }
 0x398   :  { %7615 = vrcp.f32 %v494_v3 }
 0x39b   :  { %v228_v5 = vpop.xlane.xlu0 %227  ;;  %v497_v6 = vpop.xlane.xlu1 %496 }
 0x39c   :  { %7617 = vrcp.f32 %v228_v5 }
 0x39d   :  { %7619 = vrcp.f32 %v497_v6 }
 0x39f   :  { %v231_v7 = vpop.xlane.xlu1 %230 }
 0x3a0   :  { %7621 = vrcp.f32 %v231_v7 }
 0x3a5   :  { %v7616_v8 = vpop.eup %7615 }
 0x3a6   :  { %v500_v9 = vmul.f32 %v7616_v8, %v7608_v58  ;;  %v6350_v8 = vld [vmem:[%s9001_s3 + $0x263] ss:$0 sm:$0xff] }
 0x3a8   :  { %7029 = vmatprep.mubr.msk.f32.mxu0 %vm213_vm1, %v500_v9 }
 0x3a9   :  { %v7618_v10 = vpop.eup %7617 }
 0x3aa   :  { %v7620_v11 = vpop.eup %7619  ;;  %v234_v12 = vmul.f32 %v7618_v10, %v7610_v60 }
 0x3ab   :  { %v501_v13 = vmul.f32 %v7620_v11, %v7612_v61 }
 0x3ad   :  { %v7622_v14 = vpop.eup %7621  ;;  %7030 = vmatmul.mubr.msk.f32.vlgmr.msra.gmra.mxu0 %vm213_vm1, %v501_v13  ;;  %v1281_v13 = vld [vmem:[%s9001_s3 + $0xf0] sm:$0xff] }
 0x3ae   :  { %7033 = vmatpush3.msra.mxu0 %v6995_v38  ;;  %7036 = vmatprep.mubr.msk.f32.mxu0 %vm213_vm1, %v234_v12  ;;  %v235_v16 = vmul.f32 %v7622_v14, %v7614_v0  ;;  %v1092_v0 = vld [vmem:[%s9001_s3 + $0x60] sm:$0xff]  ;;  %v1282_v12 = vld [vmem:[%s9001_s3 + $0xf8] sm:$0xff]  ;;  %v1280_v14 = vld [vmem:[%s9001_s3 + $0xe8] sm:$0xff] }
 0x3af   :  { %7034 = vmatprep.subr.mxu0 %v306_v39 }
 0x3b0   :  { %7035 = vmatpush3.msra.mxu0 %v306_v39 }
 0x3b1   :  { %7039 = vmatprep.subr.mxu0 %v746_v15  ;;  %7037 = vmatmul.mubr.msk.f32.vlgmr.msra.gmra.mxu0 %vm213_vm1, %v235_v16 }
 0x3b2   :  { %7040 = vmatpush3.msra.mxu0 %v746_v15  ;;  %7047 = vmatprep.mubr.msk.f32.mxu0 %vm50_vm0, %v7850_v2  ;;  %v1279_v15 = vld [vmem:[%s9001_s3 + $0xe0] sm:$0xff] }
 0x3b3   :  { %7041 = vmatprep.subr.mxu0 %v745_v17 }
 0x3b4   :  { %7042 = vmatpush3.msra.mxu0 %v745_v17 }
 0x3b5   :  { %7043 = vmatprep.subr.mxu0 %v744_v18 }
 0x3b6   :  { %7044 = vmatpush3.msra.mxu0 %v744_v18 }
 0x3b7   :  { %7045 = vmatprep.subr.mxu0 %v743_v19 }
 0x3b8   :  { %7046 = vmatpush3.msra.mxu0 %v743_v19 }
 0x3b9   :  { %7048 = vmatmul.mubr.msk.f32.vlgmr.msra.gmra.mxu0 %vm50_vm0, %v7857_v4  ;;  %7057 = vmatprep.subr.mxu0 %v933_v33 }
 0x3ba   :  { %7065 = vmatprep.mubr.msk.f32.mxu0 %vm50_vm0, %v7850_v2  ;;  %7058 = vmatpush3.msra.mxu0 %v933_v33 }
 0x3bb   :  { %7059 = vmatprep.subr.mxu0 %v932_v34 }
 0x3bc   :  { %7060 = vmatpush3.msra.mxu0 %v932_v34 }
 0x3bd   :  { %7061 = vmatprep.subr.mxu0 %v931_v35 }
 0x3be   :  { %7062 = vmatpush3.msra.mxu0 %v931_v35 }
 0x3bf   :  { %7063 = vmatprep.subr.mxu0 %v930_v36 }
 0x3c0   :  { %7064 = vmatpush3.msra.mxu0 %v930_v36 }
 0x3c1   :  { %7066 = vmatmul.mubr.msk.f32.vlgmr.msra.gmra.mxu0 %vm50_vm0, %v7857_v4  ;;  %7086 = vmatprep.subr.msk.mxu0 %vm50_vm0, %v7857_v4 }
 0x3c2   :  { %7087 = vmatpush3.xpose.msk.msra.mxu0 %vm50_vm0, %v7857_v4 }
 0x3c3   :  { %7088 = vmatprep.subr.msk.mxu0 %vm50_vm0, %v7850_v2 }
 0x3c6   :  { %7089 = vmatpush3.xpose.msk.msra.mxu0 %vm50_vm0, %v7850_v2 }
 0x46d   :  { %v7031_v20 = vpop.f32.mrf.mxu0 }
 0x46f   :  { %v653_v21 = vpop.f32.mrf.mxu0 }
 0x471   :  { %v7038_v22 = vpop.f32.mrf.mxu0 }
 0x472   :  { %v7990_v23 = vadd.f32 %v7038_v22, %v7031_v20 }
 0x473   :  { %v734_v26 = vpop.f32.mrf.mxu0 }
 0x474   :  { %v7992_v27 = vadd.f32 %v734_v26, %v653_v21 }
 0x479   :  { %v7049_v28 = vpop.f32.mrf.mxu0 }
 0x47a   :  { %v824_v32 = vadd.f32 %v7049_v28, %v6339_v29 }
 0x47b   :  { %v818_v30 = vpop.f32.mrf.mxu0 }
 0x47c   :  { %v819_v31 = vadd.f32 %v6339_v29, %v818_v30 }
 0x47e   :  { %7054 = vmatprep.mubr.msk.f32.mxu1 %vm50_vm0, %v819_v31 }
 0x47f   :  { %7055 = vmatmul.mubr.msk.f32.vlgmr.msra.gmra.mxu1 %vm50_vm0, %v824_v32 }
 0x481   :  { %v7067_v53 = vpop.f32.mrf.mxu0 }
 0x482   :  { %7068 = vmatprep.subr.mxu1 %v7067_v53 }
 0x483   :  { %v1000_v54 = vpop.f32.mrf.mxu0  ;;  %7069 = vmatpush3.msra.mxu1 %v7067_v53 }
 0x484   :  { %7070 = vmatprep.subr.mxu1 %v1000_v54 }
 0x485   :  { %7071 = vmatpush3.msra.mxu1 %v1000_v54 }
 0x486   :  { %7075 = vmatprep.subr.mxu1 %v1095_v55 }
 0x53f   :  { %v7056_v37 = vpop.f32.mrf.mxu1 }
 0x540   :  { %v905_v38 = vadd.f32 %v7056_v37, %v7949_v25 }
 0x541   :  { %v899_v39 = vpop.f32.mrf.mxu1 }
 0x542   :  { %v900_v40 = vadd.f32 %v899_v39, %v7944_v24  ;;  %v911_v41 = vsel %vm213_vm1, %v905_v38, -inf }
 0x543   :  { %912 = vmax.xlane.f32.xlu1 %v911_v41  ;;  %v6361_v41 = vld [vmem:[%s9001_s3 + $0x264] ss:$0 sm:$0xff] }
 0x544   :  { %v908_v42 = vsel %vm213_vm1, %v900_v40, -inf }
 0x545   :  { %909 = vmax.xlane.f32.xlu0 %v908_v42 }
 0x5cc   :  { %v913_v43 = vpop.xlane.xlu1 %912 }
 0x5cd   :  { %v915_v44 = vsub.f32 %v905_v38, %v913_v43 }
 0x5ce   :  { %v910_v45 = vpop.xlane.xlu0 %909 }
 0x5cf   :  { %v918_v46 = vmul.f32 1.442695, %v915_v44  ;;  %v914_v47 = vsub.f32 %v900_v40, %v910_v45 }
 0x5d1   :  { %7623 = vpow2.f32 %v918_v46  ;;  %v916_v48 = vmul.f32 1.442695, %v914_v47 }
 0x5d3   :  { %7625 = vpow2.f32 %v916_v48 }
 0x5de   :  { %v7624_v49 = vpop.eup %7623 }
 0x5df   :  { %v923_v50 = vsel %vm213_vm1, %v7624_v49, 0.0 }
 0x5e0   :  { %v7626_v51 = vpop.eup %7625  ;;  %924 = vadd.xlane.f32.xlu1 %v923_v50 }
 0x5e1   :  { %v920_v52 = vsel %vm213_vm1, %v7626_v51, 0.0 }
 0x5e2   :  { %921 = vadd.xlane.f32.xlu0 %v920_v52 }
 0x669   :  { %v925_v56 = vpop.xlane.xlu1 %924 }
 0x66a   :  { %7627 = vrcp.f32 %v925_v56 }
 0x66b   :  { %v922_v57 = vpop.xlane.xlu0 %921 }
 0x66c   :  { %7629 = vrcp.f32 %v922_v57 }
 0x677   :  { %v7628_v58 = vpop.eup %7627 }
 0x678   :  { %v929_v61 = vmul.f32 %v7628_v58, %v7624_v49 }
 0x679   :  { %v7630_v59 = vpop.eup %7629 }
 0x67a   :  { %v928_v60 = vmul.f32 %v7630_v59, %v7626_v51 }
 0x67c   :  { %7072 = vmatprep.mubr.msk.f32.mxu1 %vm213_vm1, %v928_v60  ;;  %v1493_v60 = vld [vmem:[%s9001_s3 + $0x110] sm:$0xff] }
 0x67d   :  { %7073 = vmatmul.mubr.msk.f32.vlgmr.msra.gmra.mxu1 %vm213_vm1, %v929_v61  ;;  %v1492_v61 = vld [vmem:[%s9001_s3 + $0x108] sm:$0xff] }
 0x67e   :  { %7076 = vmatpush3.msra.mxu1 %v1095_v55  ;;  %7083 = vmatprep.mubr.msk.f32.mxu1 %vm50_vm0, %v7850_v2 }
 0x67f   :  { %7077 = vmatprep.subr.mxu1 %v1094_v62 }
 0x680   :  { %7078 = vmatpush3.msra.mxu1 %v1094_v62  ;;  %v1491_v62 = vld [vmem:[%s9001_s3 + $0x100] sm:$0xff] }
 0x681   :  { %7079 = vmatprep.subr.mxu1 %v1093_v63 }
 0x682   :  { %7080 = vmatpush3.msra.mxu1 %v1093_v63  ;;  %v8106_v63 = vld [vmem:[%s8999_s1 + $0x8] sm:$0xff] }
 0x683   :  { %7081 = vmatprep.subr.mxu1 %v1092_v0 }
 0x684   :  { %7082 = vmatpush3.msra.mxu1 %v1092_v0 }
 0x685   :  { %7084 = vmatmul.mubr.msk.f32.vlgmr.msra.gmra.mxu1 %vm50_vm0, %v7857_v4  ;;  %7093 = vmatprep.subr.mxu1 %v1282_v12 }
 0x686   :  { %7101 = vmatprep.mubr.msk.f32.mxu1 %vm50_vm0, %v7850_v2  ;;  %7094 = vmatpush3.msra.mxu1 %v1282_v12 }
 0x687   :  { %7095 = vmatprep.subr.mxu1 %v1281_v13 }
 0x688   :  { %7096 = vmatpush3.msra.mxu1 %v1281_v13 }
 0x689   :  { %7097 = vmatprep.subr.mxu1 %v1280_v14 }
 0x68a   :  { %7098 = vmatpush3.msra.mxu1 %v1280_v14  ;;  %v6363_v14 = vld [vmem:[%s9001_s3 + $0x279] ss:$0 sm:$0xff] }
 0x68b   :  { %7099 = vmatprep.subr.mxu1 %v1279_v15 }
 0x68c   :  { %7100 = vmatpush3.msra.mxu1 %v1279_v15 }
 0x68d   :  { %7102 = vmatmul.mubr.msk.f32.vlgmr.msra.gmra.mxu1 %vm50_vm0, %v7857_v4  ;;  %7122 = vmatprep.subr.msk.mxu1 %vm50_vm0, %v8106_v63 }
 0x68e   :  { %7123 = vmatpush3.xpose.msk.msra.mxu1 %vm50_vm0, %v8106_v63 }
 0x73d   :  { %v7074_v1 = vpop.f32.mrf.mxu1 }
 0x73e   :  { %v8048_v3 = vadd.f32 %v7074_v1, %v7990_v23 }
 0x73f   :  { %v1081_v5 = vpop.f32.mrf.mxu1 }
 0x740   :  { %v8051_v6 = vadd.f32 %v1081_v5, %v7992_v27 }
 0x745   :  { %v7085_v7 = vpop.f32.mrf.mxu1 }
 0x746   :  { %v1173_v11 = vadd.f32 %v7085_v7, %v6350_v8 }
 0x747   :  { %v1167_v9 = vpop.f32.mrf.mxu1 }
 0x748   :  { %v1168_v10 = vadd.f32 %v6350_v8, %v1167_v9 }
 0x74a   :  { %7090 = vmatprep.mubr.msk.f32.mxu0 %vm50_vm0, %v1168_v10  ;;  %v6362_v10 = vld [vmem:[%s9001_s3 + $0x278] ss:$0 sm:$0xff] }
 0x74b   :  { %7091 = vmatmul.mubr.msk.f32.vlgmr.msra.gmra.mxu0 %vm50_vm0, %v1173_v11 }
 0x74d   :  { %v7103_v32 = vpop.f32.mrf.mxu1 }
 0x74e   :  { %7104 = vmatprep.subr.mxu0 %v7103_v32 }
 0x74f   :  { %v1349_v33 = vpop.f32.mrf.mxu1  ;;  %7105 = vmatpush3.msra.mxu0 %v7103_v32  ;;  %v1959_v32 = vld [vmem:[%s9001_s3 + $0x1b8] sm:$0xff] }
 0x750   :  { %7106 = vmatprep.subr.mxu0 %v1349_v33 }
 0x751   :  { %7107 = vmatpush3.msra.mxu0 %v1349_v33  ;;  %v1958_v33 = vld [vmem:[%s9001_s3 + $0x1b0] sm:$0xff] }
 0x80b   :  { %v7092_v16 = vpop.f32.mrf.mxu0 }
 0x80c   :  { %v1254_v17 = vadd.f32 %v7092_v16, %v7949_v25 }
 0x80d   :  { %v1248_v18 = vpop.f32.mrf.mxu0 }
 0x80e   :  { %v1249_v19 = vadd.f32 %v1248_v18, %v7944_v24  ;;  %v1260_v20 = vsel %vm213_vm1, %v1254_v17, -inf  ;;  %v8129_v18 = vld [vmem:[%s8999_s1] sm:$0xff] }
 0x80f   :  { %1261 = vmax.xlane.f32.xlu1 %v1260_v20  ;;  %7124 = vmatprep.subr.msk.mxu1 %vm50_vm0, %v8129_v18  ;;  %v1693_v20 = vld [vmem:[%s9001_s3 + $0x198] sm:$0xff] }
 0x810   :  { %v1257_v21 = vsel %vm213_vm1, %v1249_v19, -inf  ;;  %7125 = vmatpush3.xpose.msk.msra.mxu1 %vm50_vm0, %v8129_v18 }
 0x811   :  { %1258 = vmax.xlane.f32.xlu0 %v1257_v21  ;;  %v1692_v21 = vld [vmem:[%s9001_s3 + $0x190] sm:$0xff] }
 0x898   :  { %v1262_v22 = vpop.xlane.xlu1 %1261 }
 0x899   :  { %v1264_v23 = vsub.f32 %v1254_v17, %v1262_v22  ;;  %v1691_v22 = vld [vmem:[%s9001_s3 + $0x188] sm:$0xff] }
 0x89a   :  { %v1259_v26 = vpop.xlane.xlu0 %1258 }
 0x89b   :  { %v1267_v27 = vmul.f32 1.442695, %v1264_v23  ;;  %v1263_v28 = vsub.f32 %v1249_v19, %v1259_v26  ;;  %v1772_v19 = vld [vmem:[%s9001_s3 + $0x138] sm:$0xff]  ;;  %v6364_v26 = vld [vmem:[%s9001_s3 + $0x268] ss:$0 sm:$0xff] }
 0x89c   :  { %7140 = vmatprep.subr.mxu1 %v1772_v19 }
 0x89d   :  { %7631 = vpow2.f32 %v1267_v27  ;;  %v1265_v29 = vmul.f32 1.442695, %v1263_v28 }
 0x89f   :  { %7633 = vpow2.f32 %v1265_v29 }
 0x8aa   :  { %v7632_v30 = vpop.eup %7631 }
 0x8ab   :  { %v1272_v25 = vsel %vm213_vm1, %v7632_v30, 0.0 }
 0x8ac   :  { %v7634_v31 = vpop.eup %7633  ;;  %1273 = vadd.xlane.f32.xlu1 %v1272_v25  ;;  %v1770_v25 = vld [vmem:[%s9001_s3 + $0x128] sm:$0xff] }
 0x8ad   :  { %v1269_v24 = vsel %vm213_vm1, %v7634_v31, 0.0 }
 0x8ae   :  { %1270 = vadd.xlane.f32.xlu0 %v1269_v24  ;;  %v1690_v24 = vld [vmem:[%s9001_s3 + $0x180] sm:$0xff] }
 0x935   :  { %v1274_v34 = vpop.xlane.xlu1 %1273 }
 0x936   :  { %7635 = vrcp.f32 %v1274_v34  ;;  %v1957_v34 = vld [vmem:[%s9001_s3 + $0x1a8] sm:$0xff] }
 0x937   :  { %v1271_v35 = vpop.xlane.xlu0 %1270 }
 0x938   :  { %7637 = vrcp.f32 %v1271_v35  ;;  %v1956_v35 = vld [vmem:[%s9001_s3 + $0x1a0] sm:$0xff] }
 0x943   :  { %v7636_v36 = vpop.eup %7635 }
 0x944   :  { %v1278_v39 = vmul.f32 %v7636_v36, %v7632_v30  ;;  %v1771_v30 = vld [vmem:[%s9001_s3 + $0x130] sm:$0xff] }
 0x945   :  { %v7638_v37 = vpop.eup %7637 }
 0x946   :  { %v1277_v38 = vmul.f32 %v7638_v37, %v7634_v31  ;;  %v1769_v31 = vld [vmem:[%s9001_s3 + $0x120] sm:$0xff] }
 0x948   :  { %7108 = vmatprep.mubr.msk.f32.mxu0 %vm213_vm1, %v1277_v38 }
 0x949   :  { %7109 = vmatmul.mubr.msk.f32.vlgmr.msra.gmra.mxu0 %vm213_vm1, %v1278_v39  ;;  %v6373_v39 = vld [vmem:[%s9001_s3 + $0x269] ss:$0 sm:$0xff] }
 0xa09   :  { %v7110_v40 = vpop.f32.mrf.mxu0 }
 0xa0a   :  { %v1440_v42 = vadd.f32 %v7110_v40, %v8048_v3 }
 0xa0b   :  { %v1430_v43 = vpop.f32.mrf.mxu0 }
 0xa0c   :  { %v1447_v44 = vadd.f32 %v6361_v41, %v1440_v42  ;;  %v1439_v45 = vadd.f32 %v1430_v43, %v8051_v6 }
 0xa0e   :  { %v1446_v46 = vadd.f32 %v6361_v41, %v1439_v45  ;;  %v1449_v47 = vadd.f32 %v1447_v44, %v7857_v4  ;;  %v8206_v45 = vld [vmem:[%s9000_s2 + $0x18] sm:$0xff] }
 0xa10   :  { %v1455_v48 = vsel %vm50_vm0, %v1449_v47, 0.0  ;;  %v1448_v49 = vadd.f32 %v1446_v46, %v7850_v2  ;;  %v1494_v2 = vld [vmem:[%s9001_s3 + $0x118] sm:$0xff] }
 0xa11   :  { %1456 = vadd.xlane.f32.xlu1 %v1455_v48  ;;  %7111 = vmatprep.subr.mxu0 %v1494_v2  ;;  %v8212_v48 = vld [vmem:[%s9000_s2 + $0x10] sm:$0xff] }
 0xa12   :  { %v1452_v50 = vsel %vm50_vm0, %v1448_v49, 0.0  ;;  %7112 = vmatpush3.msra.mxu0 %v1494_v2 }
 0xa13   :  { %1453 = vadd.xlane.f32.xlu0 %v1452_v50  ;;  %7113 = vmatprep.subr.mxu0 %v1493_v60 }
 0xa14   :  { %7114 = vmatpush3.msra.mxu0 %v1493_v60 }
 0xa15   :  { %7115 = vmatprep.subr.mxu0 %v1492_v61 }
 0xa16   :  { %7116 = vmatpush3.msra.mxu0 %v1492_v61 }
 0xa17   :  { %7117 = vmatprep.subr.mxu0 %v1491_v62 }
 0xa18   :  { %7118 = vmatpush3.msra.mxu0 %v1491_v62 }
 0xa19   :  { %7129 = vmatprep.subr.mxu0 %v1693_v20 }
 0xa9a   :  { %v1457_v51 = vpop.xlane.xlu1 %1456 }
 0xa9b   :  { %v1460_v52 = vmul.f32 0.03125, %v1457_v51 }
 0xa9c   :  { %v1454_v53 = vpop.xlane.xlu0 %1453 }
 0xa9d   :  { %v1462_v54 = vsub.f32 %v1449_v47, %v1460_v52  ;;  %v1459_v55 = vmul.f32 0.03125, %v1454_v53 }
 0xa9f   :  { %v1461_v56 = vsub.f32 %v1448_v49, %v1459_v55  ;;  %v1464_v57 = vmul.f32 %v1462_v54, %v1462_v54 }
 0xaa1   :  { %v1468_v58 = vsel %vm50_vm0, %v1464_v57, 0.0  ;;  %v1463_v59 = vmul.f32 %v1461_v56, %v1461_v56 }
 0xaa2   :  { %1469 = vadd.xlane.f32.xlu1 %v1468_v58 }
 0xaa3   :  { %v1465_v4 = vsel %vm50_vm0, %v1463_v59, 0.0 }
 0xaa4   :  { %1466 = vadd.xlane.f32.xlu0 %v1465_v4 }
 0xb2b   :  { %v1470_v0 = vpop.xlane.xlu1 %1469 }
 0xb2c   :  { %v1472_v1 = vmul.f32 0.03125, %v1470_v0 }
 0xb2d   :  { %v1467_v3 = vpop.xlane.xlu0 %1466 }
 0xb2e   :  { %v1474_v5 = vadd.f32 1e-05, %v1472_v1  ;;  %v1471_v6 = vmul.f32 0.03125, %v1467_v3 }
 0xb30   :  { %7639 = vrsqrt.f32 %v1474_v5  ;;  %v1473_v7 = vadd.f32 1e-05, %v1471_v6  ;;  %v2200_v6 = vld [vmem:[%s9001_s3 + $0x158] sm:$0xff] }
 0xb32   :  { %7641 = vrsqrt.f32 %v1473_v7 }
 0xb3d   :  { %v7640_v8 = vpop.eup %7639 }
 0xb3e   :  { %v1478_v9 = vmul.f32 %v7640_v8, %v1462_v54 }
 0xb3f   :  { %v7642_v11 = vpop.eup %7641 }
 0xb40   :  { %v1477_v12 = vmul.f32 %v7642_v11, %v1461_v56  ;;  %v1484_v13 = vmul.f32 %v6362_v10, %v1478_v9 }
 0xb42   :  { %v1483_v15 = vmul.f32 %v6362_v10, %v1477_v12  ;;  %v8120_v17 = vadd.f32 %v6363_v14, %v1484_v13 }
 0xb44   :  { %v8118_v16 = vadd.f32 %v6363_v14, %v1483_v15 }
 0xb46   :  { %7119 = vmatprep.mubr.msk.f32.mxu0 %vm50_vm0, %v8118_v16 }
 0xb47   :  { %7120 = vmatmul.mubr.msk.f32.vlgmr.msra.gmra.mxu0 %vm50_vm0, %v8120_v17 }
 0xb48   :  { %7137 = vmatprep.mubr.msk.f32.mxu0 %vm50_vm0, %v8129_v18  ;;  %7130 = vmatpush3.msra.mxu0 %v1693_v20 }
 0xb49   :  { %7131 = vmatprep.subr.mxu0 %v1692_v21 }
 0xb4a   :  { %7132 = vmatpush3.msra.mxu0 %v1692_v21 }
 0xb4b   :  { %7133 = vmatprep.subr.mxu0 %v1691_v22 }
 0xb4c   :  { %7134 = vmatpush3.msra.mxu0 %v1691_v22  ;;  %v2199_v22 = vld [vmem:[%s9001_s3 + $0x150] sm:$0xff] }
 0xb4d   :  { %7135 = vmatprep.subr.mxu0 %v1690_v24 }
 0xb4e   :  { %7136 = vmatpush3.msra.mxu0 %v1690_v24 }
 0xb4f   :  { %7138 = vmatmul.mubr.msk.f32.vlgmr.msra.gmra.mxu0 %vm50_vm0, %v8106_v63  ;;  %7151 = vmatprep.subr.msk.mxu0 %vm50_vm0, %v8106_v63 }
 0xb50   :  { %7152 = vmatpush3.xpose.msk.msra.mxu0 %vm50_vm0, %v8106_v63 }
 0xb51   :  { %7153 = vmatprep.subr.msk.mxu0 %vm50_vm0, %v8129_v18 }
 0xb54   :  { %7154 = vmatpush3.xpose.msk.msra.mxu0 %vm50_vm0, %v8129_v18 }
 0xc07   :  { %v7121_v23 = vpop.f32.mrf.mxu0 }
 0xc08   :  { %v1578_v29 = vadd.f32 %v7121_v23, %v6364_v26  ;;  %v2198_v23 = vld [vmem:[%s9001_s3 + $0x148] sm:$0xff] }
 0xc09   :  { %v1572_v27 = vpop.f32.mrf.mxu0 }
 0xc0a   :  { %v1573_v28 = vadd.f32 %v6364_v26, %v1572_v27 }
 0xc0c   :  { %7126 = vmatprep.mubr.msk.f32.mxu1 %vm50_vm0, %v1573_v28  ;;  %v2197_v28 = vld [vmem:[%s9001_s3 + $0x140] sm:$0xff] }
 0xc0d   :  { %7127 = vmatmul.mubr.msk.f32.vlgmr.msra.gmra.mxu1 %vm50_vm0, %v1578_v29 }
 0xc0e   :  { %7141 = vmatpush3.msra.mxu1 %v1772_v19  ;;  %7148 = vmatprep.mubr.msk.f32.mxu1 %vm50_vm0, %v8118_v16 }
 0xc0f   :  { %7142 = vmatprep.subr.mxu1 %v1771_v30  ;;  %v7139_v43 = vpop.f32.mrf.mxu0 }
 0xc10   :  { %7143 = vmatpush3.msra.mxu1 %v1771_v30 }
 0xc11   :  { %7144 = vmatprep.subr.mxu1 %v1770_v25  ;;  %v1760_v44 = vpop.f32.mrf.mxu0 }
 0xc12   :  { %7145 = vmatpush3.msra.mxu1 %v1770_v25 }
 0xc13   :  { %7146 = vmatprep.subr.mxu1 %v1769_v31 }
 0xc14   :  { %7147 = vmatpush3.msra.mxu1 %v1769_v31 }
 0xc15   :  { %7149 = vmatmul.mubr.msk.f32.vlgmr.msra.gmra.mxu1 %vm50_vm0, %v8120_v17  ;;  %7158 = vmatprep.subr.mxu1 %v1959_v32 }
 0xc16   :  { %7166 = vmatprep.mubr.msk.f32.mxu1 %vm50_vm0, %v8129_v18  ;;  %7159 = vmatpush3.msra.mxu1 %v1959_v32 }
 0xc17   :  { %7160 = vmatprep.subr.mxu1 %v1958_v33 }
 0xc18   :  { %7161 = vmatpush3.msra.mxu1 %v1958_v33 }
 0xc19   :  { %7162 = vmatprep.subr.mxu1 %v1957_v34 }
 0xc1a   :  { %7163 = vmatpush3.msra.mxu1 %v1957_v34 }
 0xc1b   :  { %7164 = vmatprep.subr.mxu1 %v1956_v35 }
 0xc1c   :  { %7165 = vmatpush3.msra.mxu1 %v1956_v35 }
 0xc1d   :  { %7167 = vmatmul.mubr.msk.f32.vlgmr.msra.gmra.mxu1 %vm50_vm0, %v8106_v63  ;;  %7176 = vmatprep.subr.mxu1 %v7139_v43 }
 0xc1e   :  { %7177 = vmatpush3.msra.mxu1 %v7139_v43  ;;  %v2386_v43 = vld [vmem:[%s9001_s3 + $0x1d0] sm:$0xff] }
 0xc1f   :  { %7178 = vmatprep.subr.mxu1 %v1760_v44 }
 0xc20   :  { %7179 = vmatpush3.msra.mxu1 %v1760_v44  ;;  %v2385_v44 = vld [vmem:[%s9001_s3 + $0x1c8] sm:$0xff] }
 0xc21   :  { %7194 = vmatprep.subr.msk.mxu1 %vm50_vm0, %v8106_v63 }
 0xccd   :  { %v7128_v36 = vpop.f32.mrf.mxu1 }
 0xcce   :  { %v1665_v4 = vadd.f32 %v7128_v36, %v8206_v45 }
 0xccf   :  { %v1659_v37 = vpop.f32.mrf.mxu1 }
 0xcd0   :  { %v1660_v61 = vadd.f32 %v8212_v48, %v1659_v37  ;;  %v1671_v0 = vsel %vm213_vm1, %v1665_v4, -inf }
 0xcd2   :  { %v1668_v1 = vsel %vm213_vm1, %v1660_v61, -inf }
 0xcd5   :  { %v7150_v38 = vpop.f32.mrf.mxu1 }
 0xcd6   :  { %v1850_v42 = vadd.f32 %v7150_v38, %v6373_v39  ;;  %v6386_v38 = vld [vmem:[%s9001_s3 + $0x26a] ss:$0 sm:$0xff] }
 0xcd7   :  { %v1844_v40 = vpop.f32.mrf.mxu1 }
 0xcd8   :  { %v1845_v41 = vadd.f32 %v6373_v39, %v1844_v40 }
 0xcda   :  { %7155 = vmatprep.mubr.msk.f32.mxu0 %vm50_vm0, %v1845_v41 }
 0xcdb   :  { %7156 = vmatmul.mubr.msk.f32.vlgmr.msra.gmra.mxu0 %vm50_vm0, %v1850_v42  ;;  %v2387_v42 = vld [vmem:[%s9001_s3 + $0x1d8] sm:$0xff] }
 0xcdd   :  { %v7168_v3 = vpop.f32.mrf.mxu1 }
 0xcde   :  { %7169 = vmatprep.subr.mxu0 %v7168_v3 }
 0xcdf   :  { %v2026_v5 = vpop.f32.mrf.mxu1  ;;  %7170 = vmatpush3.msra.mxu0 %v7168_v3 }
 0xce0   :  { %7171 = vmatprep.subr.mxu0 %v2026_v5 }
 0xce1   :  { %7172 = vmatpush3.msra.mxu0 %v2026_v5  ;;  %v2549_v5 = vld [vmem:[%s9001_s3 + $0x178] sm:$0xff] }
 0xce2   :  { %7183 = vmatprep.subr.mxu0 %v2200_v6 }
 0xd9b   :  { %v7157_v46 = vpop.f32.mrf.mxu0 }
 0xd9c   :  { %v1931_v47 = vadd.f32 %v7157_v46, %v8206_v45  ;;  %v2384_v46 = vld [vmem:[%s9001_s3 + $0x1c0] sm:$0xff] }
 0xd9d   :  { %v1925_v49 = vpop.f32.mrf.mxu0 }
 0xd9e   :  { %v1926_v50 = vadd.f32 %v8212_v48, %v1925_v49  ;;  %v1937_v51 = vsel %vm213_vm1, %v1931_v47, -inf }
 0xd9f   :  { %1938 = vmax.xlane.f32.xlu1 %v1937_v51 }
 0xda0   :  { %v1934_v52 = vsel %vm213_vm1, %v1926_v50, -inf }
 0xda1   :  { %1935 = vmax.xlane.f32.xlu0 %v1934_v52 }
 0xe28   :  { %v1939_v53 = vpop.xlane.xlu1 %1938 }
 0xe29   :  { %v1941_v54 = vsub.f32 %v1931_v47, %v1939_v53 }
 0xe2a   :  { %v1936_v55 = vpop.xlane.xlu0 %1935 }
 0xe2b   :  { %v1944_v56 = vmul.f32 1.442695, %v1941_v54  ;;  %v1940_v57 = vsub.f32 %v1926_v50, %v1936_v55 }
 0xe2d   :  { %7643 = vpow2.f32 %v1944_v56  ;;  %v1942_v58 = vmul.f32 1.442695, %v1940_v57 }
 0xe2f   :  { %7645 = vpow2.f32 %v1942_v58 }
 0xe3a   :  { %v7644_v59 = vpop.eup %7643 }
 0xe3b   :  { %v1949_v2 = vsel %vm213_vm1, %v7644_v59, 0.0 }
 0xe3c   :  { %v7646_v60 = vpop.eup %7645  ;;  %1950 = vadd.xlane.f32.xlu1 %v1949_v2 }
 0xe3d   :  { %v1946_v62 = vsel %vm213_vm1, %v7646_v60, 0.0 }
 0xe3e   :  { %1947 = vadd.xlane.f32.xlu0 %v1946_v62 }
 0xe40   :  { %1672 = vmax.xlane.f32.xlu1 %v1671_v0 }
 0xe42   :  { %1669 = vmax.xlane.f32.xlu0 %v1668_v1 }
 0xec5   :  { %v1951_v7 = vpop.xlane.xlu1 %1950 }
 0xec6   :  { %7647 = vrcp.f32 %v1951_v7 }
 0xec7   :  { %v1948_v8 = vpop.xlane.xlu0 %1947 }
 0xec8   :  { %7649 = vrcp.f32 %v1948_v8 }
 0xec9   :  { %v1673_v9 = vpop.xlane.xlu1 %1672 }
 0xeca   :  { %v1675_v10 = vsub.f32 %v1665_v4, %v1673_v9 }
 0xecb   :  { %v1670_v11 = vpop.xlane.xlu0 %1669 }
 0xecc   :  { %v1678_v12 = vmul.f32 1.442695, %v1675_v10  ;;  %v1674_v13 = vsub.f32 %v1660_v61, %v1670_v11 }
 0xece   :  { %7651 = vpow2.f32 %v1678_v12  ;;  %v1676_v14 = vmul.f32 1.442695, %v1674_v13  ;;  %v2548_v12 = vld [vmem:[%s9001_s3 + $0x170] sm:$0xff]  ;;  %v2547_v13 = vld [vmem:[%s9001_s3 + $0x168] sm:$0xff] }
 0xed0   :  { %7653 = vpow2.f32 %v1676_v14  ;;  %v2546_v14 = vld [vmem:[%s9001_s3 + $0x160] sm:$0xff] }
 0xed3   :  { %v7648_v15 = vpop.eup %7647 }
 0xed4   :  { %v1955_v21 = vmul.f32 %v7648_v15, %v7644_v59 }
 0xed5   :  { %v7650_v19 = vpop.eup %7649 }
 0xed6   :  { %v1954_v20 = vmul.f32 %v7650_v19, %v7646_v60 }
 0xed8   :  { %7173 = vmatprep.mubr.msk.f32.mxu0 %vm213_vm1, %v1954_v20 }
 0xed9   :  { %7174 = vmatmul.mubr.msk.f32.vlgmr.msra.gmra.mxu0 %vm213_vm1, %v1955_v21 }
 0xeda   :  { %7184 = vmatpush3.msra.mxu0 %v2200_v6  ;;  %7191 = vmatprep.mubr.msk.f32.mxu0 %vm50_vm0, %v8118_v16 }
 0xedb   :  { %v7652_v26 = vpop.eup %7651  ;;  %7185 = vmatprep.subr.mxu0 %v2199_v22 }
 0xedc   :  { %7186 = vmatpush3.msra.mxu0 %v2199_v22  ;;  %v1683_v27 = vsel %vm213_vm1, %v7652_v26, 0.0 }
 0xedd   :  { %v7654_v29 = vpop.eup %7653  ;;  %7187 = vmatprep.subr.mxu0 %v2198_v23  ;;  %1684 = vadd.xlane.f32.xlu1 %v1683_v27  ;;  %v6397_v27 = vld [vmem:[%s9001_s3 + $0x26b] ss:$0 sm:$0xff] }
 0xede   :  { %7188 = vmatpush3.msra.mxu0 %v2198_v23  ;;  %v1680_v30 = vsel %vm213_vm1, %v7654_v29, 0.0 }
 0xedf   :  { %7189 = vmatprep.subr.mxu0 %v2197_v28  ;;  %1681 = vadd.xlane.f32.xlu0 %v1680_v30 }
 0xee0   :  { %7190 = vmatpush3.msra.mxu0 %v2197_v28 }
 0xee1   :  { %7192 = vmatmul.mubr.msk.f32.vlgmr.msra.gmra.mxu0 %vm50_vm0, %v8120_v17  ;;  %7201 = vmatprep.subr.mxu0 %v2387_v42 }
 0xee2   :  { %7209 = vmatprep.mubr.msk.f32.mxu0 %vm50_vm0, %v8129_v18  ;;  %7202 = vmatpush3.msra.mxu0 %v2387_v42 }
 0xee3   :  { %7203 = vmatprep.subr.mxu0 %v2386_v43 }
 0xee4   :  { %7204 = vmatpush3.msra.mxu0 %v2386_v43 }
 0xee5   :  { %7205 = vmatprep.subr.mxu0 %v2385_v44 }
 0xee6   :  { %7206 = vmatpush3.msra.mxu0 %v2385_v44 }
 0xee7   :  { %7207 = vmatprep.subr.mxu0 %v2384_v46 }
 0xee8   :  { %7208 = vmatpush3.msra.mxu0 %v2384_v46 }
 0xee9   :  { %7210 = vmatmul.mubr.msk.f32.vlgmr.msra.gmra.mxu0 %vm50_vm0, %v8106_v63  ;;  %7230 = vmatprep.subr.msk.mxu0 %vm50_vm0, %v8106_v63 }
 0xeea   :  { %7231 = vmatpush3.xpose.msk.msra.mxu0 %vm50_vm0, %v8106_v63 }
 0xeeb   :  { %7232 = vmatprep.subr.msk.mxu0 %vm50_vm0, %v8129_v18 }
 0xeee   :  { %7233 = vmatpush3.xpose.msk.msra.mxu0 %vm50_vm0, %v8129_v18 }
 0xf66   :  { %v1685_v25 = vpop.xlane.xlu1 %1684 }
 0xf67   :  { %7655 = vrcp.f32 %v1685_v25  ;;  %v2735_v25 = vld [vmem:[%s9001_s3 + $0x1f0] sm:$0xff] }
 0xf68   :  { %v1682_v31 = vpop.xlane.xlu0 %1681 }
 0xf69   :  { %7657 = vrcp.f32 %v1682_v31  ;;  %v2734_v31 = vld [vmem:[%s9001_s3 + $0x1e8] sm:$0xff] }
 0xf74   :  { %v7656_v24 = vpop.eup %7655 }
 0xf75   :  { %v1689_v34 = vmul.f32 %v7656_v24, %v7652_v26  ;;  %v2733_v24 = vld [vmem:[%s9001_s3 + $0x1e0] sm:$0xff] }
 0xf76   :  { %v7658_v32 = vpop.eup %7657 }
 0xf77   :  { %v1688_v33 = vmul.f32 %v7658_v32, %v7654_v29 }
 0xf79   :  { %7180 = vmatprep.mubr.msk.f32.mxu1 %vm213_vm1, %v1688_v33 }
 0xf7a   :  { %7181 = vmatmul.mubr.msk.f32.vlgmr.msra.gmra.mxu1 %vm213_vm1, %v1689_v34 }
 0xf7b   :  { %7195 = vmatpush3.xpose.msk.msra.mxu1 %vm50_vm0, %v8106_v63 }
 0xf7c   :  { %7196 = vmatprep.subr.msk.mxu1 %vm50_vm0, %v8129_v18 }
 0xf7f   :  { %7197 = vmatpush3.xpose.msk.msra.mxu1 %vm50_vm0, %v8129_v18 }
 0xf99   :  { %v8253_v35 = vpop.f32.mrf.mxu0 }
 0xf9b   :  { %v8255_v36 = vpop.f32.mrf.mxu0 }
 0xfa1   :  { %v7193_v37 = vpop.f32.mrf.mxu0 }
 0xfa2   :  { %v2278_v41 = vadd.f32 %v7193_v37, %v6386_v38 }
 0xfa3   :  { %v2272_v39 = vpop.f32.mrf.mxu0 }
 0xfa4   :  { %v2273_v40 = vadd.f32 %v6386_v38, %v2272_v39 }
 0xfa6   :  { %7198 = vmatprep.mubr.msk.f32.mxu1 %vm50_vm0, %v2273_v40 }
 0xfa7   :  { %7199 = vmatmul.mubr.msk.f32.vlgmr.msra.gmra.mxu1 %vm50_vm0, %v2278_v41 }
 0xfa9   :  { %v7211_v1 = vpop.f32.mrf.mxu0 }
 0xfaa   :  { %7212 = vmatprep.subr.mxu1 %v7211_v1 }
 0xfab   :  { %v2454_v3 = vpop.f32.mrf.mxu0  ;;  %7213 = vmatpush3.msra.mxu1 %v7211_v1 }
 0xfac   :  { %7214 = vmatprep.subr.mxu1 %v2454_v3 }
 0xfad   :  { %7215 = vmatpush3.msra.mxu1 %v2454_v3 }
 0xfae   :  { %7219 = vmatprep.subr.mxu1 %v2549_v5 }
0x103a   :  { %v7182_v47 = vpop.f32.mrf.mxu1 }
0x103b   :  { %v2194_v15 = vadd.f32 %v7182_v47, %v8253_v35 }
0x103c   :  { %v2188_v49 = vpop.f32.mrf.mxu1 }
0x103d   :  { %v2189_v20 = vadd.f32 %v2188_v49, %v8255_v36 }
0x1067   :  { %v7200_v50 = vpop.f32.mrf.mxu1 }
0x1068   :  { %v2359_v51 = vadd.f32 %v7200_v50, %v8206_v45 }
0x1069   :  { %v2353_v52 = vpop.f32.mrf.mxu1 }
0x106a   :  { %v2354_v53 = vadd.f32 %v8212_v48, %v2353_v52  ;;  %v2365_v54 = vsel %vm213_vm1, %v2359_v51, -inf }
0x106b   :  { %2366 = vmax.xlane.f32.xlu1 %v2365_v54 }
0x106c   :  { %v2362_v55 = vsel %vm213_vm1, %v2354_v53, -inf }
0x106d   :  { %2363 = vmax.xlane.f32.xlu0 %v2362_v55 }
0x10f4   :  { %v2367_v56 = vpop.xlane.xlu1 %2366 }
0x10f5   :  { %v2369_v57 = vsub.f32 %v2359_v51, %v2367_v56  ;;  %v6408_v56 = vld [vmem:[%s9001_s3 + $0x26c] ss:$0 sm:$0xff] }
0x10f6   :  { %v2364_v58 = vpop.xlane.xlu0 %2363 }
0x10f7   :  { %v2372_v59 = vmul.f32 1.442695, %v2369_v57  ;;  %v2368_v4 = vsub.f32 %v2354_v53, %v2364_v58 }
0x10f9   :  { %7659 = vpow2.f32 %v2372_v59  ;;  %v2370_v2 = vmul.f32 1.442695, %v2368_v4 }
0x10fb   :  { %7661 = vpow2.f32 %v2370_v2 }
0x1106   :  { %v7660_v60 = vpop.eup %7659 }
0x1107   :  { %v2377_v61 = vsel %vm213_vm1, %v7660_v60, 0.0 }
0x1108   :  { %v7662_v62 = vpop.eup %7661  ;;  %2378 = vadd.xlane.f32.xlu1 %v2377_v61 }
0x1109   :  { %v2374_v0 = vsel %vm213_vm1, %v7662_v62, 0.0 }
0x110a   :  { %2375 = vadd.xlane.f32.xlu0 %v2374_v0 }
0x1191   :  { %v2379_v6 = vpop.xlane.xlu1 %2378 }
0x1192   :  { %7663 = vrcp.f32 %v2379_v6 }
0x1193   :  { %v2376_v7 = vpop.xlane.xlu0 %2375 }
0x1194   :  { %7665 = vrcp.f32 %v2376_v7 }
0x119f   :  { %v7664_v8 = vpop.eup %7663 }
0x11a0   :  { %v2383_v11 = vmul.f32 %v7664_v8, %v7660_v60 }
0x11a1   :  { %v7666_v9 = vpop.eup %7665 }
0x11a2   :  { %v2382_v10 = vmul.f32 %v7666_v9, %v7662_v62 }
0x11a4   :  { %7216 = vmatprep.mubr.msk.f32.mxu1 %vm213_vm1, %v2382_v10 }
0x11a5   :  { %7217 = vmatmul.mubr.msk.f32.vlgmr.msra.gmra.mxu1 %vm213_vm1, %v2383_v11 }
0x11a6   :  { %7220 = vmatpush3.msra.mxu1 %v2549_v5  ;;  %7227 = vmatprep.mubr.msk.f32.mxu1 %vm50_vm0, %v8118_v16 }
0x11a7   :  { %7221 = vmatprep.subr.mxu1 %v2548_v12 }
0x11a8   :  { %7222 = vmatpush3.msra.mxu1 %v2548_v12  ;;  %v2946_v12 = vld [vmem:[%s9001_s3 + $0x210] sm:$0xff] }
0x11a9   :  { %7223 = vmatprep.subr.mxu1 %v2547_v13 }
0x11aa   :  { %7224 = vmatpush3.msra.mxu1 %v2547_v13  ;;  %v2945_v13 = vld [vmem:[%s9001_s3 + $0x208] sm:$0xff] }
0x11ab   :  { %7225 = vmatprep.subr.mxu1 %v2546_v14 }
0x11ac   :  { %7226 = vmatpush3.msra.mxu1 %v2546_v14  ;;  %v2944_v14 = vld [vmem:[%s9001_s3 + $0x200] sm:$0xff] }
0x11ad   :  { %7228 = vmatmul.mubr.msk.f32.vlgmr.msra.gmra.mxu1 %vm50_vm0, %v8120_v17 }
0x11ae   :  { %7245 = vmatprep.mubr.msk.f32.mxu1 %vm50_vm0, %v8129_v18  ;;  %v2736_v18 = vld [vmem:[%s9001_s3 + $0x1f8] sm:$0xff] }
0x11af   :  { %7237 = vmatprep.subr.mxu1 %v2736_v18 }
0x11b0   :  { %7238 = vmatpush3.msra.mxu1 %v2736_v18  ;;  %v6409_v18 = vld [vmem:[%s9001_s3 + $0x27a] ss:$0 sm:$0xff] }
0x11b1   :  { %7239 = vmatprep.subr.mxu1 %v2735_v25 }
0x11b2   :  { %7240 = vmatpush3.msra.mxu1 %v2735_v25 }
0x11b3   :  { %7241 = vmatprep.subr.mxu1 %v2734_v31 }
0x11b4   :  { %7242 = vmatpush3.msra.mxu1 %v2734_v31 }
0x11b5   :  { %7243 = vmatprep.subr.mxu1 %v2733_v24 }
0x11b6   :  { %7244 = vmatpush3.msra.mxu1 %v2733_v24 }
0x11b7   :  { %7246 = vmatmul.mubr.msk.f32.vlgmr.msra.gmra.mxu1 %vm50_vm0, %v8106_v63 }
0x1265   :  { %v7218_v19 = vpop.f32.mrf.mxu1 }
0x1266   :  { %v8312_v21 = vadd.f32 %v7218_v19, %v2194_v15  ;;  %v3043_v15 = vld [vmem:[%s9001_s3 + $0x258] sm:$0xff]  ;;  %v3042_v19 = vld [vmem:[%s9001_s3 + $0x250] sm:$0xff] }
0x1267   :  { %v2535_v22 = vpop.f32.mrf.mxu1  ;;  %7266 = vmatprep.subr.mxu1 %v3043_v15 }
0x1268   :  { %v8314_v23 = vadd.f32 %v2535_v22, %v2189_v20  ;;  %7267 = vmatpush3.msra.mxu1 %v3043_v15  ;;  %v3041_v20 = vld [vmem:[%s9001_s3 + $0x248] sm:$0xff] }
0x1269   :  { %7268 = vmatprep.subr.mxu1 %v3042_v19 }
0x126a   :  { %7269 = vmatpush3.msra.mxu1 %v3042_v19  ;;  %v6417_v19 = vld [vmem:[%s9001_s3 + $0x27c] ss:$0 sm:$0xff] }
0x126b   :  { %7270 = vmatprep.subr.mxu1 %v3041_v20 }
0x126c   :  { %7271 = vmatpush3.msra.mxu1 %v3041_v20 }
0x126d   :  { %v7229_v26 = vpop.f32.mrf.mxu1 }
0x126e   :  { %v2627_v30 = vadd.f32 %v7229_v26, %v6397_v27 }
0x126f   :  { %v2621_v28 = vpop.f32.mrf.mxu1 }
0x1270   :  { %v2622_v29 = vadd.f32 %v6397_v27, %v2621_v28 }
0x1272   :  { %7234 = vmatprep.mubr.msk.f32.mxu0 %vm50_vm0, %v2622_v29 }
0x1273   :  { %7235 = vmatmul.mubr.msk.f32.vlgmr.msra.gmra.mxu0 %vm50_vm0, %v2627_v30 }
0x1277   :  { %v7247_v46 = vpop.f32.mrf.mxu1 }
0x1278   :  { %7248 = vmatprep.subr.mxu0 %v7247_v46 }
0x1279   :  { %v2803_v47 = vpop.f32.mrf.mxu1  ;;  %7249 = vmatpush3.msra.mxu0 %v7247_v46  ;;  %v6414_v46 = vld [vmem:[%s9001_s3 + $0x271] ss:$0 sm:$0xff] }
0x127a   :  { %7250 = vmatprep.subr.mxu0 %v2803_v47 }
0x127b   :  { %7251 = vmatpush3.msra.mxu0 %v2803_v47 }
0x1333   :  { %v7236_v32 = vpop.f32.mrf.mxu0 }
0x1334   :  { %v2708_v33 = vadd.f32 %v7236_v32, %v8206_v45 }
0x1335   :  { %v2702_v34 = vpop.f32.mrf.mxu0 }
0x1336   :  { %v2703_v35 = vadd.f32 %v8212_v48, %v2702_v34  ;;  %v2714_v36 = vsel %vm213_vm1, %v2708_v33, -inf }
0x1337   :  { %2715 = vmax.xlane.f32.xlu1 %v2714_v36 }
0x1338   :  { %v2711_v37 = vsel %vm213_vm1, %v2703_v35, -inf }
0x1339   :  { %2712 = vmax.xlane.f32.xlu0 %v2711_v37  ;;  %v3039_v37 = vld [vmem:[%s9001_s3 + $0x238] sm:$0xff] }
0x13c0   :  { %v2716_v38 = vpop.xlane.xlu1 %2715 }
0x13c1   :  { %v2718_v39 = vsub.f32 %v2708_v33, %v2716_v38  ;;  %v6410_v33 = vld [vmem:[%s9001_s3 + $0x27b] ss:$0 sm:$0xff]  ;;  %v3038_v38 = vld [vmem:[%s9001_s3 + $0x230] sm:$0xff] }
0x13c2   :  { %v2713_v40 = vpop.xlane.xlu0 %2712 }
0x13c3   :  { %v2721_v41 = vmul.f32 1.442695, %v2718_v39  ;;  %v2717_v42 = vsub.f32 %v2703_v35, %v2713_v40  ;;  %v3037_v39 = vld [vmem:[%s9001_s3 + $0x228] sm:$0xff]  ;;  %v3036_v40 = vld [vmem:[%s9001_s3 + $0x220] sm:$0xff] }
0x13c5   :  { %7667 = vpow2.f32 %v2721_v41  ;;  %v2719_v43 = vmul.f32 1.442695, %v2717_v42  ;;  %v6411_v41 = vld [vmem:[%s9001_s3 + $0x270] ss:$0 sm:$0xff] }
0x13c7   :  { %7669 = vpow2.f32 %v2719_v43 }
0x13d2   :  { %v7668_v63 = vpop.eup %7667 }
0x13d3   :  { %v2726_v45 = vsel %vm213_vm1, %v7668_v63, 0.0 }
0x13d4   :  { %v7670_v44 = vpop.eup %7669  ;;  %2727 = vadd.xlane.f32.xlu1 %v2726_v45 }
0x13d5   :  { %v2723_v48 = vsel %vm213_vm1, %v7670_v44, 0.0 }
0x13d6   :  { %2724 = vadd.xlane.f32.xlu0 %v2723_v48 }
0x145d   :  { %v2728_v49 = vpop.xlane.xlu1 %2727 }
0x145e   :  { %7671 = vrcp.f32 %v2728_v49 }
0x145f   :  { %v2725_v50 = vpop.xlane.xlu0 %2724 }
0x1460   :  { %7673 = vrcp.f32 %v2725_v50 }
0x146b   :  { %v7672_v51 = vpop.eup %7671 }
0x146c   :  { %v2732_v54 = vmul.f32 %v7672_v51, %v7668_v63 }
0x146d   :  { %v7674_v52 = vpop.eup %7673 }
0x146e   :  { %v2731_v53 = vmul.f32 %v7674_v52, %v7670_v44 }
0x1470   :  { %7252 = vmatprep.mubr.msk.f32.mxu0 %vm213_vm1, %v2731_v53 }
0x1471   :  { %7253 = vmatmul.mubr.msk.f32.vlgmr.msra.gmra.mxu0 %vm213_vm1, %v2732_v54 }
0x1531   :  { %v7254_v55 = vpop.f32.mrf.mxu0 }
0x1532   :  { %v2894_v57 = vadd.f32 %v7254_v55, %v8312_v21  ;;  %v3040_v21 = vld [vmem:[%s9001_s3 + $0x240] sm:$0xff] }
0x1533   :  { %v2884_v58 = vpop.f32.mrf.mxu0  ;;  %7272 = vmatprep.subr.mxu1 %v3040_v21 }
0x1534   :  { %v2901_v59 = vadd.f32 %v6408_v56, %v2894_v57  ;;  %v2893_v4 = vadd.f32 %v2884_v58, %v8314_v23  ;;  %7273 = vmatpush3.msra.mxu1 %v3040_v21 }
0x1535   :  { %7274 = vmatprep.subr.mxu1 %v3039_v37 }
0x1536   :  { %v2900_v2 = vadd.f32 %v6408_v56, %v2893_v4  ;;  %v2903_v60 = vadd.f32 %v2901_v59, %v8120_v17  ;;  %7275 = vmatpush3.msra.mxu1 %v3039_v37  ;;  %v6451_v37 = vld [vmem:[%s9001_s3 + $0x330] sm:$0xff] }
0x1537   :  { %7276 = vmatprep.subr.mxu1 %v3038_v38 }
0x1538   :  { %v2909_v61 = vsel %vm50_vm0, %v2903_v60, 0.0  ;;  %v2902_v62 = vadd.f32 %v2900_v2, %v8118_v16  ;;  %v2947_v16 = vld [vmem:[%s9001_s3 + $0x218] sm:$0xff]  ;;  %7277 = vmatpush3.msra.mxu1 %v3038_v38  ;;  %v6450_v38 = vld [vmem:[%s9001_s3 + $0x328] sm:$0xff] }
0x1539   :  { %2910 = vadd.xlane.f32.xlu1 %v2909_v61  ;;  %7255 = vmatprep.subr.mxu0 %v2947_v16 }
0x153a   :  { %v2906_v0 = vsel %vm50_vm0, %v2902_v62, 0.0  ;;  %7256 = vmatpush3.msra.mxu0 %v2947_v16  ;;  %7278 = vmatprep.subr.mxu1 %v3037_v39 }
0x153b   :  { %2907 = vadd.xlane.f32.xlu0 %v2906_v0  ;;  %7257 = vmatprep.subr.mxu0 %v2946_v12 }
0x153c   :  { %7258 = vmatpush3.msra.mxu0 %v2946_v12  ;;  %7279 = vmatpush3.msra.mxu1 %v3037_v39  ;;  %v6449_v39 = vld [vmem:[%s9001_s3 + $0x320] sm:$0xff] }
0x153d   :  { %7259 = vmatprep.subr.mxu0 %v2945_v13  ;;  %7280 = vmatprep.subr.mxu1 %v3036_v40 }
0x153e   :  { %7260 = vmatpush3.msra.mxu0 %v2945_v13  ;;  %7281 = vmatpush3.msra.mxu1 %v3036_v40  ;;  %v6462_v40 = vld [vmem:[%s9001_s3 + $0x2d8] sm:$0xff] }
0x153f   :  { %7261 = vmatprep.subr.mxu0 %v2944_v14 }
0x1540   :  { %7262 = vmatpush3.msra.mxu0 %v2944_v14 }
0x15c2   :  { %v2911_v1 = vpop.xlane.xlu1 %2910 }
0x15c3   :  { %v2913_v3 = vmul.f32 0.03125, %v2911_v1  ;;  %v6422_v1 = vld [vmem:[%s9001_s3 + $0x298] sm:$0xff] }
0x15c4   :  { %v2908_v5 = vpop.xlane.xlu0 %2907  ;;  %7285 = vmatprep.subr.mxu0 %v6422_v1 }
0x15c5   :  { %v2915_v6 = vsub.f32 %v2903_v60, %v2913_v3  ;;  %v2912_v7 = vmul.f32 0.03125, %v2908_v5  ;;  %v6434_v3 = vld [vmem:[%s9001_s3 + $0x318] sm:$0xff]  ;;  %v6421_v5 = vld [vmem:[%s9001_s3 + $0x290] sm:$0xff] }
0x15c6   :  { %7303 = vmatprep.subr.mxu1 %v6434_v3 }
0x15c7   :  { %v2914_v8 = vsub.f32 %v2902_v62, %v2912_v7  ;;  %v2917_v9 = vmul.f32 %v2915_v6, %v2915_v6  ;;  %v6420_v7 = vld [vmem:[%s9001_s3 + $0x288] sm:$0xff] }
0x15c9   :  { %v2921_v10 = vsel %vm50_vm0, %v2917_v9, 0.0  ;;  %v2916_v11 = vmul.f32 %v2914_v8, %v2914_v8  ;;  %v6419_v9 = vld [vmem:[%s9001_s3 + $0x280] sm:$0xff] }
0x15ca   :  { %2922 = vadd.xlane.f32.xlu1 %v2921_v10  ;;  %v6431_v10 = vld [vmem:[%s9001_s3 + $0x300] sm:$0xff] }
0x15cb   :  { %v2918_v17 = vsel %vm50_vm0, %v2916_v11, 0.0 }
0x15cc   :  { %2919 = vadd.xlane.f32.xlu0 %v2918_v17 }
0x1653   :  { %v2923_v22 = vpop.xlane.xlu1 %2922 }
0x1654   :  { %v2925_v23 = vmul.f32 0.03125, %v2923_v22  ;;  %v6418_v22 = vld [vmem:[%s9001_s3 + $0x27d] ss:$0 sm:$0xff] }
0x1655   :  { %v2920_v26 = vpop.xlane.xlu0 %2919 }
0x1656   :  { %v2927_v27 = vadd.f32 1e-05, %v2925_v23  ;;  %v2924_v28 = vmul.f32 0.03125, %v2920_v26 }
0x1658   :  { %7675 = vrsqrt.f32 %v2927_v27  ;;  %v2926_v29 = vadd.f32 1e-05, %v2924_v28 }
0x165a   :  { %7677 = vrsqrt.f32 %v2926_v29 }
0x1665   :  { %v7676_v30 = vpop.eup %7675 }
0x1666   :  { %v2931_v25 = vmul.f32 %v7676_v30, %v2915_v6  ;;  %v6433_v6 = vld [vmem:[%s9001_s3 + $0x310] sm:$0xff]  ;;  %v6440_v30 = vld [vmem:[%s9001_s3 + $0x2b8] sm:$0xff] }
0x1667   :  { %v7678_v31 = vpop.eup %7677 }
0x1668   :  { %v2930_v24 = vmul.f32 %v7678_v31, %v2914_v8  ;;  %v2937_v32 = vmul.f32 %v6409_v18, %v2931_v25  ;;  %v6432_v8 = vld [vmem:[%s9001_s3 + $0x308] sm:$0xff]  ;;  %v6424_v25 = vld [vmem:[%s9001_s3 + $0x4e0] ss:$0 sm:$0xff] }
0x166a   :  { %v2936_v34 = vmul.f32 %v6409_v18, %v2930_v24  ;;  %v2943_v36 = vadd.f32 %v6410_v33, %v2937_v32 }
0x166c   :  { %v2942_v35 = vadd.f32 %v6410_v33, %v2936_v34  ;;  %v6439_v33 = vld [vmem:[%s9001_s3 + $0x2b0] sm:$0xff]  ;;  %v6438_v34 = vld [vmem:[%s9001_s3 + $0x2a8] sm:$0xff] }
0x166e   :  { %7263 = vmatprep.mubr.msk.f32.mxu0 %vm50_vm0, %v2942_v35 }
0x166f   :  { %7264 = vmatmul.mubr.msk.f32.vlgmr.msra.gmra.mxu0 %vm50_vm0, %v2943_v36 }
0x1670   :  { %7286 = vmatpush3.msra.mxu0 %v6422_v1 }
0x1671   :  { %7287 = vmatprep.subr.mxu0 %v6421_v5 }
0x1672   :  { %7288 = vmatpush3.msra.mxu0 %v6421_v5 }
0x1673   :  { %7289 = vmatprep.subr.mxu0 %v6420_v7 }
0x1674   :  { %7290 = vmatpush3.msra.mxu0 %v6420_v7 }
0x1675   :  { %7291 = vmatprep.subr.mxu0 %v6419_v9 }
0x1676   :  { %7292 = vmatpush3.msra.mxu0 %v6419_v9 }
0x172f   :  { %v7265_v42 = vpop.f32.mrf.mxu0 }
0x1730   :  { %v3031_v43 = vadd.f32 %v7265_v42, %v6411_v41  ;;  %v6460_v42 = vld [vmem:[%s9001_s3 + $0x2c8] sm:$0xff] }
0x1731   :  { %v3025_v63 = vpop.f32.mrf.mxu0 }
0x1732   :  { %v3026_v45 = vadd.f32 %v6411_v41, %v3025_v63  ;;  %v3035_v48 = vmax.f32 %v3031_v43, 0.0  ;;  %v6461_v41 = vld [vmem:[%s9001_s3 + $0x2d0] sm:$0xff]  ;;  %v6459_v43 = vld [vmem:[%s9001_s3 + $0x2c0] sm:$0xff]  ;;  %v6474_v63 = vld [vmem:[%s9001_s3 + $0x358] sm:$0xff] }
0x1734   :  { %v3034_v44 = vmax.f32 %v3026_v45, 0.0  ;;  %v6473_v45 = vld [vmem:[%s9001_s3 + $0x350] sm:$0xff] }
0x1736   :  { %7282 = vmatprep.mubr.msk.f32.mxu1 %vm3049_vm2, %v3034_v44  ;;  %v6472_v44 = vld [vmem:[%s9001_s3 + $0x348] sm:$0xff] }
0x1737   :  { %7283 = vmatmul.mubr.msk.f32.vlgmr.msra.gmra.mxu1 %vm3049_vm2, %v3035_v48  ;;  %v6471_v48 = vld [vmem:[%s9001_s3 + $0x340] sm:$0xff] }
0x1738   :  { %7304 = vmatpush3.msra.mxu1 %v6434_v3 }
0x1739   :  { %7305 = vmatprep.subr.mxu1 %v6433_v6 }
0x173a   :  { %7306 = vmatpush3.msra.mxu1 %v6433_v6 }
0x173b   :  { %7307 = vmatprep.subr.mxu1 %v6432_v8 }
0x173c   :  { %7308 = vmatpush3.msra.mxu1 %v6432_v8 }
0x173d   :  { %7309 = vmatprep.subr.mxu1 %v6431_v10 }
0x173e   :  { %7310 = vmatpush3.msra.mxu1 %v6431_v10 }
0x17f7   :  { %v7284_v47 = vpop.f32.mrf.mxu1 }
0x17f8   :  { %v3128_v49 = vadd.f32 %v7284_v47, %v6414_v46 }
0x17f9   :  { %v3122_v50 = vpop.f32.mrf.mxu1 }
0x17fa   :  { %v3123_v51 = vadd.f32 %v6414_v46, %v3122_v50  ;;  %v3132_v52 = vadd.f32 %v3128_v49, %v2943_v36  ;;  %v6452_v36 = vld [vmem:[%s9001_s3 + $0x338] sm:$0xff]  ;;  %v6442_v50 = vld [vmem:[%s9001_s3 + $0x4e1] ss:$0 sm:$0xff] }
0x17fc   :  { %v3138_v53 = vsel %vm50_vm0, %v3132_v52, 0.0  ;;  %v3131_v54 = vadd.f32 %v3123_v51, %v2942_v35  ;;  %v6437_v35 = vld [vmem:[%s9001_s3 + $0x2a0] sm:$0xff] }
0x17fd   :  { %3139 = vadd.xlane.f32.xlu1 %v3138_v53 }
0x17fe   :  { %v3135_v55 = vsel %vm50_vm0, %v3131_v54, 0.0 }
0x17ff   :  { %3136 = vadd.xlane.f32.xlu0 %v3135_v55 }
0x1886   :  { %v3140_v56 = vpop.xlane.xlu1 %3139 }
0x1887   :  { %v3142_v57 = vmul.f32 0.03125, %v3140_v56 }
0x1888   :  { %v3137_v58 = vpop.xlane.xlu0 %3136 }
0x1889   :  { %v3144_v59 = vsub.f32 %v3132_v52, %v3142_v57  ;;  %v3141_v4 = vmul.f32 0.03125, %v3137_v58 }
0x188b   :  { %v3143_v2 = vsub.f32 %v3131_v54, %v3141_v4  ;;  %v3146_v60 = vmul.f32 %v3144_v59, %v3144_v59 }
0x188d   :  { %v3150_v61 = vsel %vm50_vm0, %v3146_v60, 0.0  ;;  %v3145_v62 = vmul.f32 %v3143_v2, %v3143_v2 }
0x188e   :  { %3151 = vadd.xlane.f32.xlu1 %v3150_v61  ;;  %v8565_v61 = vld [vmem:[%s9000_s2] sm:$0xff] }
0x188f   :  { %v3147_v0 = vsel %vm50_vm0, %v3145_v62, 0.0 }
0x1890   :  { %3148 = vadd.xlane.f32.xlu0 %v3147_v0 }
0x1917   :  { %v3152_v11 = vpop.xlane.xlu1 %3151 }
0x1918   :  { %v3154_v17 = vmul.f32 0.03125, %v3152_v11 }
0x1919   :  { %v3149_v16 = vpop.xlane.xlu0 %3148 }
0x191a   :  { %v3156_v12 = vadd.f32 1e-05, %v3154_v17  ;;  %v3153_v13 = vmul.f32 0.03125, %v3149_v16 }
0x191c   :  { %7679 = vrsqrt.f32 %v3156_v12  ;;  %v3155_v14 = vadd.f32 1e-05, %v3153_v13 }
0x191e   :  { %7681 = vrsqrt.f32 %v3155_v14 }
0x1929   :  { %v7680_v15 = vpop.eup %7679 }
0x192a   :  { %v3160_v20 = vmul.f32 %v7680_v15, %v3144_v59  ;;  %v8558_v59 = vld [vmem:[%s9000_s2 + $0x8] sm:$0xff] }
0x192b   :  { %v7682_v21 = vpop.eup %7681 }
0x192c   :  { %v3166_v23 = vmul.f32 %v6417_v19, %v3160_v20  ;;  %v3159_v26 = vmul.f32 %v7682_v21, %v3143_v2 }
0x192e   :  { %v8440_v27 = vadd.f32 %v6418_v22, %v3166_v23  ;;  %v3165_v28 = vmul.f32 %v6417_v19, %v3159_v26 }
0x1930   :  { %v8442_v29 = vadd.f32 %v6418_v22, %v3165_v28  ;;  %7296 = vmatprep.subr.msk.mxu0 %vm50_vm0, %v8440_v27  ;;  %7325 = vmatprep.subr.msk.mxu1 %vm50_vm0, %v8440_v27 }
0x1932   :  { %7293 = vmatprep.mubr.msk.f32.mxu0 %vm50_vm0, %v8442_v29  ;;  %7311 = vmatprep.mubr.msk.f32.mxu1 %vm50_vm0, %v8442_v29 }
0x1933   :  { %7294 = vmatmul.mubr.msk.f32.vlgmr.msra.gmra.mxu0 %vm50_vm0, %v8440_v27  ;;  %7312 = vmatmul.mubr.msk.f32.vlgmr.msra.gmra.mxu1 %vm50_vm0, %v8440_v27 }
0x1934   :  { %7297 = vmatpush3.xpose.msk.msra.mxu0 %vm50_vm0, %v8440_v27  ;;  %7326 = vmatpush3.xpose.msk.msra.mxu1 %vm50_vm0, %v8440_v27 }
0x1935   :  { %7298 = vmatprep.subr.msk.mxu0 %vm50_vm0, %v8442_v29  ;;  %7327 = vmatprep.subr.msk.mxu1 %vm50_vm0, %v8442_v29 }
0x1938   :  { %7299 = vmatpush3.xpose.msk.msra.mxu0 %vm50_vm0, %v8442_v29  ;;  %7328 = vmatpush3.xpose.msk.msra.mxu1 %vm50_vm0, %v8442_v29 }
0x1939   :  { %7314 = vmatprep.subr.mxu0 %v6440_v30 }
0x19f3   :  { %v7295_v18 = vpop.f32.mrf.mxu0  ;;  %v8550_v56 = vpop.f32.mrf.mxu1 }
0x19f4   :  { %v3261_v32 = vadd.f32 %v7295_v18, %v6424_v25 }
0x19f5   :  { %v3255_v31 = vpop.f32.mrf.mxu0  ;;  %v8553_v57 = vpop.f32.mrf.mxu1 }
0x19f6   :  { %v3256_v24 = vadd.f32 %v6424_v25, %v3255_v31 }
0x19f8   :  { %7300 = vmatprep.mubr.msk.f32.mxu0 %vm50_vm0, %v3256_v24 }
0x19f9   :  { %7301 = vmatmul.mubr.msk.f32.vlgmr.msra.gmra.mxu0 %vm50_vm0, %v3261_v32 }
0x19fa   :  { %7315 = vmatpush3.msra.mxu0 %v6440_v30  ;;  %7322 = vmatprep.mubr.msk.f32.mxu0 %vm50_vm0, %v8442_v29 }
0x19fb   :  { %7316 = vmatprep.subr.mxu0 %v6439_v33 }
0x19fc   :  { %7317 = vmatpush3.msra.mxu0 %v6439_v33 }
0x19fd   :  { %7318 = vmatprep.subr.mxu0 %v6438_v34 }
0x19fe   :  { %7319 = vmatpush3.msra.mxu0 %v6438_v34 }
0x19ff   :  { %7320 = vmatprep.subr.mxu0 %v6437_v35 }
0x1a00   :  { %7321 = vmatpush3.msra.mxu0 %v6437_v35 }
0x1a01   :  { %7323 = vmatmul.mubr.msk.f32.vlgmr.msra.gmra.mxu0 %vm50_vm0, %v8440_v27  ;;  %7332 = vmatprep.subr.mxu0 %v6452_v36 }
0x1a02   :  { %7333 = vmatpush3.msra.mxu0 %v6452_v36  ;;  %7340 = vmatprep.mubr.msk.f32.mxu0 %vm50_vm0, %v8442_v29 }
0x1a03   :  { %7334 = vmatprep.subr.mxu0 %v6451_v37 }
0x1a04   :  { %7335 = vmatpush3.msra.mxu0 %v6451_v37 }
0x1a05   :  { %7336 = vmatprep.subr.mxu0 %v6450_v38 }
0x1a06   :  { %7337 = vmatpush3.msra.mxu0 %v6450_v38 }
0x1a07   :  { %7338 = vmatprep.subr.mxu0 %v6449_v39 }
0x1a08   :  { %7339 = vmatpush3.msra.mxu0 %v6449_v39 }
0x1a09   :  { %7341 = vmatmul.mubr.msk.f32.vlgmr.msra.gmra.mxu0 %vm50_vm0, %v8440_v27  ;;  %7357 = vmatprep.subr.mxu0 %v6462_v40 }
0x1a0a   :  { %7358 = vmatpush3.msra.mxu0 %v6462_v40  ;;  %7365 = vmatprep.mubr.msk.f32.mxu0 %vm50_vm0, %v8442_v29 }
0x1a0b   :  { %7359 = vmatprep.subr.mxu0 %v6461_v41 }
0x1a0c   :  { %7360 = vmatpush3.msra.mxu0 %v6461_v41 }
0x1a0d   :  { %7361 = vmatprep.subr.mxu0 %v6460_v42 }
0x1a0e   :  { %7362 = vmatpush3.msra.mxu0 %v6460_v42  ;;  %v6464_v42 = vld [vmem:[%s9001_s3 + $0x4e2] ss:$0 sm:$0xff] }
0x1a0f   :  { %7363 = vmatprep.subr.mxu0 %v6459_v43 }
0x1a10   :  { %7364 = vmatpush3.msra.mxu0 %v6459_v43 }
0x1a11   :  { %7366 = vmatmul.mubr.msk.f32.vlgmr.msra.gmra.mxu0 %vm50_vm0, %v8440_v27  ;;  %7375 = vmatprep.subr.mxu0 %v6474_v63 }
0x1a12   :  { %7376 = vmatpush3.msra.mxu0 %v6474_v63  ;;  %7383 = vmatprep.mubr.msk.f32.mxu0 %vm50_vm0, %v8442_v29 }
0x1a13   :  { %7377 = vmatprep.subr.mxu0 %v6473_v45 }
0x1a14   :  { %7378 = vmatpush3.msra.mxu0 %v6473_v45 }
0x1a15   :  { %7379 = vmatprep.subr.mxu0 %v6472_v44 }
0x1a16   :  { %7380 = vmatpush3.msra.mxu0 %v6472_v44 }
0x1a17   :  { %7381 = vmatprep.subr.mxu0 %v6471_v48 }
0x1a18   :  { %7382 = vmatpush3.msra.mxu0 %v6471_v48 }
0x1a19   :  { %7384 = vmatmul.mubr.msk.f32.vlgmr.msra.gmra.mxu0 %vm50_vm0, %v8440_v27  ;;  %7404 = vmatprep.subr.msk.mxu0 %vm50_vm0, %v8440_v27 }
0x1a1a   :  { %7405 = vmatpush3.xpose.msk.msra.mxu0 %vm50_vm0, %v8440_v27 }
0x1a1b   :  { %7406 = vmatprep.subr.msk.mxu0 %vm50_vm0, %v8442_v29 }
0x1a1e   :  { %7407 = vmatpush3.xpose.msk.msra.mxu0 %vm50_vm0, %v8442_v29 }
0x1ab9   :  { %v7302_v46 = vpop.f32.mrf.mxu0 }
0x1aba   :  { %v3342_v60 = vadd.f32 %v8558_v59, %v7302_v46 }
0x1abb   :  { %v3336_v47 = vpop.f32.mrf.mxu0 }
0x1abc   :  { %v3337_v1 = vadd.f32 %v8565_v61, %v3336_v47  ;;  %v3348_v5 = vsel %vm213_vm1, %v3342_v60, -inf }
0x1abe   :  { %v3345_v6 = vsel %vm213_vm1, %v3337_v1, -inf }
0x1ac1   :  { %v7324_v49 = vpop.f32.mrf.mxu0 }
0x1ac2   :  { %v3527_v53 = vadd.f32 %v7324_v49, %v6442_v50 }
0x1ac3   :  { %v3521_v51 = vpop.f32.mrf.mxu0 }
0x1ac4   :  { %v3522_v52 = vadd.f32 %v6442_v50, %v3521_v51 }
0x1ac6   :  { %7329 = vmatprep.mubr.msk.f32.mxu1 %vm50_vm0, %v3522_v52 }
0x1ac7   :  { %7330 = vmatmul.mubr.msk.f32.vlgmr.msra.gmra.mxu1 %vm50_vm0, %v3527_v53 }
0x1ac9   :  { %v7342_v54 = vpop.f32.mrf.mxu0 }
0x1aca   :  { %7343 = vmatprep.subr.mxu1 %v7342_v54 }
0x1acb   :  { %v3703_v55 = vpop.f32.mrf.mxu0  ;;  %7344 = vmatpush3.msra.mxu1 %v7342_v54 }
0x1acc   :  { %7345 = vmatprep.subr.mxu1 %v3703_v55 }
0x1acd   :  { %7346 = vmatpush3.msra.mxu1 %v3703_v55 }
0x1ace   :  { %7350 = vmatprep.subr.mxu1 %v8550_v56 }
0x1ad1   :  { %v7367_v35 = vpop.f32.mrf.mxu0 }
0x1ad2   :  { %v3955_v44 = vadd.f32 %v7367_v35, %v6464_v42 }
0x1ad3   :  { %v3949_v40 = vpop.f32.mrf.mxu0 }
0x1ad4   :  { %v3950_v63 = vadd.f32 %v6464_v42, %v3949_v40 }
0x1ad9   :  { %v7385_v45 = vpop.f32.mrf.mxu0 }
0x1adb   :  { %v4131_v48 = vpop.f32.mrf.mxu0 }
0x1b87   :  { %v7331_v58 = vpop.f32.mrf.mxu1 }
0x1b88   :  { %v3608_v4 = vadd.f32 %v8558_v59, %v7331_v58 }
0x1b89   :  { %v3602_v2 = vpop.f32.mrf.mxu1 }
0x1b8a   :  { %v3603_v62 = vadd.f32 %v8565_v61, %v3602_v2  ;;  %v3614_v0 = vsel %vm213_vm1, %v3608_v4, -inf }
0x1b8b   :  { %3615 = vmax.xlane.f32.xlu1 %v3614_v0 }
0x1b8c   :  { %v3611_v3 = vsel %vm213_vm1, %v3603_v62, -inf }
0x1b8d   :  { %3612 = vmax.xlane.f32.xlu0 %v3611_v3 }
0x1b8f   :  { %3349 = vmax.xlane.f32.xlu1 %v3348_v5 }
0x1b91   :  { %3346 = vmax.xlane.f32.xlu0 %v3345_v6 }
0x1c14   :  { %v3616_v7 = vpop.xlane.xlu1 %3615 }
0x1c15   :  { %v3618_v8 = vsub.f32 %v3608_v4, %v3616_v7 }
0x1c16   :  { %v3613_v9 = vpop.xlane.xlu0 %3612 }
0x1c17   :  { %v3621_v10 = vmul.f32 1.442695, %v3618_v8  ;;  %v3617_v11 = vsub.f32 %v3603_v62, %v3613_v9  ;;  %v6482_v8 = vld [vmem:[%s9001_s3 + $0x2f8] sm:$0xff] }
0x1c18   :  { %v3350_v17 = vpop.xlane.xlu1 %3349 }
0x1c19   :  { %7683 = vpow2.f32 %v3621_v10  ;;  %v3619_v16 = vmul.f32 1.442695, %v3617_v11  ;;  %v3352_v12 = vsub.f32 %v3342_v60, %v3350_v17 }
0x1c1a   :  { %v3347_v13 = vpop.xlane.xlu0 %3346 }
0x1c1b   :  { %7685 = vpow2.f32 %v3619_v16  ;;  %v3355_v14 = vmul.f32 1.442695, %v3352_v12  ;;  %v3351_v15 = vsub.f32 %v3337_v1, %v3347_v13  ;;  %v6481_v13 = vld [vmem:[%s9001_s3 + $0x2f0] sm:$0xff] }
0x1c1d   :  { %7687 = vpow2.f32 %v3355_v14  ;;  %v3353_v19 = vmul.f32 1.442695, %v3351_v15  ;;  %v6480_v14 = vld [vmem:[%s9001_s3 + $0x2e8] sm:$0xff]  ;;  %v6479_v15 = vld [vmem:[%s9001_s3 + $0x2e0] sm:$0xff] }
0x1c1f   :  { %7689 = vpow2.f32 %v3353_v19  ;;  %v6494_v19 = vld [vmem:[%s9001_s3 + $0x378] sm:$0xff] }
0x1c26   :  { %v7684_v20 = vpop.eup %7683 }
0x1c27   :  { %v3626_v21 = vsel %vm213_vm1, %v7684_v20, 0.0 }
0x1c28   :  { %v7686_v22 = vpop.eup %7685  ;;  %3627 = vadd.xlane.f32.xlu1 %v3626_v21  ;;  %v6492_v21 = vld [vmem:[%s9001_s3 + $0x368] sm:$0xff] }
0x1c29   :  { %v3623_v23 = vsel %vm213_vm1, %v7686_v22, 0.0 }
0x1c2a   :  { %v7688_v26 = vpop.eup %7687  ;;  %3624 = vadd.xlane.f32.xlu0 %v3623_v23  ;;  %v8644_v23 = vld [vmem:[%s8999_s1 + $0x8] sm:$0xff] }
0x1c2b   :  { %v3360_v28 = vsel %vm213_vm1, %v7688_v26, 0.0 }
0x1c2c   :  { %v7690_v30 = vpop.eup %7689  ;;  %3361 = vadd.xlane.f32.xlu1 %v3360_v28 }
0x1c2d   :  { %v3357_v18 = vsel %vm213_vm1, %v7690_v30, 0.0 }
0x1c2e   :  { %3358 = vadd.xlane.f32.xlu0 %v3357_v18 }
0x1cb1   :  { %v3628_v25 = vpop.xlane.xlu1 %3627 }
0x1cb2   :  { %7691 = vrcp.f32 %v3628_v25 }
0x1cb3   :  { %v3625_v31 = vpop.xlane.xlu0 %3624 }
0x1cb4   :  { %7693 = vrcp.f32 %v3625_v31 }
0x1cb5   :  { %v3362_v24 = vpop.xlane.xlu1 %3361 }
0x1cb6   :  { %7695 = vrcp.f32 %v3362_v24  ;;  %v6484_v24 = vld [vmem:[%s9001_s3 + $0x4e3] ss:$0 sm:$0xff] }
0x1cb7   :  { %v3359_v32 = vpop.xlane.xlu0 %3358 }
0x1cb8   :  { %7697 = vrcp.f32 %v3359_v32 }
0x1cbf   :  { %v7692_v33 = vpop.eup %7691 }
0x1cc0   :  { %v3632_v37 = vmul.f32 %v7692_v33, %v7684_v20  ;;  %v6493_v20 = vld [vmem:[%s9001_s3 + $0x370] sm:$0xff] }
0x1cc1   :  { %v7694_v34 = vpop.eup %7693 }
0x1cc2   :  { %v3631_v36 = vmul.f32 %v7694_v34, %v7686_v22  ;;  %v6491_v22 = vld [vmem:[%s9001_s3 + $0x360] sm:$0xff] }
0x1cc3   :  { %v7696_v38 = vpop.eup %7695 }
0x1cc4   :  { %7347 = vmatprep.mubr.msk.f32.mxu1 %vm213_vm1, %v3631_v36  ;;  %v3366_v43 = vmul.f32 %v7696_v38, %v7688_v26  ;;  %v8653_v26 = vld [vmem:[%s8999_s1] sm:$0xff] }
0x1cc5   :  { %v7698_v39 = vpop.eup %7697  ;;  %7348 = vmatmul.mubr.msk.f32.vlgmr.msra.gmra.mxu1 %vm213_vm1, %v3632_v37 }
0x1cc6   :  { %7351 = vmatpush3.msra.mxu1 %v8550_v56  ;;  %v3365_v41 = vmul.f32 %v7698_v39, %v7690_v30 }
0x1cc7   :  { %7352 = vmatprep.subr.mxu1 %v8553_v57 }
0x1cc8   :  { %7353 = vmatpush3.msra.mxu1 %v8553_v57  ;;  %7354 = vmatprep.mubr.msk.f32.mxu1 %vm213_vm1, %v3365_v41 }
0x1cc9   :  { %7368 = vmatprep.subr.msk.mxu1 %vm50_vm0, %v8440_v27  ;;  %7355 = vmatmul.mubr.msk.f32.vlgmr.msra.gmra.mxu1 %vm213_vm1, %v3366_v43 }
0x1cca   :  { %7369 = vmatpush3.xpose.msk.msra.mxu1 %vm50_vm0, %v8440_v27  ;;  %7372 = vmatprep.mubr.msk.f32.mxu1 %vm50_vm0, %v3950_v63 }
0x1ccb   :  { %7370 = vmatprep.subr.msk.mxu1 %vm50_vm0, %v8442_v29 }
0x1cce   :  { %7371 = vmatpush3.xpose.msk.msra.mxu1 %vm50_vm0, %v8442_v29 }
0x1ccf   :  { %7386 = vmatprep.subr.mxu1 %v7385_v45 }
0x1cd1   :  { %7373 = vmatmul.mubr.msk.f32.vlgmr.msra.gmra.mxu1 %vm50_vm0, %v3955_v44 }
0x1cd2   :  { %7387 = vmatpush3.msra.mxu1 %v7385_v45 }
0x1cd3   :  { %7388 = vmatprep.subr.mxu1 %v4131_v48 }
0x1cd4   :  { %7389 = vmatpush3.msra.mxu1 %v4131_v48 }
0x1cd5   :  { %7393 = vmatprep.subr.mxu1 %v6482_v8 }
0x1d85   :  { %v7349_v46 = vpop.f32.mrf.mxu1 }
0x1d87   :  { %v3784_v47 = vpop.f32.mrf.mxu1 }
0x1d89   :  { %v7356_v49 = vpop.f32.mrf.mxu1 }
0x1d8a   :  { %v8597_v50 = vadd.f32 %v7356_v49, %v7349_v46 }
0x1d8b   :  { %v3865_v51 = vpop.f32.mrf.mxu1 }
0x1d8c   :  { %v8599_v52 = vadd.f32 %v3865_v51, %v3784_v47 }
0x1d91   :  { %v7374_v53 = vpop.f32.mrf.mxu1 }
0x1d92   :  { %v4036_v54 = vadd.f32 %v8558_v59, %v7374_v53 }
0x1d93   :  { %v4030_v55 = vpop.f32.mrf.mxu1 }
0x1d94   :  { %v4031_v56 = vadd.f32 %v8565_v61, %v4030_v55  ;;  %v4042_v57 = vsel %vm213_vm1, %v4036_v54, -inf }
0x1d95   :  { %4043 = vmax.xlane.f32.xlu1 %v4042_v57  ;;  %v6500_v57 = vld [vmem:[%s9001_s3 + $0x4e4] ss:$0 sm:$0xff] }
0x1d96   :  { %v4039_v58 = vsel %vm213_vm1, %v4031_v56, -inf }
0x1d97   :  { %4040 = vmax.xlane.f32.xlu0 %v4039_v58 }
0x1e1e   :  { %v4044_v4 = vpop.xlane.xlu1 %4043 }
0x1e1f   :  { %v4046_v2 = vsub.f32 %v4036_v54, %v4044_v4 }
0x1e20   :  { %v4041_v60 = vpop.xlane.xlu0 %4040 }
0x1e21   :  { %v4049_v62 = vmul.f32 1.442695, %v4046_v2  ;;  %v4045_v0 = vsub.f32 %v4031_v56, %v4041_v60 }
0x1e23   :  { %7699 = vpow2.f32 %v4049_v62  ;;  %v4047_v1 = vmul.f32 1.442695, %v4045_v0 }
0x1e25   :  { %7701 = vpow2.f32 %v4047_v1 }
0x1e30   :  { %v7700_v3 = vpop.eup %7699 }
0x1e31   :  { %v4054_v5 = vsel %vm213_vm1, %v7700_v3, 0.0 }
0x1e32   :  { %v7702_v6 = vpop.eup %7701  ;;  %4055 = vadd.xlane.f32.xlu1 %v4054_v5 }
0x1e33   :  { %v4051_v7 = vsel %vm213_vm1, %v7702_v6, 0.0 }
0x1e34   :  { %4052 = vadd.xlane.f32.xlu0 %v4051_v7 }
0x1ebb   :  { %v4056_v9 = vpop.xlane.xlu1 %4055 }
0x1ebc   :  { %7703 = vrcp.f32 %v4056_v9 }
0x1ebd   :  { %v4053_v10 = vpop.xlane.xlu0 %4052 }
0x1ebe   :  { %7705 = vrcp.f32 %v4053_v10 }
0x1ec9   :  { %v7704_v11 = vpop.eup %7703 }
0x1eca   :  { %v4060_v12 = vmul.f32 %v7704_v11, %v7700_v3 }
0x1ecb   :  { %v7706_v17 = vpop.eup %7705 }
0x1ecc   :  { %v4059_v16 = vmul.f32 %v7706_v17, %v7702_v6 }
0x1ece   :  { %7390 = vmatprep.mubr.msk.f32.mxu1 %vm213_vm1, %v4059_v16 }
0x1ecf   :  { %7391 = vmatmul.mubr.msk.f32.vlgmr.msra.gmra.mxu1 %vm213_vm1, %v4060_v12 }
0x1ed0   :  { %7394 = vmatpush3.msra.mxu1 %v6482_v8  ;;  %7401 = vmatprep.mubr.msk.f32.mxu1 %vm50_vm0, %v8442_v29 }
0x1ed1   :  { %7395 = vmatprep.subr.mxu1 %v6481_v13 }
0x1ed2   :  { %7396 = vmatpush3.msra.mxu1 %v6481_v13  ;;  %v6507_v13 = vld [vmem:[%s9001_s3 + $0x390] sm:$0xff] }
0x1ed3   :  { %7397 = vmatprep.subr.mxu1 %v6480_v14 }
0x1ed4   :  { %7398 = vmatpush3.msra.mxu1 %v6480_v14  ;;  %v6506_v14 = vld [vmem:[%s9001_s3 + $0x388] sm:$0xff] }
0x1ed5   :  { %7399 = vmatprep.subr.mxu1 %v6479_v15 }
0x1ed6   :  { %7400 = vmatpush3.msra.mxu1 %v6479_v15  ;;  %v6505_v15 = vld [vmem:[%s9001_s3 + $0x380] sm:$0xff] }
0x1ed7   :  { %7402 = vmatmul.mubr.msk.f32.vlgmr.msra.gmra.mxu1 %vm50_vm0, %v8440_v27  ;;  %7411 = vmatprep.subr.mxu1 %v6494_v19 }
0x1ed8   :  { %7412 = vmatpush3.msra.mxu1 %v6494_v19  ;;  %7419 = vmatprep.mubr.msk.f32.mxu1 %vm50_vm0, %v8442_v29 }
0x1ed9   :  { %7413 = vmatprep.subr.mxu1 %v6493_v20 }
0x1eda   :  { %7414 = vmatpush3.msra.mxu1 %v6493_v20 }
0x1edb   :  { %7415 = vmatprep.subr.mxu1 %v6492_v21 }
0x1edc   :  { %7416 = vmatpush3.msra.mxu1 %v6492_v21 }
0x1edd   :  { %7417 = vmatprep.subr.mxu1 %v6491_v22 }
0x1ede   :  { %7418 = vmatpush3.msra.mxu1 %v6491_v22 }
0x1edf   :  { %7420 = vmatmul.mubr.msk.f32.vlgmr.msra.gmra.mxu1 %vm50_vm0, %v8440_v27  ;;  %7440 = vmatprep.subr.msk.mxu1 %vm50_vm0, %v8644_v23 }
0x1ee0   :  { %7441 = vmatpush3.xpose.msk.msra.mxu1 %vm50_vm0, %v8644_v23 }
0x1ee1   :  { %7442 = vmatprep.subr.msk.mxu1 %vm50_vm0, %v8653_v26 }
0x1ee4   :  { %7443 = vmatpush3.xpose.msk.msra.mxu1 %vm50_vm0, %v8653_v26 }
0x1f8f   :  { %v7392_v28 = vpop.f32.mrf.mxu1 }
0x1f90   :  { %v4222_v30 = vadd.f32 %v7392_v28, %v8597_v50 }
0x1f91   :  { %v4212_v18 = vpop.f32.mrf.mxu1 }
0x1f92   :  { %v4221_v25 = vadd.f32 %v4212_v18, %v8599_v52 }
0x1f97   :  { %v7403_v31 = vpop.f32.mrf.mxu1 }
0x1f98   :  { %v4304_v34 = vadd.f32 %v7403_v31, %v6484_v24  ;;  %v6503_v31 = vld [vmem:[%s9001_s3 + $0x4f8] ss:$0 sm:$0xff] }
0x1f99   :  { %v4298_v32 = vpop.f32.mrf.mxu1 }
0x1f9a   :  { %v4299_v33 = vadd.f32 %v6484_v24, %v4298_v32 }
0x1f9c   :  { %7408 = vmatprep.mubr.msk.f32.mxu0 %vm50_vm0, %v4299_v33 }
0x1f9d   :  { %7409 = vmatmul.mubr.msk.f32.vlgmr.msra.gmra.mxu0 %vm50_vm0, %v4304_v34  ;;  %v6504_v34 = vld [vmem:[%s9001_s3 + $0x4f9] ss:$0 sm:$0xff] }
0x1f9f   :  { %v7421_v35 = vpop.f32.mrf.mxu1 }
0x1fa0   :  { %7422 = vmatprep.subr.mxu0 %v7421_v35 }
0x1fa1   :  { %v4480_v36 = vpop.f32.mrf.mxu1  ;;  %7423 = vmatpush3.msra.mxu0 %v7421_v35 }
0x1fa2   :  { %7424 = vmatprep.subr.mxu0 %v4480_v36 }
0x1fa3   :  { %7425 = vmatpush3.msra.mxu0 %v4480_v36 }
0x205d   :  { %v7410_v37 = vpop.f32.mrf.mxu0 }
0x205e   :  { %v4385_v38 = vadd.f32 %v8558_v59, %v7410_v37 }
0x205f   :  { %v4379_v39 = vpop.f32.mrf.mxu0 }
0x2060   :  { %v4380_v40 = vadd.f32 %v8565_v61, %v4379_v39  ;;  %v4391_v41 = vsel %vm213_vm1, %v4385_v38, -inf  ;;  %v6520_v39 = vld [vmem:[%s9001_s3 + $0x418] sm:$0xff] }
0x2061   :  { %4392 = vmax.xlane.f32.xlu1 %v4391_v41  ;;  %v6518_v41 = vld [vmem:[%s9001_s3 + $0x408] sm:$0xff] }
0x2062   :  { %v4388_v42 = vsel %vm213_vm1, %v4380_v40, -inf }
0x2063   :  { %4389 = vmax.xlane.f32.xlu0 %v4388_v42 }
0x20ea   :  { %v4393_v43 = vpop.xlane.xlu1 %4392 }
0x20eb   :  { %v4395_v63 = vsub.f32 %v4385_v38, %v4393_v43  ;;  %v6526_v38 = vld [vmem:[%s9001_s3 + $0x3b8] sm:$0xff]  ;;  %v6510_v43 = vld [vmem:[%s9001_s3 + $0x4e8] ss:$0 sm:$0xff] }
0x20ec   :  { %v4390_v45 = vpop.xlane.xlu0 %4389  ;;  %7458 = vmatprep.subr.mxu1 %v6526_v38 }
0x20ed   :  { %v4398_v44 = vmul.f32 1.442695, %v4395_v63  ;;  %v4394_v48 = vsub.f32 %v4380_v40, %v4390_v45  ;;  %v6519_v40 = vld [vmem:[%s9001_s3 + $0x410] sm:$0xff] }
0x20ef   :  { %7707 = vpow2.f32 %v4398_v44  ;;  %v4396_v46 = vmul.f32 1.442695, %v4394_v48  ;;  %v6525_v48 = vld [vmem:[%s9001_s3 + $0x3b0] sm:$0xff] }
0x20f1   :  { %7709 = vpow2.f32 %v4396_v46  ;;  %v6524_v46 = vld [vmem:[%s9001_s3 + $0x3a8] sm:$0xff] }
0x20fc   :  { %v7708_v47 = vpop.eup %7707 }
0x20fd   :  { %v4403_v59 = vsel %vm213_vm1, %v7708_v47, 0.0 }
0x20fe   :  { %v7710_v49 = vpop.eup %7709  ;;  %4404 = vadd.xlane.f32.xlu1 %v4403_v59  ;;  %v6517_v59 = vld [vmem:[%s9001_s3 + $0x400] sm:$0xff] }
0x20ff   :  { %v4400_v61 = vsel %vm213_vm1, %v7710_v49, 0.0 }
0x2100   :  { %4401 = vadd.xlane.f32.xlu0 %v4400_v61  ;;  %v6537_v61 = vld [vmem:[%s9001_s3 + $0x430] sm:$0xff] }
0x2187   :  { %v4405_v50 = vpop.xlane.xlu1 %4404 }
0x2188   :  { %7711 = vrcp.f32 %v4405_v50  ;;  %v6536_v50 = vld [vmem:[%s9001_s3 + $0x428] sm:$0xff] }
0x2189   :  { %v4402_v51 = vpop.xlane.xlu0 %4401 }
0x218a   :  { %7713 = vrcp.f32 %v4402_v51  ;;  %v6535_v51 = vld [vmem:[%s9001_s3 + $0x420] sm:$0xff] }
0x2195   :  { %v7712_v52 = vpop.eup %7711 }
0x2196   :  { %v4409_v55 = vmul.f32 %v7712_v52, %v7708_v47  ;;  %v6523_v47 = vld [vmem:[%s9001_s3 + $0x3a0] sm:$0xff] }
0x2197   :  { %v7714_v53 = vpop.eup %7713 }
0x2198   :  { %v4408_v54 = vmul.f32 %v7714_v53, %v7710_v49  ;;  %v6538_v49 = vld [vmem:[%s9001_s3 + $0x438] sm:$0xff] }
0x219a   :  { %7426 = vmatprep.mubr.msk.f32.mxu0 %vm213_vm1, %v4408_v54 }
0x219b   :  { %7427 = vmatmul.mubr.msk.f32.vlgmr.msra.gmra.mxu0 %vm213_vm1, %v4409_v55  ;;  %v6528_v55 = vld [vmem:[%s9001_s3 + $0x4e9] ss:$0 sm:$0xff] }
0x225b   :  { %v7428_v56 = vpop.f32.mrf.mxu0 }
0x225c   :  { %v4571_v58 = vadd.f32 %v7428_v56, %v4222_v30 }
0x225d   :  { %v4561_v4 = vpop.f32.mrf.mxu0 }
0x225e   :  { %v4578_v2 = vadd.f32 %v6500_v57, %v4571_v58  ;;  %v4570_v60 = vadd.f32 %v4561_v4, %v4221_v25 }
0x2260   :  { %v4577_v62 = vadd.f32 %v6500_v57, %v4570_v60  ;;  %v4580_v0 = vadd.f32 %v4578_v2, %v8440_v27 }
0x2262   :  { %v4586_v1 = vsel %vm50_vm0, %v4580_v0, 0.0  ;;  %v4579_v3 = vadd.f32 %v4577_v62, %v8442_v29  ;;  %v6508_v29 = vld [vmem:[%s9001_s3 + $0x398] sm:$0xff] }
0x2263   :  { %4587 = vadd.xlane.f32.xlu1 %v4586_v1  ;;  %7429 = vmatprep.subr.mxu0 %v6508_v29  ;;  %v8780_v62 = vld [vmem:[%s9000_s2 + $0x18] sm:$0xff] }
0x2264   :  { %v4583_v5 = vsel %vm50_vm0, %v4579_v3, 0.0  ;;  %7430 = vmatpush3.msra.mxu0 %v6508_v29 }
0x2265   :  { %4584 = vadd.xlane.f32.xlu0 %v4583_v5  ;;  %7431 = vmatprep.subr.mxu0 %v6507_v13 }
0x2266   :  { %7432 = vmatpush3.msra.mxu0 %v6507_v13 }
0x2267   :  { %7433 = vmatprep.subr.mxu0 %v6506_v14 }
0x2268   :  { %7434 = vmatpush3.msra.mxu0 %v6506_v14 }
0x2269   :  { %7435 = vmatprep.subr.mxu0 %v6505_v15 }
0x226a   :  { %7436 = vmatpush3.msra.mxu0 %v6505_v15 }
0x226b   :  { %7447 = vmatprep.subr.mxu0 %v6520_v39 }
0x22ec   :  { %v4588_v6 = vpop.xlane.xlu1 %4587 }
0x22ed   :  { %v4590_v7 = vmul.f32 0.03125, %v4588_v6 }
0x22ee   :  { %v4585_v8 = vpop.xlane.xlu0 %4584 }
0x22ef   :  { %v4592_v9 = vsub.f32 %v4580_v0, %v4590_v7  ;;  %v4589_v10 = vmul.f32 0.03125, %v4585_v8 }
0x22f1   :  { %v4591_v11 = vsub.f32 %v4579_v3, %v4589_v10  ;;  %v4594_v17 = vmul.f32 %v4592_v9, %v4592_v9  ;;  %v8786_v3 = vld [vmem:[%s9000_s2 + $0x10] sm:$0xff] }
0x22f3   :  { %v4598_v16 = vsel %vm50_vm0, %v4594_v17, 0.0  ;;  %v4593_v12 = vmul.f32 %v4591_v11, %v4591_v11 }
0x22f4   :  { %4599 = vadd.xlane.f32.xlu1 %v4598_v16 }
0x22f5   :  { %v4595_v27 = vsel %vm50_vm0, %v4593_v12, 0.0 }
0x22f6   :  { %4596 = vadd.xlane.f32.xlu0 %v4595_v27 }
0x237d   :  { %v4600_v19 = vpop.xlane.xlu1 %4599 }
0x237e   :  { %v4602_v20 = vmul.f32 0.03125, %v4600_v19 }
0x237f   :  { %v4597_v21 = vpop.xlane.xlu0 %4596 }
0x2380   :  { %v4604_v22 = vadd.f32 1e-05, %v4602_v20  ;;  %v4601_v28 = vmul.f32 0.03125, %v4597_v21 }
0x2382   :  { %7715 = vrsqrt.f32 %v4604_v22  ;;  %v4603_v30 = vadd.f32 1e-05, %v4601_v28  ;;  %v6548_v28 = vld [vmem:[%s9001_s3 + $0x3d8] sm:$0xff] }
0x2384   :  { %7717 = vrsqrt.f32 %v4603_v30 }
0x238f   :  { %v7716_v18 = vpop.eup %7715 }
0x2390   :  { %v4608_v25 = vmul.f32 %v7716_v18, %v4592_v9 }
0x2391   :  { %v7718_v24 = vpop.eup %7717 }
0x2392   :  { %v4607_v32 = vmul.f32 %v7718_v24, %v4591_v11  ;;  %v4614_v33 = vmul.f32 %v6503_v31, %v4608_v25 }
0x2394   :  { %v4613_v35 = vmul.f32 %v6503_v31, %v4607_v32  ;;  %v8703_v37 = vadd.f32 %v6504_v34, %v4614_v33 }
0x2396   :  { %v8701_v36 = vadd.f32 %v6504_v34, %v4613_v35 }
0x2398   :  { %7437 = vmatprep.mubr.msk.f32.mxu0 %vm50_vm0, %v8701_v36 }
0x2399   :  { %7438 = vmatmul.mubr.msk.f32.vlgmr.msra.gmra.mxu0 %vm50_vm0, %v8703_v37 }
0x239a   :  { %7455 = vmatprep.mubr.msk.f32.mxu0 %vm50_vm0, %v8653_v26  ;;  %7448 = vmatpush3.msra.mxu0 %v6520_v39 }
0x239b   :  { %7449 = vmatprep.subr.mxu0 %v6519_v40 }
0x239c   :  { %7450 = vmatpush3.msra.mxu0 %v6519_v40 }
0x239d   :  { %7451 = vmatprep.subr.mxu0 %v6518_v41 }
0x239e   :  { %7452 = vmatpush3.msra.mxu0 %v6518_v41  ;;  %v6547_v41 = vld [vmem:[%s9001_s3 + $0x3d0] sm:$0xff] }
0x239f   :  { %7453 = vmatprep.subr.mxu0 %v6517_v59 }
0x23a0   :  { %7454 = vmatpush3.msra.mxu0 %v6517_v59 }
0x23a1   :  { %7456 = vmatmul.mubr.msk.f32.vlgmr.msra.gmra.mxu0 %vm50_vm0, %v8644_v23  ;;  %7469 = vmatprep.subr.msk.mxu0 %vm50_vm0, %v8644_v23 }
0x23a2   :  { %7470 = vmatpush3.xpose.msk.msra.mxu0 %vm50_vm0, %v8644_v23 }
0x23a3   :  { %7471 = vmatprep.subr.msk.mxu0 %vm50_vm0, %v8653_v26 }
0x23a6   :  { %7472 = vmatpush3.xpose.msk.msra.mxu0 %vm50_vm0, %v8653_v26 }
0x2459   :  { %v7439_v42 = vpop.f32.mrf.mxu0 }
0x245a   :  { %v4708_v44 = vadd.f32 %v7439_v42, %v6510_v43  ;;  %v6546_v42 = vld [vmem:[%s9001_s3 + $0x3c8] sm:$0xff] }
0x245b   :  { %v4702_v63 = vpop.f32.mrf.mxu0 }
0x245c   :  { %v4703_v45 = vadd.f32 %v6510_v43, %v4702_v63 }
0x245e   :  { %7444 = vmatprep.mubr.msk.f32.mxu1 %vm50_vm0, %v4703_v45  ;;  %v6545_v45 = vld [vmem:[%s9001_s3 + $0x3c0] sm:$0xff] }
0x245f   :  { %7445 = vmatmul.mubr.msk.f32.vlgmr.msra.gmra.mxu1 %vm50_vm0, %v4708_v44 }
0x2460   :  { %7459 = vmatpush3.msra.mxu1 %v6526_v38  ;;  %7466 = vmatprep.mubr.msk.f32.mxu1 %vm50_vm0, %v8701_v36 }
0x2461   :  { %7460 = vmatprep.subr.mxu1 %v6525_v48  ;;  %v7457_v4 = vpop.f32.mrf.mxu0 }
0x2462   :  { %7461 = vmatpush3.msra.mxu1 %v6525_v48 }
0x2463   :  { %7462 = vmatprep.subr.mxu1 %v6524_v46  ;;  %v4884_v2 = vpop.f32.mrf.mxu0 }
0x2464   :  { %7463 = vmatpush3.msra.mxu1 %v6524_v46 }
0x2465   :  { %7464 = vmatprep.subr.mxu1 %v6523_v47 }
0x2466   :  { %7465 = vmatpush3.msra.mxu1 %v6523_v47 }
0x2467   :  { %7467 = vmatmul.mubr.msk.f32.vlgmr.msra.gmra.mxu1 %vm50_vm0, %v8703_v37  ;;  %7476 = vmatprep.subr.mxu1 %v6538_v49 }
0x2468   :  { %7484 = vmatprep.mubr.msk.f32.mxu1 %vm50_vm0, %v8653_v26  ;;  %7477 = vmatpush3.msra.mxu1 %v6538_v49 }
0x2469   :  { %7478 = vmatprep.subr.mxu1 %v6537_v61 }
0x246a   :  { %7479 = vmatpush3.msra.mxu1 %v6537_v61 }
0x246b   :  { %7480 = vmatprep.subr.mxu1 %v6536_v50 }
0x246c   :  { %7481 = vmatpush3.msra.mxu1 %v6536_v50 }
0x246d   :  { %7482 = vmatprep.subr.mxu1 %v6535_v51 }
0x246e   :  { %7483 = vmatpush3.msra.mxu1 %v6535_v51 }
0x246f   :  { %7485 = vmatmul.mubr.msk.f32.vlgmr.msra.gmra.mxu1 %vm50_vm0, %v8644_v23  ;;  %7494 = vmatprep.subr.mxu1 %v7457_v4 }
0x2470   :  { %7495 = vmatpush3.msra.mxu1 %v7457_v4  ;;  %v6559_v4 = vld [vmem:[%s9001_s3 + $0x450] sm:$0xff] }
0x2471   :  { %7496 = vmatprep.subr.mxu1 %v4884_v2 }
0x2472   :  { %7497 = vmatpush3.msra.mxu1 %v4884_v2  ;;  %v6558_v2 = vld [vmem:[%s9001_s3 + $0x448] sm:$0xff] }
0x2473   :  { %7512 = vmatprep.subr.msk.mxu1 %vm50_vm0, %v8644_v23 }
0x251f   :  { %v7446_v52 = vpop.f32.mrf.mxu1 }
0x2520   :  { %v4789_v27 = vadd.f32 %v8780_v62, %v7446_v52 }
0x2521   :  { %v4783_v53 = vpop.f32.mrf.mxu1 }
0x2522   :  { %v4784_v14 = vadd.f32 %v8786_v3, %v4783_v53  ;;  %v4795_v19 = vsel %vm213_vm1, %v4789_v27, -inf }
0x2524   :  { %v4792_v20 = vsel %vm213_vm1, %v4784_v14, -inf }
0x2527   :  { %v7468_v54 = vpop.f32.mrf.mxu1 }
0x2528   :  { %v4974_v58 = vadd.f32 %v7468_v54, %v6528_v55  ;;  %v6550_v54 = vld [vmem:[%s9001_s3 + $0x4ea] ss:$0 sm:$0xff] }
0x2529   :  { %v4968_v56 = vpop.f32.mrf.mxu1 }
0x252a   :  { %v4969_v57 = vadd.f32 %v6528_v55, %v4968_v56 }
0x252c   :  { %7473 = vmatprep.mubr.msk.f32.mxu0 %vm50_vm0, %v4969_v57 }
0x252d   :  { %7474 = vmatmul.mubr.msk.f32.vlgmr.msra.gmra.mxu0 %vm50_vm0, %v4974_v58  ;;  %v6560_v58 = vld [vmem:[%s9001_s3 + $0x458] sm:$0xff] }
0x252f   :  { %v7486_v21 = vpop.f32.mrf.mxu1 }
0x2530   :  { %7487 = vmatprep.subr.mxu0 %v7486_v21 }
0x2531   :  { %v5150_v22 = vpop.f32.mrf.mxu1  ;;  %7488 = vmatpush3.msra.mxu0 %v7486_v21 }
0x2532   :  { %7489 = vmatprep.subr.mxu0 %v5150_v22 }
0x2533   :  { %7490 = vmatpush3.msra.mxu0 %v5150_v22  ;;  %v6568_v22 = vld [vmem:[%s9001_s3 + $0x3f8] sm:$0xff] }
0x2534   :  { %7501 = vmatprep.subr.mxu0 %v6548_v28 }
0x25ed   :  { %v7475_v60 = vpop.f32.mrf.mxu0 }
0x25ee   :  { %v5055_v0 = vadd.f32 %v8780_v62, %v7475_v60  ;;  %v6557_v60 = vld [vmem:[%s9001_s3 + $0x440] sm:$0xff] }
0x25ef   :  { %v5049_v1 = vpop.f32.mrf.mxu0 }
0x25f0   :  { %v5050_v5 = vadd.f32 %v8786_v3, %v5049_v1  ;;  %v5061_v6 = vsel %vm213_vm1, %v5055_v0, -inf }
0x25f1   :  { %5062 = vmax.xlane.f32.xlu1 %v5061_v6 }
0x25f2   :  { %v5058_v7 = vsel %vm213_vm1, %v5050_v5, -inf }
0x25f3   :  { %5059 = vmax.xlane.f32.xlu0 %v5058_v7 }
0x267a   :  { %v5063_v8 = vpop.xlane.xlu1 %5062 }
0x267b   :  { %v5065_v9 = vsub.f32 %v5055_v0, %v5063_v8 }
0x267c   :  { %v5060_v10 = vpop.xlane.xlu0 %5059 }
0x267d   :  { %v5068_v11 = vmul.f32 1.442695, %v5065_v9  ;;  %v5064_v17 = vsub.f32 %v5050_v5, %v5060_v10 }
0x267f   :  { %7719 = vpow2.f32 %v5068_v11  ;;  %v5066_v16 = vmul.f32 1.442695, %v5064_v17 }
0x2681   :  { %7721 = vpow2.f32 %v5066_v16 }
0x268c   :  { %v7720_v12 = vpop.eup %7719 }
0x268d   :  { %v5073_v29 = vsel %vm213_vm1, %v7720_v12, 0.0 }
0x268e   :  { %v7722_v13 = vpop.eup %7721  ;;  %5074 = vadd.xlane.f32.xlu1 %v5073_v29 }
0x268f   :  { %v5070_v15 = vsel %vm213_vm1, %v7722_v13, 0.0 }
0x2690   :  { %5071 = vadd.xlane.f32.xlu0 %v5070_v15 }
0x2692   :  { %4796 = vmax.xlane.f32.xlu1 %v4795_v19 }
0x2694   :  { %4793 = vmax.xlane.f32.xlu0 %v4792_v20 }
0x2717   :  { %v5075_v30 = vpop.xlane.xlu1 %5074 }
0x2718   :  { %7723 = vrcp.f32 %v5075_v30 }
0x2719   :  { %v5072_v18 = vpop.xlane.xlu0 %5071 }
0x271a   :  { %7725 = vrcp.f32 %v5072_v18 }
0x271b   :  { %v4797_v25 = vpop.xlane.xlu1 %4796 }
0x271c   :  { %v4799_v31 = vsub.f32 %v4789_v27, %v4797_v25 }
0x271d   :  { %v4794_v24 = vpop.xlane.xlu0 %4793 }
0x271e   :  { %v4802_v32 = vmul.f32 1.442695, %v4799_v31  ;;  %v4798_v33 = vsub.f32 %v4784_v14, %v4794_v24 }
0x2720   :  { %7727 = vpow2.f32 %v4802_v32  ;;  %v4800_v34 = vmul.f32 1.442695, %v4798_v33  ;;  %v6567_v32 = vld [vmem:[%s9001_s3 + $0x3f0] sm:$0xff]  ;;  %v6566_v33 = vld [vmem:[%s9001_s3 + $0x3e8] sm:$0xff] }
0x2722   :  { %7729 = vpow2.f32 %v4800_v34  ;;  %v6565_v34 = vld [vmem:[%s9001_s3 + $0x3e0] sm:$0xff] }
0x2725   :  { %v7724_v35 = vpop.eup %7723 }
0x2726   :  { %v5079_v40 = vmul.f32 %v7724_v35, %v7720_v12 }
0x2727   :  { %v7726_v38 = vpop.eup %7725 }
0x2728   :  { %v5078_v39 = vmul.f32 %v7726_v38, %v7722_v13 }
0x272a   :  { %7491 = vmatprep.mubr.msk.f32.mxu0 %vm213_vm1, %v5078_v39 }
0x272b   :  { %7492 = vmatmul.mubr.msk.f32.vlgmr.msra.gmra.mxu0 %vm213_vm1, %v5079_v40 }
0x272c   :  { %7502 = vmatpush3.msra.mxu0 %v6548_v28  ;;  %7509 = vmatprep.mubr.msk.f32.mxu0 %vm50_vm0, %v8701_v36 }
0x272d   :  { %v7728_v43 = vpop.eup %7727  ;;  %7503 = vmatprep.subr.mxu0 %v6547_v41 }
0x272e   :  { %7504 = vmatpush3.msra.mxu0 %v6547_v41  ;;  %v4807_v63 = vsel %vm213_vm1, %v7728_v43, 0.0 }
0x272f   :  { %v7730_v44 = vpop.eup %7729  ;;  %7505 = vmatprep.subr.mxu0 %v6546_v42  ;;  %4808 = vadd.xlane.f32.xlu1 %v4807_v63  ;;  %v6570_v63 = vld [vmem:[%s9001_s3 + $0x4eb] ss:$0 sm:$0xff] }
0x2730   :  { %7506 = vmatpush3.msra.mxu0 %v6546_v42  ;;  %v4804_v48 = vsel %vm213_vm1, %v7730_v44, 0.0 }
0x2731   :  { %7507 = vmatprep.subr.mxu0 %v6545_v45  ;;  %4805 = vadd.xlane.f32.xlu0 %v4804_v48 }
0x2732   :  { %7508 = vmatpush3.msra.mxu0 %v6545_v45 }
0x2733   :  { %7510 = vmatmul.mubr.msk.f32.vlgmr.msra.gmra.mxu0 %vm50_vm0, %v8703_v37  ;;  %7519 = vmatprep.subr.mxu0 %v6560_v58 }
0x2734   :  { %7527 = vmatprep.mubr.msk.f32.mxu0 %vm50_vm0, %v8653_v26  ;;  %7520 = vmatpush3.msra.mxu0 %v6560_v58 }
0x2735   :  { %7521 = vmatprep.subr.mxu0 %v6559_v4 }
0x2736   :  { %7522 = vmatpush3.msra.mxu0 %v6559_v4 }
0x2737   :  { %7523 = vmatprep.subr.mxu0 %v6558_v2 }
0x2738   :  { %7524 = vmatpush3.msra.mxu0 %v6558_v2 }
0x2739   :  { %7525 = vmatprep.subr.mxu0 %v6557_v60 }
0x273a   :  { %7526 = vmatpush3.msra.mxu0 %v6557_v60 }
0x273b   :  { %7528 = vmatmul.mubr.msk.f32.vlgmr.msra.gmra.mxu0 %vm50_vm0, %v8644_v23  ;;  %7548 = vmatprep.subr.msk.mxu0 %vm50_vm0, %v8644_v23 }
0x273c   :  { %7549 = vmatpush3.xpose.msk.msra.mxu0 %vm50_vm0, %v8644_v23 }
0x273d   :  { %7550 = vmatprep.subr.msk.mxu0 %vm50_vm0, %v8653_v26 }
0x2740   :  { %7551 = vmatpush3.xpose.msk.msra.mxu0 %vm50_vm0, %v8653_v26 }
0x27b8   :  { %v4809_v46 = vpop.xlane.xlu1 %4808 }
0x27b9   :  { %7731 = vrcp.f32 %v4809_v46  ;;  %v6579_v46 = vld [vmem:[%s9001_s3 + $0x470] sm:$0xff] }
0x27ba   :  { %v4806_v47 = vpop.xlane.xlu0 %4805 }
0x27bb   :  { %7733 = vrcp.f32 %v4806_v47  ;;  %v6578_v47 = vld [vmem:[%s9001_s3 + $0x468] sm:$0xff] }
0x27c6   :  { %v7732_v59 = vpop.eup %7731 }
0x27c7   :  { %v4813_v50 = vmul.f32 %v7732_v59, %v7728_v43  ;;  %v6577_v59 = vld [vmem:[%s9001_s3 + $0x460] sm:$0xff] }
0x27c8   :  { %v7734_v49 = vpop.eup %7733 }
0x27c9   :  { %v4812_v61 = vmul.f32 %v7734_v49, %v7730_v44 }
0x27cb   :  { %7498 = vmatprep.mubr.msk.f32.mxu1 %vm213_vm1, %v4812_v61 }
0x27cc   :  { %7499 = vmatmul.mubr.msk.f32.vlgmr.msra.gmra.mxu1 %vm213_vm1, %v4813_v50 }
0x27cd   :  { %7513 = vmatpush3.xpose.msk.msra.mxu1 %vm50_vm0, %v8644_v23 }
0x27ce   :  { %7514 = vmatprep.subr.msk.mxu1 %vm50_vm0, %v8653_v26 }
0x27d1   :  { %7515 = vmatpush3.xpose.msk.msra.mxu1 %vm50_vm0, %v8653_v26 }
0x27eb   :  { %v8827_v51 = vpop.f32.mrf.mxu0 }
0x27ed   :  { %v8829_v52 = vpop.f32.mrf.mxu0 }
0x27f3   :  { %v7511_v53 = vpop.f32.mrf.mxu0 }
0x27f4   :  { %v5402_v57 = vadd.f32 %v7511_v53, %v6550_v54 }
0x27f5   :  { %v5396_v55 = vpop.f32.mrf.mxu0 }
0x27f6   :  { %v5397_v56 = vadd.f32 %v6550_v54, %v5396_v55 }
0x27f8   :  { %7516 = vmatprep.mubr.msk.f32.mxu1 %vm50_vm0, %v5397_v56 }
0x27f9   :  { %7517 = vmatmul.mubr.msk.f32.vlgmr.msra.gmra.mxu1 %vm50_vm0, %v5402_v57 }
0x27fb   :  { %v7529_v20 = vpop.f32.mrf.mxu0 }
0x27fc   :  { %7530 = vmatprep.subr.mxu1 %v7529_v20 }
0x27fd   :  { %v5578_v21 = vpop.f32.mrf.mxu0  ;;  %7531 = vmatpush3.msra.mxu1 %v7529_v20 }
0x27fe   :  { %7532 = vmatprep.subr.mxu1 %v5578_v21 }
0x27ff   :  { %7533 = vmatpush3.msra.mxu1 %v5578_v21 }
0x2800   :  { %7537 = vmatprep.subr.mxu1 %v6568_v22 }
0x288c   :  { %v7500_v0 = vpop.f32.mrf.mxu1 }
0x288d   :  { %v5318_v35 = vadd.f32 %v7500_v0, %v8827_v51 }
0x288e   :  { %v5312_v1 = vpop.f32.mrf.mxu1 }
0x288f   :  { %v5313_v39 = vadd.f32 %v5312_v1, %v8829_v52 }
0x28b9   :  { %v7518_v5 = vpop.f32.mrf.mxu1 }
0x28ba   :  { %v5483_v6 = vadd.f32 %v8780_v62, %v7518_v5 }
0x28bb   :  { %v5477_v7 = vpop.f32.mrf.mxu1 }
0x28bc   :  { %v5478_v8 = vadd.f32 %v8786_v3, %v5477_v7  ;;  %v5489_v9 = vsel %vm213_vm1, %v5483_v6, -inf }
0x28bd   :  { %5490 = vmax.xlane.f32.xlu1 %v5489_v9 }
0x28be   :  { %v5486_v10 = vsel %vm213_vm1, %v5478_v8, -inf }
0x28bf   :  { %5487 = vmax.xlane.f32.xlu0 %v5486_v10 }
0x2946   :  { %v5491_v11 = vpop.xlane.xlu1 %5490 }
0x2947   :  { %v5493_v17 = vsub.f32 %v5483_v6, %v5491_v11  ;;  %v6586_v11 = vld [vmem:[%s9001_s3 + $0x4ec] ss:$0 sm:$0xff] }
0x2948   :  { %v5488_v16 = vpop.xlane.xlu0 %5487 }
0x2949   :  { %v5496_v12 = vmul.f32 1.442695, %v5493_v17  ;;  %v5492_v27 = vsub.f32 %v5478_v8, %v5488_v16 }
0x294b   :  { %7735 = vpow2.f32 %v5496_v12  ;;  %v5494_v29 = vmul.f32 1.442695, %v5492_v27 }
0x294d   :  { %7737 = vpow2.f32 %v5494_v29 }
0x2958   :  { %v7736_v13 = vpop.eup %7735 }
0x2959   :  { %v5501_v14 = vsel %vm213_vm1, %v7736_v13, 0.0 }
0x295a   :  { %v7738_v15 = vpop.eup %7737  ;;  %5502 = vadd.xlane.f32.xlu1 %v5501_v14 }
0x295b   :  { %v5498_v19 = vsel %vm213_vm1, %v7738_v15, 0.0 }
0x295c   :  { %5499 = vadd.xlane.f32.xlu0 %v5498_v19 }
0x29e3   :  { %v5503_v28 = vpop.xlane.xlu1 %5502 }
0x29e4   :  { %7739 = vrcp.f32 %v5503_v28 }
0x29e5   :  { %v5500_v30 = vpop.xlane.xlu0 %5499 }
0x29e6   :  { %7741 = vrcp.f32 %v5500_v30 }
0x29f1   :  { %v7740_v18 = vpop.eup %7739 }
0x29f2   :  { %v5507_v24 = vmul.f32 %v7740_v18, %v7736_v13 }
0x29f3   :  { %v7742_v25 = vpop.eup %7741 }
0x29f4   :  { %v5506_v31 = vmul.f32 %v7742_v25, %v7738_v15 }
0x29f6   :  { %7534 = vmatprep.mubr.msk.f32.mxu1 %vm213_vm1, %v5506_v31 }
0x29f7   :  { %7535 = vmatmul.mubr.msk.f32.vlgmr.msra.gmra.mxu1 %vm213_vm1, %v5507_v24 }
0x29f8   :  { %7538 = vmatpush3.msra.mxu1 %v6568_v22  ;;  %7545 = vmatprep.mubr.msk.f32.mxu1 %vm50_vm0, %v8701_v36 }
0x29f9   :  { %7539 = vmatprep.subr.mxu1 %v6567_v32 }
0x29fa   :  { %7540 = vmatpush3.msra.mxu1 %v6567_v32  ;;  %v6593_v32 = vld [vmem:[%s9001_s3 + $0x490] sm:$0xff] }
0x29fb   :  { %7541 = vmatprep.subr.mxu1 %v6566_v33 }
0x29fc   :  { %7542 = vmatpush3.msra.mxu1 %v6566_v33  ;;  %v6592_v33 = vld [vmem:[%s9001_s3 + $0x488] sm:$0xff] }
0x29fd   :  { %7543 = vmatprep.subr.mxu1 %v6565_v34 }
0x29fe   :  { %7544 = vmatpush3.msra.mxu1 %v6565_v34  ;;  %v6591_v34 = vld [vmem:[%s9001_s3 + $0x480] sm:$0xff] }
0x29ff   :  { %7546 = vmatmul.mubr.msk.f32.vlgmr.msra.gmra.mxu1 %vm50_vm0, %v8703_v37 }
0x2a00   :  { %7563 = vmatprep.mubr.msk.f32.mxu1 %vm50_vm0, %v8653_v26  ;;  %v6580_v26 = vld [vmem:[%s9001_s3 + $0x478] sm:$0xff] }
0x2a01   :  { %7555 = vmatprep.subr.mxu1 %v6580_v26 }
0x2a02   :  { %7556 = vmatpush3.msra.mxu1 %v6580_v26  ;;  %v6589_v26 = vld [vmem:[%s9001_s3 + $0x4fa] ss:$0 sm:$0xff] }
0x2a03   :  { %7557 = vmatprep.subr.mxu1 %v6579_v46 }
0x2a04   :  { %7558 = vmatpush3.msra.mxu1 %v6579_v46 }
0x2a05   :  { %7559 = vmatprep.subr.mxu1 %v6578_v47 }
0x2a06   :  { %7560 = vmatpush3.msra.mxu1 %v6578_v47 }
0x2a07   :  { %7561 = vmatprep.subr.mxu1 %v6577_v59 }
0x2a08   :  { %7562 = vmatpush3.msra.mxu1 %v6577_v59 }
0x2a09   :  { %7564 = vmatmul.mubr.msk.f32.vlgmr.msra.gmra.mxu1 %vm50_vm0, %v8644_v23 }
0x2ab7   :  { %v7536_v38 = vpop.f32.mrf.mxu1 }
0x2ab8   :  { %v8886_v40 = vadd.f32 %v7536_v38, %v5318_v35  ;;  %v6606_v35 = vld [vmem:[%s9001_s3 + $0x4d8] sm:$0xff]  ;;  %v6605_v38 = vld [vmem:[%s9001_s3 + $0x4d0] sm:$0xff] }
0x2ab9   :  { %v5659_v41 = vpop.f32.mrf.mxu1  ;;  %7584 = vmatprep.subr.mxu1 %v6606_v35 }
0x2aba   :  { %v8888_v42 = vadd.f32 %v5659_v41, %v5313_v39  ;;  %7585 = vmatpush3.msra.mxu1 %v6606_v35  ;;  %v6604_v39 = vld [vmem:[%s9001_s3 + $0x4c8] sm:$0xff] }
0x2abb   :  { %7586 = vmatprep.subr.mxu1 %v6605_v38 }
0x2abc   :  { %7587 = vmatpush3.msra.mxu1 %v6605_v38 }
0x2abd   :  { %7588 = vmatprep.subr.mxu1 %v6604_v39 }
0x2abe   :  { %7589 = vmatpush3.msra.mxu1 %v6604_v39 }
0x2abf   :  { %v7547_v43 = vpop.f32.mrf.mxu1 }
0x2ac0   :  { %v5751_v48 = vadd.f32 %v7547_v43, %v6570_v63 }
0x2ac1   :  { %v5745_v45 = vpop.f32.mrf.mxu1 }
0x2ac2   :  { %v5746_v44 = vadd.f32 %v6570_v63, %v5745_v45 }
0x2ac4   :  { %7552 = vmatprep.mubr.msk.f32.mxu0 %vm50_vm0, %v5746_v44 }
0x2ac5   :  { %7553 = vmatmul.mubr.msk.f32.vlgmr.msra.gmra.mxu0 %vm50_vm0, %v5751_v48 }
0x2ac9   :  { %v7565_v60 = vpop.f32.mrf.mxu1 }
0x2aca   :  { %7566 = vmatprep.subr.mxu0 %v7565_v60 }
0x2acb   :  { %v5927_v0 = vpop.f32.mrf.mxu1  ;;  %7567 = vmatpush3.msra.mxu0 %v7565_v60  ;;  %v6608_v60 = vld [vmem:[%s9001_s3 + $0x4f1] ss:$0 sm:$0xff] }
0x2acc   :  { %7568 = vmatprep.subr.mxu0 %v5927_v0 }
0x2acd   :  { %7569 = vmatpush3.msra.mxu0 %v5927_v0 }
0x2b85   :  { %v7554_v49 = vpop.f32.mrf.mxu0 }
0x2b86   :  { %v5832_v61 = vadd.f32 %v8780_v62, %v7554_v49 }
0x2b87   :  { %v5826_v50 = vpop.f32.mrf.mxu0 }
0x2b88   :  { %v5827_v51 = vadd.f32 %v8786_v3, %v5826_v50  ;;  %v5838_v52 = vsel %vm213_vm1, %v5832_v61, -inf }
0x2b89   :  { %5839 = vmax.xlane.f32.xlu1 %v5838_v52 }
0x2b8a   :  { %v5835_v53 = vsel %vm213_vm1, %v5827_v51, -inf }
0x2b8b   :  { %5836 = vmax.xlane.f32.xlu0 %v5835_v53  ;;  %v6602_v53 = vld [vmem:[%s9001_s3 + $0x4b8] sm:$0xff] }
0x2c12   :  { %v5840_v54 = vpop.xlane.xlu1 %5839 }
0x2c13   :  { %v5842_v55 = vsub.f32 %v5832_v61, %v5840_v54  ;;  %v6590_v61 = vld [vmem:[%s9001_s3 + $0x4fb] ss:$0 sm:$0xff]  ;;  %v6601_v54 = vld [vmem:[%s9001_s3 + $0x4b0] sm:$0xff] }
0x2c14   :  { %v5837_v56 = vpop.xlane.xlu0 %5836 }
0x2c15   :  { %v5845_v57 = vmul.f32 1.442695, %v5842_v55  ;;  %v5841_v58 = vsub.f32 %v5827_v51, %v5837_v56  ;;  %v6600_v55 = vld [vmem:[%s9001_s3 + $0x4a8] sm:$0xff]  ;;  %v6599_v56 = vld [vmem:[%s9001_s3 + $0x4a0] sm:$0xff] }
0x2c17   :  { %7743 = vpow2.f32 %v5845_v57  ;;  %v5843_v4 = vmul.f32 1.442695, %v5841_v58  ;;  %v6596_v57 = vld [vmem:[%s9001_s3 + $0x4f0] ss:$0 sm:$0xff] }
0x2c19   :  { %7745 = vpow2.f32 %v5843_v4 }
0x2c24   :  { %v7744_v23 = vpop.eup %7743 }
0x2c25   :  { %v5850_v62 = vsel %vm213_vm1, %v7744_v23, 0.0 }
0x2c26   :  { %v7746_v2 = vpop.eup %7745  ;;  %5851 = vadd.xlane.f32.xlu1 %v5850_v62 }
0x2c27   :  { %v5847_v3 = vsel %vm213_vm1, %v7746_v2, 0.0 }
0x2c28   :  { %5848 = vadd.xlane.f32.xlu0 %v5847_v3 }
0x2caf   :  { %v5852_v1 = vpop.xlane.xlu1 %5851 }
0x2cb0   :  { %7747 = vrcp.f32 %v5852_v1 }
0x2cb1   :  { %v5849_v5 = vpop.xlane.xlu0 %5848 }
0x2cb2   :  { %7749 = vrcp.f32 %v5849_v5 }
0x2cbd   :  { %v7748_v6 = vpop.eup %7747 }
0x2cbe   :  { %v5856_v9 = vmul.f32 %v7748_v6, %v7744_v23 }
0x2cbf   :  { %v7750_v7 = vpop.eup %7749 }
0x2cc0   :  { %v5855_v8 = vmul.f32 %v7750_v7, %v7746_v2 }
0x2cc2   :  { %7570 = vmatprep.mubr.msk.f32.mxu0 %vm213_vm1, %v5855_v8 }
0x2cc3   :  { %7571 = vmatmul.mubr.msk.f32.vlgmr.msra.gmra.mxu0 %vm213_vm1, %v5856_v9 }
0x2d83   :  { %v7572_v10 = vpop.f32.mrf.mxu0 }
0x2d84   :  { %v6018_v17 = vadd.f32 %v7572_v10, %v8886_v40  ;;  %v6603_v40 = vld [vmem:[%s9001_s3 + $0x4c0] sm:$0xff] }
0x2d85   :  { %v6008_v16 = vpop.f32.mrf.mxu0  ;;  %7590 = vmatprep.subr.mxu1 %v6603_v40 }
0x2d86   :  { %v6025_v12 = vadd.f32 %v6586_v11, %v6018_v17  ;;  %v6017_v27 = vadd.f32 %v6008_v16, %v8888_v42  ;;  %7591 = vmatpush3.msra.mxu1 %v6603_v40 }
0x2d87   :  { %7592 = vmatprep.subr.mxu1 %v6602_v53 }
0x2d88   :  { %v6024_v29 = vadd.f32 %v6586_v11, %v6017_v27  ;;  %v6027_v13 = vadd.f32 %v6025_v12, %v8703_v37  ;;  %7593 = vmatpush3.msra.mxu1 %v6602_v53 }
0x2d89   :  { %7594 = vmatprep.subr.mxu1 %v6601_v54 }
0x2d8a   :  { %v6033_v14 = vsel %vm50_vm0, %v6027_v13, 0.0  ;;  %v6026_v15 = vadd.f32 %v6024_v29, %v8701_v36  ;;  %v6594_v36 = vld [vmem:[%s9001_s3 + $0x498] sm:$0xff]  ;;  %7595 = vmatpush3.msra.mxu1 %v6601_v54 }
0x2d8b   :  { %6034 = vadd.xlane.f32.xlu1 %v6033_v14  ;;  %7573 = vmatprep.subr.mxu0 %v6594_v36 }
0x2d8c   :  { %v6030_v19 = vsel %vm50_vm0, %v6026_v15, 0.0  ;;  %7574 = vmatpush3.msra.mxu0 %v6594_v36  ;;  %7596 = vmatprep.subr.mxu1 %v6600_v55  ;;  %v6614_v36 = vld [vmem:[%s9001_s3 + $0x4fd] ss:$0 sm:$0xff] }
0x2d8d   :  { %6031 = vadd.xlane.f32.xlu0 %v6030_v19  ;;  %7575 = vmatprep.subr.mxu0 %v6593_v32 }
0x2d8e   :  { %7576 = vmatpush3.msra.mxu0 %v6593_v32  ;;  %7597 = vmatpush3.msra.mxu1 %v6600_v55 }
0x2d8f   :  { %7577 = vmatprep.subr.mxu0 %v6592_v33  ;;  %7598 = vmatprep.subr.mxu1 %v6599_v56 }
0x2d90   :  { %7578 = vmatpush3.msra.mxu0 %v6592_v33  ;;  %7599 = vmatpush3.msra.mxu1 %v6599_v56 }
0x2d91   :  { %7579 = vmatprep.subr.mxu0 %v6591_v34 }
0x2d92   :  { %7580 = vmatpush3.msra.mxu0 %v6591_v34 }
0x2e14   :  { %v6035_v20 = vpop.xlane.xlu1 %6034 }
0x2e15   :  { %v6037_v21 = vmul.f32 0.03125, %v6035_v20 }
0x2e16   :  { %v6032_v22 = vpop.xlane.xlu0 %6031 }
0x2e17   :  { %v6039_v28 = vsub.f32 %v6027_v13, %v6037_v21  ;;  %v6036_v30 = vmul.f32 0.03125, %v6032_v22 }
0x2e19   :  { %v6038_v18 = vsub.f32 %v6026_v15, %v6036_v30  ;;  %v6041_v25 = vmul.f32 %v6039_v28, %v6039_v28 }
0x2e1b   :  { %v6045_v31 = vsel %vm50_vm0, %v6041_v25, 0.0  ;;  %v6040_v24 = vmul.f32 %v6038_v18, %v6038_v18 }
0x2e1c   :  { %6046 = vadd.xlane.f32.xlu1 %v6045_v31  ;;  %v6613_v31 = vld [vmem:[%s9001_s3 + $0x4fc] ss:$0 sm:$0xff] }
0x2e1d   :  { %v6042_v37 = vsel %vm50_vm0, %v6040_v24, 0.0 }
0x2e1e   :  { %6043 = vadd.xlane.f32.xlu0 %v6042_v37 }
0x2ea5   :  { %v6047_v41 = vpop.xlane.xlu1 %6046 }
0x2ea6   :  { %v6049_v42 = vmul.f32 0.03125, %v6047_v41 }
0x2ea7   :  { %v6044_v43 = vpop.xlane.xlu0 %6043 }
0x2ea8   :  { %v6051_v63 = vadd.f32 1e-05, %v6049_v42  ;;  %v6048_v45 = vmul.f32 0.03125, %v6044_v43 }
0x2eaa   :  { %7751 = vrsqrt.f32 %v6051_v63  ;;  %v6050_v44 = vadd.f32 1e-05, %v6048_v45 }
0x2eac   :  { %7753 = vrsqrt.f32 %v6050_v44 }
0x2eb7   :  { %v7752_v48 = vpop.eup %7751 }
0x2eb8   :  { %v6055_v46 = vmul.f32 %v7752_v48, %v6039_v28 }
0x2eb9   :  { %v7754_v47 = vpop.eup %7753 }
0x2eba   :  { %v6054_v59 = vmul.f32 %v7754_v47, %v6038_v18  ;;  %v6061_v49 = vmul.f32 %v6589_v26, %v6055_v46 }
0x2ebc   :  { %v6060_v50 = vmul.f32 %v6589_v26, %v6054_v59  ;;  %v6067_v52 = vadd.f32 %v6590_v61, %v6061_v49 }
0x2ebe   :  { %v6066_v51 = vadd.f32 %v6590_v61, %v6060_v50 }
0x2ec0   :  { %7581 = vmatprep.mubr.msk.f32.mxu0 %vm50_vm0, %v6066_v51 }
0x2ec1   :  { %7582 = vmatmul.mubr.msk.f32.vlgmr.msra.gmra.mxu0 %vm50_vm0, %v6067_v52 }
0x2f81   :  { %v7583_v58 = vpop.f32.mrf.mxu0 }
0x2f82   :  { %v6155_v4 = vadd.f32 %v7583_v58, %v6596_v57 }
0x2f83   :  { %v6149_v23 = vpop.f32.mrf.mxu0 }
0x2f84   :  { %v6150_v62 = vadd.f32 %v6596_v57, %v6149_v23  ;;  %v6159_v3 = vmax.f32 %v6155_v4, 0.0 }
0x2f86   :  { %v6158_v2 = vmax.f32 %v6150_v62, 0.0 }
0x2f88   :  { %7600 = vmatprep.mubr.msk.f32.mxu1 %vm3049_vm2, %v6158_v2 }
0x2f89   :  { %7601 = vmatmul.mubr.msk.f32.vlgmr.msra.gmra.mxu1 %vm3049_vm2, %v6159_v3 }
0x3049   :  { %v7602_v0 = vpop.f32.mrf.mxu1 }
0x304a   :  { %v6251_v1 = vadd.f32 %v7602_v0, %v6608_v60 }
0x304b   :  { %v6245_v5 = vpop.f32.mrf.mxu1 }
0x304c   :  { %v6246_v6 = vadd.f32 %v6608_v60, %v6245_v5  ;;  %v6255_v7 = vadd.f32 %v6251_v1, %v6067_v52 }
0x304e   :  { %v6261_v8 = vsel %vm50_vm0, %v6255_v7, 0.0  ;;  %v6254_v9 = vadd.f32 %v6246_v6, %v6066_v51 }
0x304f   :  { %6262 = vadd.xlane.f32.xlu1 %v6261_v8 }
0x3050   :  { %v6258_v10 = vsel %vm50_vm0, %v6254_v9, 0.0 }
0x3051   :  { %6259 = vadd.xlane.f32.xlu0 %v6258_v10 }
0x30d8   :  { %v6263_v11 = vpop.xlane.xlu1 %6262 }
0x30d9   :  { %v6265_v17 = vmul.f32 0.03125, %v6263_v11 }
0x30da   :  { %v6260_v16 = vpop.xlane.xlu0 %6259 }
0x30db   :  { %v6267_v12 = vsub.f32 %v6255_v7, %v6265_v17  ;;  %v6264_v27 = vmul.f32 0.03125, %v6260_v16 }
0x30dd   :  { %v6266_v29 = vsub.f32 %v6254_v9, %v6264_v27  ;;  %v6269_v13 = vmul.f32 %v6267_v12, %v6267_v12 }
0x30df   :  { %v6273_v14 = vsel %vm50_vm0, %v6269_v13, 0.0  ;;  %v6268_v15 = vmul.f32 %v6266_v29, %v6266_v29 }
0x30e0   :  { %6274 = vadd.xlane.f32.xlu1 %v6273_v14 }
0x30e1   :  { %v6270_v19 = vsel %vm50_vm0, %v6268_v15, 0.0 }
0x30e2   :  { %6271 = vadd.xlane.f32.xlu0 %v6270_v19 }
0x3169   :  { %v6275_v20 = vpop.xlane.xlu1 %6274 }
0x316a   :  { %v6277_v21 = vmul.f32 0.03125, %v6275_v20 }
0x316b   :  { %v6272_v22 = vpop.xlane.xlu0 %6271 }
0x316c   :  { %v6279_v28 = vadd.f32 1e-05, %v6277_v21  ;;  %v6276_v30 = vmul.f32 0.03125, %v6272_v22 }
0x316e   :  { %7755 = vrsqrt.f32 %v6279_v28  ;;  %v6278_v18 = vadd.f32 1e-05, %v6276_v30 }
0x3170   :  { %7757 = vrsqrt.f32 %v6278_v18 }
0x317b   :  { %v7756_v25 = vpop.eup %7755 }
0x317c   :  { %v6283_v24 = vmul.f32 %v7756_v25, %v6267_v12 }
0x317d   :  { %v7758_v37 = vpop.eup %7757 }
0x317e   :  { %v6282_v32 = vmul.f32 %v7758_v37, %v6266_v29  ;;  %v6289_v33 = vmul.f32 %v6613_v31, %v6283_v24 }
0x3180   :  { %v6288_v34 = vmul.f32 %v6613_v31, %v6282_v32  ;;  %v6295_v35 = vadd.f32 %v6614_v36, %v6289_v33 }
0x3182   :  { %v6294_v38 = vadd.f32 %v6614_v36, %v6288_v34  ;;  %6297 = vst.msk [vmem:[#allocation5 + $0x8] sm:$0xff] %vm50_vm0, %v6295_v35 }
0x3184   :  { %6296 = vst.msk [vmem:[#allocation5] sm:$0xff] %vm50_vm0, %v6294_v38 }
0x3185   :  { %7796 = shalt.err (!%p7793_p9)
}
0x3186   :  { %6309 = dma.vmem_to_hbm [thread:$0]  %s6304_s13, 256, %s9002_s4, [#allocation4], %s7810_s18, %s7810_s18, %s7811_s19  }
0x3187   :  { %7807 = dma.done.wait [#allocation4], 256  }
0x3188   :  { %7808 = vsyncadd [#allocation4], 4294967040 }
0x3189   :  { %6313 = vsyncpa [#allocation3], 1 }
0x318a   :  { %6314 = vsyncpa [#allocation4], 1 }

</bundles_post_ra>
